<compile_context>
chip_gen: v5e
topology: v5e:2x2
jax: 0.10.0
libtpu: 0.0.40
codegen_flags: <defaults>
</compile_context>

<pallas_src>
import functools

import jax
import jax.numpy as jnp
from jax.experimental import pallas as pl
from jax.experimental.pallas import tpu as pltpu

BN_EPS = 1e-5


def _round_up(x, m):
    return (x + m - 1) // m * m


def _co_tile(cout):
    # Whole (unpadded) Cout when small; 128-lane tiles otherwise so large layers get
    # >=2 parallel output blocks (v7x megacore) and lane-dense stores.
    return cout if cout <= 128 else 128


# ---------------------------------------------------------------------------
# Kernel: direct conv (tap loop in-kernel) + folded-BN shift + ReLU, one store.
# ---------------------------------------------------------------------------
def _conv_bn_relu_kernel(x_ref, w_ref, shift_ref, o_ref, acc_ref, *, taps, stride, rows):
    # x_ref:     (1, L, Cin)      bf16   flattened padded image (one sample)
    # w_ref:     (KHW, Cin, TCo)  bf16   BN-scale-folded weights for this Cout tile
    # shift_ref: (1, TCo)         f32    folded bias/BN shift
    # o_ref:     (1, rows, TCo)           rows = Ho * Wp ("wide" rows, trimmed in glue)
    # acc_ref:   (rows, TCo)      f32    VMEM accumulator
    for t, off in enumerate(taps):
        if stride == 1:
            patch = x_ref[0, pl.ds(off, rows), :]
        else:
            patch = x_ref[0, pl.ds(off, rows, stride=stride), :]
        contrib = jnp.dot(patch, w_ref[t], preferred_element_type=jnp.float32)
        if t == 0:
            acc_ref[...] = contrib          # first tap writes (no zero-init pass)
        else:
            acc_ref[...] += contrib
    y = acc_ref[...] + shift_ref[...]       # (rows,TCo) + (1,TCo)
    o_ref[0] = jnp.maximum(y, 0.0).astype(o_ref.dtype)


# ---------------------------------------------------------------------------
# One-time parameter preparation: fold BN(eval) + conv bias, cast, pad.
# ---------------------------------------------------------------------------
def prepare_conv_bn_relu(p):
    """Fold BN(eval) + bias into conv weights once (inference weights are constant)."""
    W, b = p["W"], p["b"]                                   # W: (Cout, Cin, kh, kw)
    gamma, beta, rmean, rvar = p["gamma"], p["beta"], p["rmean"], p["rvar"]
    cout, cin, kh, kw = W.shape
    scale = gamma / jnp.sqrt(rvar + BN_EPS)
    shift = scale * (b - rmean) + beta
    w_taps = jnp.transpose(W, (2, 3, 1, 0)).reshape(kh * kw, cin, cout) * scale[None, None, :]
    tco = _co_tile(cout)
    cout_p = _round_up(cout, tco)
    # NOTE: BN scale multiplied in BEFORE the bf16 cast; extreme gamma/rvar could lose a
    # couple of mantissa bits — acceptable at the module's bf16-MXU tolerance.
    w_taps = jnp.pad(w_taps, ((0, 0), (0, 0), (0, cout_p - cout))).astype(jnp.bfloat16)
    shift = jnp.pad(shift, (0, cout_p - cout)).astype(jnp.float32).reshape(1, cout_p)
    return w_taps, shift


# ---------------------------------------------------------------------------
# NHWC forward (the fused op) and the NCHW PyTorch-parity wrapper.
# ---------------------------------------------------------------------------
def conv_bn_relu_nhwc(x, w_taps, shift, *, cout, kh, kw, padding, stride,
                      out_dtype=jnp.float32):
    """x: (N, H, W, Cin).  Returns (N, Ho, Wo, Cout).  Set out_dtype=bf16 when the
    consumer is another ConvBnRelu (it re-casts to bf16 anyway) to halve writeback."""
    N, H, W_, Cin = x.shape
    KHW, Cin2, cout_p = w_taps.shape
    assert KHW == kh * kw and Cin2 == Cin
    s = stride
    Ho = (H + 2 * padding - kh) // s + 1
    Wo = (W_ + 2 * padding - kw) // s + 1
    Hp = H + 2 * padding
    Wp = W_ + 2 * padding
    rows = Ho * Wp                                   # "wide" rows; cols >= Wo are scratch

    # Flat length needed so the last tap's (strided) window stays in bounds.
    l_need = (kh - 1) * Wp + (kw - 1) + s * (rows - 1) + 1
    extra = max(0, l_need - Hp * Wp)
    extra_h = (extra + Wp - 1) // Wp
    xp = jnp.pad(x.astype(jnp.bfloat16),
                 ((0, 0), (padding, padding + extra_h), (padding, padding), (0, 0)))
    L = (Hp + extra_h) * Wp
    x_flat = xp.reshape(N, L, Cin)                   # free row-major reshape

    tco = _co_tile(cout)
    assert cout_p == _round_up(cout, tco)
    n_co = cout_p // tco
    taps = tuple(ky * Wp + kx for ky in range(kh) for kx in range(kw))

    flops = 2 * N * rows * KHW * Cin * cout_p
    bytes_accessed = (x_flat.size * 2 + w_taps.size * 2 + shift.size * 4
                      + N * rows * cout_p * jnp.dtype(out_dtype).itemsize)

    wide = pl.pallas_call(
        functools.partial(_conv_bn_relu_kernel, taps=taps, stride=s, rows=rows),
        out_shape=jax.ShapeDtypeStruct((N, rows, cout_p), out_dtype),
        grid_spec=pltpu.PrefetchScalarGridSpec(
            num_scalar_prefetch=0,
            grid=(N, n_co),
            in_specs=[
                pl.BlockSpec((1, L, Cin), lambda n, j: (n, 0, 0)),        # resident over j
                pl.BlockSpec((KHW, Cin, tco), lambda n, j: (0, 0, j)),
                pl.BlockSpec((1, tco), lambda n, j: (0, j)),
            ],
            out_specs=pl.BlockSpec((1, rows, tco), lambda n, j: (n, 0, j)),
            scratch_shapes=[pltpu.VMEM((rows, tco), jnp.float32)],
        ),
        compiler_params=pltpu.CompilerParams(
            dimension_semantics=("parallel", "parallel")),
        cost_estimate=pl.CostEstimate(flops=flops, transcendentals=0,
                                      bytes_accessed=bytes_accessed),
    )(x_flat, w_taps, shift)

    # Trim the scratch columns / padded channels (cheap: ~1 pass over the output).
    return wide.reshape(N, Ho, Wp, cout_p)[:, :, :Wo, :cout]


def conv_bn_relu(x_nchw, w_taps, shift, *, cout, kh, kw, padding, stride):
    """PyTorch-parity API (NCHW in / NCHW out).  Layout converts only at this boundary."""
    x = jnp.transpose(x_nchw, (0, 2, 3, 1))
    y = conv_bn_relu_nhwc(x, w_taps, shift, cout=cout, kh=kh, kw=kw,
                          padding=padding, stride=stride)
    return jnp.transpose(y, (0, 3, 1, 2))


# Pure-JAX reference (f32) for correctness checking.
def conv_bn_relu_ref(x, p, *, padding, stride):
    y = jax.lax.conv_general_dilated(
        x, p["W"], window_strides=(stride, stride),
        padding=[(padding, padding), (padding, padding)],
        dimension_numbers=("NCHW", "OIHW", "NCHW"))
    y = y + p["b"][None, :, None, None]
    sc = p["gamma"] / jnp.sqrt(p["rvar"] + BN_EPS)
    y = sc[None, :, None, None] * (y - p["rmean"][None, :, None, None]) \
        + p["beta"][None, :, None, None]
    return jnp.maximum(y, 0.0)


# ---------------------------------------------------------------------------
if __name__ == "__main__":
    def make_params(key, cin, cout, ksz):
        kw_, kb, kg, kbe, krm, krv = jax.random.split(key, 6)
        return dict(
            W=jax.random.normal(kw_, (cout, cin, ksz, ksz), jnp.float32)
              / jnp.sqrt(cin * ksz * ksz),
            b=0.01 * jax.random.normal(kb, (cout,), jnp.float32),
            gamma=1.0 + 0.1 * jax.random.normal(kg, (cout,), jnp.float32),
            beta=0.1 * jax.random.normal(kbe, (cout,), jnp.float32),
            rmean=0.1 * jax.random.normal(krm, (cout,), jnp.float32),
            rvar=jnp.abs(1.0 + 0.1 * jax.random.normal(krv, (cout,), jnp.float32)),
        )

    def run_case(key, *, n, cin, h, w, cout, ksz, pad, stride):
        kx, kp = jax.random.split(key)
        x = jax.random.normal(kx, (n, cin, h, w), jnp.float32)
        p = make_params(kp, cin, cout, ksz)
        w_taps, shift = prepare_conv_bn_relu(p)          # fold + cast + pad once
        fwd = jax.jit(functools.partial(conv_bn_relu, cout=cout, kh=ksz, kw=ksz,
                                        padding=pad, stride=stride))
        y = jax.block_until_ready(fwd(x, w_taps, shift))
        y_ref = conv_bn_relu_ref(x, p, padding=pad, stride=stride)
        assert y.shape == y_ref.shape, (y.shape, y_ref.shape)
        assert bool(jnp.all(jnp.isfinite(y)))
        assert bool(jnp.all(y >= 0.0))                             # ReLU range
        assert bool(jnp.allclose(y, y_ref, atol=5e-2, rtol=5e-2))  # bf16-MXU tolerance

    key = jax.random.PRNGKey(0)
    k1, k2 = jax.random.split(key)
    # Module-spec shapes (batch=2, channels=4, spatial=16, 3x3, pad=1, stride=1).
    run_case(k1, n=2, cin=4, h=16, w=16, cout=8, ksz=3, pad=1, stride=1)
    # Larger check (per review): multiple Cout tiles, Cout padding (192->256), bigger K.
    run_case(k2, n=1, cin=32, h=8, w=8, cout=192, ksz=3, pad=1, stride=1)
    print("KERNEL_OK")
</pallas_src>

<mosaic_0001>
module attributes {stable_mosaic.version = 11 : i64} {
  func.func @_conv_bn_relu_kernel(%arg0: i32, %arg1: i32, %arg2: memref<1x342x4xbf16, #tpu.memory_space<vmem>>, %arg3: memref<9x4x8xbf16, #tpu.memory_space<vmem>>, %arg4: memref<1x8xf32, #tpu.memory_space<vmem>>, %arg5: memref<1x288x8xf32, #tpu.memory_space<vmem>>, %arg6: memref<288x8xf32, #tpu.memory_space<vmem>>) attributes {dimension_semantics = [#tpu.dimension_semantics<parallel>, #tpu.dimension_semantics<parallel>], iteration_bounds = array<i64: 2, 1>, scalar_prefetch = 0 : i64, scratch_operands = 1 : i64, tpu.core_type = #tpu.core_type<tc>, window_params = [{transform_indices = @transform_0, window_bounds = array<i64: 1, 342, 4>}, {transform_indices = @transform_1, window_bounds = array<i64: 9, 4, 8>}, {transform_indices = @transform_2, window_bounds = array<i64: 1, 8>}, {transform_indices = @transform_3, window_bounds = array<i64: 1, 288, 8>}]} {
    %c0 = arith.constant 0 : index
    %c0_0 = arith.constant 0 : index
    %c0_1 = arith.constant 0 : index
    %0 = vector.load %arg2[%c0, %c0_0, %c0_1] : memref<1x342x4xbf16, #tpu.memory_space<vmem>>, vector<1x288x4xbf16>
    %1 = vector.shape_cast %0 : vector<1x288x4xbf16> to vector<288x4xbf16>
    %c0_2 = arith.constant 0 : index
    %c0_3 = arith.constant 0 : index
    %c0_4 = arith.constant 0 : index
    %2 = vector.load %arg3[%c0_2, %c0_3, %c0_4] : memref<9x4x8xbf16, #tpu.memory_space<vmem>>, vector<1x4x8xbf16>
    %3 = vector.shape_cast %2 : vector<1x4x8xbf16> to vector<4x8xbf16>
    %cst = arith.constant dense<0.000000e+00> : vector<288x8xf32>
    %4 = tpu.matmul %1, %3, %cst {dimension_numbers = #tpu.dot_dimension_numbers<[1], [0], [0], [1], [0, 0, 1, 1], [], []>} : vector<288x4xbf16>, vector<4x8xbf16>, vector<288x8xf32> -> vector<288x8xf32>
    %c0_5 = arith.constant 0 : index
    %c0_6 = arith.constant 0 : index
    %5 = vector.load %arg6[%c0_5, %c0_6] : memref<288x8xf32, #tpu.memory_space<vmem>>, vector<288x8xf32>
    tpu.vector_store %arg6[%c0_5, %c0_6], %4 {strides = array<i32>} : memref<288x8xf32, #tpu.memory_space<vmem>>, vector<288x8xf32>,
    %c0_7 = arith.constant 0 : index
    %c1 = arith.constant 1 : index
    %c0_8 = arith.constant 0 : index
    %6 = vector.load %arg2[%c0_7, %c1, %c0_8] : memref<1x342x4xbf16, #tpu.memory_space<vmem>>, vector<1x288x4xbf16>
    %7 = vector.shape_cast %6 : vector<1x288x4xbf16> to vector<288x4xbf16>
    %c1_9 = arith.constant 1 : index
    %c0_10 = arith.constant 0 : index
    %c0_11 = arith.constant 0 : index
    %8 = vector.load %arg3[%c1_9, %c0_10, %c0_11] : memref<9x4x8xbf16, #tpu.memory_space<vmem>>, vector<1x4x8xbf16>
    %9 = vector.shape_cast %8 : vector<1x4x8xbf16> to vector<4x8xbf16>
    %cst_12 = arith.constant dense<0.000000e+00> : vector<288x8xf32>
    %10 = tpu.matmul %7, %9, %cst_12 {dimension_numbers = #tpu.dot_dimension_numbers<[1], [0], [0], [1], [0, 0, 1, 1], [], []>} : vector<288x4xbf16>, vector<4x8xbf16>, vector<288x8xf32> -> vector<288x8xf32>
    %c0_13 = arith.constant 0 : index
    %c0_14 = arith.constant 0 : index
    %11 = vector.load %arg6[%c0_13, %c0_14] : memref<288x8xf32, #tpu.memory_space<vmem>>, vector<288x8xf32>
    %12 = arith.addf %11, %10 : vector<288x8xf32>
    %c0_15 = arith.constant 0 : index
    %c0_16 = arith.constant 0 : index
    %13 = vector.load %arg6[%c0_15, %c0_16] : memref<288x8xf32, #tpu.memory_space<vmem>>, vector<288x8xf32>
    tpu.vector_store %arg6[%c0_15, %c0_16], %12 {strides = array<i32>} : memref<288x8xf32, #tpu.memory_space<vmem>>, vector<288x8xf32>,
    %c0_17 = arith.constant 0 : index
    %c2 = arith.constant 2 : index
    %c0_18 = arith.constant 0 : index
    %14 = vector.load %arg2[%c0_17, %c2, %c0_18] : memref<1x342x4xbf16, #tpu.memory_space<vmem>>, vector<1x288x4xbf16>
    %15 = vector.shape_cast %14 : vector<1x288x4xbf16> to vector<288x4xbf16>
    %c2_19 = arith.constant 2 : index
    %c0_20 = arith.constant 0 : index
    %c0_21 = arith.constant 0 : index
    %16 = vector.load %arg3[%c2_19, %c0_20, %c0_21] : memref<9x4x8xbf16, #tpu.memory_space<vmem>>, vector<1x4x8xbf16>
    %17 = vector.shape_cast %16 : vector<1x4x8xbf16> to vector<4x8xbf16>
    %cst_22 = arith.constant dense<0.000000e+00> : vector<288x8xf32>
    %18 = tpu.matmul %15, %17, %cst_22 {dimension_numbers = #tpu.dot_dimension_numbers<[1], [0], [0], [1], [0, 0, 1, 1], [], []>} : vector<288x4xbf16>, vector<4x8xbf16>, vector<288x8xf32> -> vector<288x8xf32>
    %c0_23 = arith.constant 0 : index
    %c0_24 = arith.constant 0 : index
    %19 = vector.load %arg6[%c0_23, %c0_24] : memref<288x8xf32, #tpu.memory_space<vmem>>, vector<288x8xf32>
    %20 = arith.addf %19, %18 : vector<288x8xf32>
    %c0_25 = arith.constant 0 : index
    %c0_26 = arith.constant 0 : index
    %21 = vector.load %arg6[%c0_25, %c0_26] : memref<288x8xf32, #tpu.memory_space<vmem>>, vector<288x8xf32>
    tpu.vector_store %arg6[%c0_25, %c0_26], %20 {strides = array<i32>} : memref<288x8xf32, #tpu.memory_space<vmem>>, vector<288x8xf32>,
    %c0_27 = arith.constant 0 : index
    %c18 = arith.constant 18 : index
    %c0_28 = arith.constant 0 : index
    %22 = vector.load %arg2[%c0_27, %c18, %c0_28] : memref<1x342x4xbf16, #tpu.memory_space<vmem>>, vector<1x288x4xbf16>
    %23 = vector.shape_cast %22 : vector<1x288x4xbf16> to vector<288x4xbf16>
    %c3 = arith.constant 3 : index
    %c0_29 = arith.constant 0 : index
    %c0_30 = arith.constant 0 : index
    %24 = vector.load %arg3[%c3, %c0_29, %c0_30] : memref<9x4x8xbf16, #tpu.memory_space<vmem>>, vector<1x4x8xbf16>
    %25 = vector.shape_cast %24 : vector<1x4x8xbf16> to vector<4x8xbf16>
    %cst_31 = arith.constant dense<0.000000e+00> : vector<288x8xf32>
    %26 = tpu.matmul %23, %25, %cst_31 {dimension_numbers = #tpu.dot_dimension_numbers<[1], [0], [0], [1], [0, 0, 1, 1], [], []>} : vector<288x4xbf16>, vector<4x8xbf16>, vector<288x8xf32> -> vector<288x8xf32>
    %c0_32 = arith.constant 0 : index
    %c0_33 = arith.constant 0 : index
    %27 = vector.load %arg6[%c0_32, %c0_33] : memref<288x8xf32, #tpu.memory_space<vmem>>, vector<288x8xf32>
    %28 = arith.addf %27, %26 : vector<288x8xf32>
    %c0_34 = arith.constant 0 : index
    %c0_35 = arith.constant 0 : index
    %29 = vector.load %arg6[%c0_34, %c0_35] : memref<288x8xf32, #tpu.memory_space<vmem>>, vector<288x8xf32>
    tpu.vector_store %arg6[%c0_34, %c0_35], %28 {strides = array<i32>} : memref<288x8xf32, #tpu.memory_space<vmem>>, vector<288x8xf32>,
    %c0_36 = arith.constant 0 : index
    %c19 = arith.constant 19 : index
    %c0_37 = arith.constant 0 : index
    %30 = vector.load %arg2[%c0_36, %c19, %c0_37] : memref<1x342x4xbf16, #tpu.memory_space<vmem>>, vector<1x288x4xbf16>
    %31 = vector.shape_cast %30 : vector<1x288x4xbf16> to vector<288x4xbf16>
    %c4 = arith.constant 4 : index
    %c0_38 = arith.constant 0 : index
    %c0_39 = arith.constant 0 : index
    %32 = vector.load %arg3[%c4, %c0_38, %c0_39] : memref<9x4x8xbf16, #tpu.memory_space<vmem>>, vector<1x4x8xbf16>
    %33 = vector.shape_cast %32 : vector<1x4x8xbf16> to vector<4x8xbf16>
    %cst_40 = arith.constant dense<0.000000e+00> : vector<288x8xf32>
    %34 = tpu.matmul %31, %33, %cst_40 {dimension_numbers = #tpu.dot_dimension_numbers<[1], [0], [0], [1], [0, 0, 1, 1], [], []>} : vector<288x4xbf16>, vector<4x8xbf16>, vector<288x8xf32> -> vector<288x8xf32>
    %c0_41 = arith.constant 0 : index
    %c0_42 = arith.constant 0 : index
    %35 = vector.load %arg6[%c0_41, %c0_42] : memref<288x8xf32, #tpu.memory_space<vmem>>, vector<288x8xf32>
    %36 = arith.addf %35, %34 : vector<288x8xf32>
    %c0_43 = arith.constant 0 : index
    %c0_44 = arith.constant 0 : index
    %37 = vector.load %arg6[%c0_43, %c0_44] : memref<288x8xf32, #tpu.memory_space<vmem>>, vector<288x8xf32>
    tpu.vector_store %arg6[%c0_43, %c0_44], %36 {strides = array<i32>} : memref<288x8xf32, #tpu.memory_space<vmem>>, vector<288x8xf32>,
    %c0_45 = arith.constant 0 : index
    %c20 = arith.constant 20 : index
    %c0_46 = arith.constant 0 : index
    %38 = vector.load %arg2[%c0_45, %c20, %c0_46] : memref<1x342x4xbf16, #tpu.memory_space<vmem>>, vector<1x288x4xbf16>
    %39 = vector.shape_cast %38 : vector<1x288x4xbf16> to vector<288x4xbf16>
    %c5 = arith.constant 5 : index
    %c0_47 = arith.constant 0 : index
    %c0_48 = arith.constant 0 : index
    %40 = vector.load %arg3[%c5, %c0_47, %c0_48] : memref<9x4x8xbf16, #tpu.memory_space<vmem>>, vector<1x4x8xbf16>
    %41 = vector.shape_cast %40 : vector<1x4x8xbf16> to vector<4x8xbf16>
    %cst_49 = arith.constant dense<0.000000e+00> : vector<288x8xf32>
    %42 = tpu.matmul %39, %41, %cst_49 {dimension_numbers = #tpu.dot_dimension_numbers<[1], [0], [0], [1], [0, 0, 1, 1], [], []>} : vector<288x4xbf16>, vector<4x8xbf16>, vector<288x8xf32> -> vector<288x8xf32>
    %c0_50 = arith.constant 0 : index
    %c0_51 = arith.constant 0 : index
    %43 = vector.load %arg6[%c0_50, %c0_51] : memref<288x8xf32, #tpu.memory_space<vmem>>, vector<288x8xf32>
    %44 = arith.addf %43, %42 : vector<288x8xf32>
    %c0_52 = arith.constant 0 : index
    %c0_53 = arith.constant 0 : index
    %45 = vector.load %arg6[%c0_52, %c0_53] : memref<288x8xf32, #tpu.memory_space<vmem>>, vector<288x8xf32>
    tpu.vector_store %arg6[%c0_52, %c0_53], %44 {strides = array<i32>} : memref<288x8xf32, #tpu.memory_space<vmem>>, vector<288x8xf32>,
    %c0_54 = arith.constant 0 : index
    %c36 = arith.constant 36 : index
    %c0_55 = arith.constant 0 : index
    %46 = vector.load %arg2[%c0_54, %c36, %c0_55] : memref<1x342x4xbf16, #tpu.memory_space<vmem>>, vector<1x288x4xbf16>
    %47 = vector.shape_cast %46 : vector<1x288x4xbf16> to vector<288x4xbf16>
    %c6 = arith.constant 6 : index
    %c0_56 = arith.constant 0 : index
    %c0_57 = arith.constant 0 : index
    %48 = vector.load %arg3[%c6, %c0_56, %c0_57] : memref<9x4x8xbf16, #tpu.memory_space<vmem>>, vector<1x4x8xbf16>
    %49 = vector.shape_cast %48 : vector<1x4x8xbf16> to vector<4x8xbf16>
    %cst_58 = arith.constant dense<0.000000e+00> : vector<288x8xf32>
    %50 = tpu.matmul %47, %49, %cst_58 {dimension_numbers = #tpu.dot_dimension_numbers<[1], [0], [0], [1], [0, 0, 1, 1], [], []>} : vector<288x4xbf16>, vector<4x8xbf16>, vector<288x8xf32> -> vector<288x8xf32>
    %c0_59 = arith.constant 0 : index
    %c0_60 = arith.constant 0 : index
    %51 = vector.load %arg6[%c0_59, %c0_60] : memref<288x8xf32, #tpu.memory_space<vmem>>, vector<288x8xf32>
    %52 = arith.addf %51, %50 : vector<288x8xf32>
    %c0_61 = arith.constant 0 : index
    %c0_62 = arith.constant 0 : index
    %53 = vector.load %arg6[%c0_61, %c0_62] : memref<288x8xf32, #tpu.memory_space<vmem>>, vector<288x8xf32>
    tpu.vector_store %arg6[%c0_61, %c0_62], %52 {strides = array<i32>} : memref<288x8xf32, #tpu.memory_space<vmem>>, vector<288x8xf32>,
    %c0_63 = arith.constant 0 : index
    %c37 = arith.constant 37 : index
    %c0_64 = arith.constant 0 : index
    %54 = vector.load %arg2[%c0_63, %c37, %c0_64] : memref<1x342x4xbf16, #tpu.memory_space<vmem>>, vector<1x288x4xbf16>
    %55 = vector.shape_cast %54 : vector<1x288x4xbf16> to vector<288x4xbf16>
    %c7 = arith.constant 7 : index
    %c0_65 = arith.constant 0 : index
    %c0_66 = arith.constant 0 : index
    %56 = vector.load %arg3[%c7, %c0_65, %c0_66] : memref<9x4x8xbf16, #tpu.memory_space<vmem>>, vector<1x4x8xbf16>
    %57 = vector.shape_cast %56 : vector<1x4x8xbf16> to vector<4x8xbf16>
    %cst_67 = arith.constant dense<0.000000e+00> : vector<288x8xf32>
    %58 = tpu.matmul %55, %57, %cst_67 {dimension_numbers = #tpu.dot_dimension_numbers<[1], [0], [0], [1], [0, 0, 1, 1], [], []>} : vector<288x4xbf16>, vector<4x8xbf16>, vector<288x8xf32> -> vector<288x8xf32>
    %c0_68 = arith.constant 0 : index
    %c0_69 = arith.constant 0 : index
    %59 = vector.load %arg6[%c0_68, %c0_69] : memref<288x8xf32, #tpu.memory_space<vmem>>, vector<288x8xf32>
    %60 = arith.addf %59, %58 : vector<288x8xf32>
    %c0_70 = arith.constant 0 : index
    %c0_71 = arith.constant 0 : index
    %61 = vector.load %arg6[%c0_70, %c0_71] : memref<288x8xf32, #tpu.memory_space<vmem>>, vector<288x8xf32>
    tpu.vector_store %arg6[%c0_70, %c0_71], %60 {strides = array<i32>} : memref<288x8xf32, #tpu.memory_space<vmem>>, vector<288x8xf32>,
    %c0_72 = arith.constant 0 : index
    %c38 = arith.constant 38 : index
    %c0_73 = arith.constant 0 : index
    %62 = vector.load %arg2[%c0_72, %c38, %c0_73] : memref<1x342x4xbf16, #tpu.memory_space<vmem>>, vector<1x288x4xbf16>
    %63 = vector.shape_cast %62 : vector<1x288x4xbf16> to vector<288x4xbf16>
    %c8 = arith.constant 8 : index
    %c0_74 = arith.constant 0 : index
    %c0_75 = arith.constant 0 : index
    %64 = vector.load %arg3[%c8, %c0_74, %c0_75] : memref<9x4x8xbf16, #tpu.memory_space<vmem>>, vector<1x4x8xbf16>
    %65 = vector.shape_cast %64 : vector<1x4x8xbf16> to vector<4x8xbf16>
    %cst_76 = arith.constant dense<0.000000e+00> : vector<288x8xf32>
    %66 = tpu.matmul %63, %65, %cst_76 {dimension_numbers = #tpu.dot_dimension_numbers<[1], [0], [0], [1], [0, 0, 1, 1], [], []>} : vector<288x4xbf16>, vector<4x8xbf16>, vector<288x8xf32> -> vector<288x8xf32>
    %c0_77 = arith.constant 0 : index
    %c0_78 = arith.constant 0 : index
    %67 = vector.load %arg6[%c0_77, %c0_78] : memref<288x8xf32, #tpu.memory_space<vmem>>, vector<288x8xf32>
    %68 = arith.addf %67, %66 : vector<288x8xf32>
    %c0_79 = arith.constant 0 : index
    %c0_80 = arith.constant 0 : index
    %69 = vector.load %arg6[%c0_79, %c0_80] : memref<288x8xf32, #tpu.memory_space<vmem>>, vector<288x8xf32>
    tpu.vector_store %arg6[%c0_79, %c0_80], %68 {strides = array<i32>} : memref<288x8xf32, #tpu.memory_space<vmem>>, vector<288x8xf32>,
    %c0_81 = arith.constant 0 : index
    %c0_82 = arith.constant 0 : index
    %70 = vector.load %arg6[%c0_81, %c0_82] : memref<288x8xf32, #tpu.memory_space<vmem>>, vector<288x8xf32>
    %c0_83 = arith.constant 0 : index
    %c0_84 = arith.constant 0 : index
    %71 = vector.load %arg4[%c0_83, %c0_84] : memref<1x8xf32, #tpu.memory_space<vmem>>, vector<1x8xf32>
    %72 = vector.broadcast %71 : vector<1x8xf32> to vector<288x8xf32>
    %73 = arith.addf %70, %72 : vector<288x8xf32>
    %cst_85 = arith.constant 0.000000e+00 : f32
    %74 = vector.broadcast %cst_85 : f32 to vector<288x8xf32>
    %75 = arith.maximumf %73, %74 : vector<288x8xf32>
    %c0_86 = arith.constant 0 : index
    %c0_87 = arith.constant 0 : index
    %c0_88 = arith.constant 0 : index
    %76 = vector.load %arg5[%c0_86, %c0_87, %c0_88] : memref<1x288x8xf32, #tpu.memory_space<vmem>>, vector<1x288x8xf32>
    %77 = vector.shape_cast %76 : vector<1x288x8xf32> to vector<288x8xf32>
    %78 = vector.shape_cast %75 : vector<288x8xf32> to vector<1x288x8xf32>
    tpu.vector_store %arg5[%c0_86, %c0_87, %c0_88], %78 {strides = array<i32>} : memref<1x288x8xf32, #tpu.memory_space<vmem>>, vector<1x288x8xf32>,
    return
  }
  func.func @transform_0(%arg0: i32, %arg1: i32) -> (i32, i32, i32) {
    %c0_i32 = arith.constant 0 : i32
    %c0_i32_0 = arith.constant 0 : i32
    %c0_i32_1 = arith.constant 0 : i32
    return %arg0, %c0_i32, %c0_i32_0 : i32, i32, i32
  }
  func.func @transform_1(%arg0: i32, %arg1: i32) -> (i32, i32, i32) {
    %c0_i32 = arith.constant 0 : i32
    %c0_i32_0 = arith.constant 0 : i32
    %c0_i32_1 = arith.constant 0 : i32
    return %c0_i32, %c0_i32_0, %arg1 : i32, i32, i32
  }
  func.func @transform_2(%arg0: i32, %arg1: i32) -> (i32, i32) {
    %c0_i32 = arith.constant 0 : i32
    %c0_i32_0 = arith.constant 0 : i32
    return %c0_i32, %arg1 : i32, i32
  }
  func.func @transform_3(%arg0: i32, %arg1: i32) -> (i32, i32, i32) {
    %c0_i32 = arith.constant 0 : i32
    %c0_i32_0 = arith.constant 0 : i32
    return %arg0, %c0_i32, %arg1 : i32, i32, i32
  }
}

</mosaic_0001>

<bundles_post_ra>
// kernel: conv_bn_relu.1
= control target key start
LH: loop header
LB: loop body
LE: loop exit
PB: predicated region body
PF: predicated region fallthrough
CT: control target
= control target key end

     0   :  { %s5711_s12 = smov 0   ;;  %s5713_s13 = smov 0   ;;  %s7624_s0 = inlined_call_operand.vmem [shape: bf16[2,342,4], index: 0, kind: input, shape index: {}]   ;;  %s7625_s1 = inlined_call_operand.vmem [shape: bf16[9,4,8], index: 1, kind: input, shape index: {}]   ;;  %s7626_s2 = inlined_call_operand.vmem [shape: f32[1,8], index: 2, kind: input, shape index: {}]   ;;  %s7627_s3 = inlined_call_operand.vmem [shape: f32[2,288,8], index: 3, kind: output, shape index: {}]  }
   0x1   :  { %s5715_s14 = smov 0  }
   0x2 LB: > { %s25_s15 = sadd.s32 1, %s5685_s13  ;;  %p4651_p0 = scmp.ge.s32.totalorder %s5689_s14, 1  ;;  %s5689_s14 = sphi %s5715_s14, %s13_s14   ;;  %s5685_s13 = sphi %s5713_s13, %s7629_s13   ;;  %s5681_s12 = sphi %s5711_s12, %s7628_s12  }
   0x3   : > { %p27_p1 = scmp.ge.s32.totalorder %s25_s15, 2  ;;  %p168_p2 = scmp.lt.s32.totalorder %s5689_s14, 3 }
   0x5   : > { %s7631_s15 = smov (%p27_p1, %s25_s15), 0  ;;  %p169_p3 = pnand %p4651_p0, %p168_p2 }
   0x6   : > { %p202_p4 = scmp.lt.s32.totalorder (!%p169_p3), %s5681_s12, 1 }
   0x7   : > { %172 = sbr.rel (%p169_p3) target bundleno = 838 (0x346), region = 32 }
   0xc   : > { %v259_v0 = vld [vmem:[%s7625_s1] sm:$0x3]  ;;  %vm405_vm0 = vcmask 1041408   ;;  %v4744_v2 = vld [vmem:[%s7625_s1 + $0x2] sm:$0x3]  ;;  %s7633_s12 = smov (!%p202_p4, %s5681_s12), 1 }
   0xd   : > { %v407_v1 = vsel %vm405_vm0, %v259_v0, 0  ;;  %v4835_v3 = vld [vmem:[%s7625_s1 + $0x4] sm:$0x3]  ;;  %v881_v4 = vsel %vm405_vm0, %v4744_v2, 0  ;;  %v5017_v6 = vld [vmem:[%s7625_s1 + $0x8] sm:$0x3] }
   0xe   : > { %5636 = vmatpush.bf16.msra.mxu1 %v407_v1  ;;  %5637 = vmatpush.bf16.msra.mxu2 %v407_v1  ;;  %v1315_v5 = vsel %vm405_vm0, %v4835_v3, 0  ;;  %v2315_v7 = vsel %vm405_vm0, %v5017_v6, 0  ;;  %s5639_s24 = smul.u32 172, %s7633_s12  ;;  %vm350_vm1 = vcmask 31744   ;;  %v4926_v12 = vld [vmem:[%s7625_s1 + $0x6] sm:$0x3] }
   0xf   : > { %416 = vmatpush.bf16.msra.mxu0 %v407_v1  ;;  %5638 = vmatpush.bf16.msra.mxu3 %v407_v1  ;;  %v1748_v13 = vsel %vm405_vm0, %v4926_v12, 0  ;;  %v5108_v25 = vld [vmem:[%s7625_s1 + $0xa] sm:$0x3]  ;;  %v5199_v26 = vld [vmem:[%s7625_s1 + $0xc] sm:$0x3]  ;;  %vm1222_vm2 = vcmask 1046528  }
  0x10   : > { %s5751_s27 = scalar_lea.vmem %s7624_s0, %s5639_s24  ;;  %v2749_v27 = vsel %vm405_vm0, %v5108_v25, 0  ;;  %v3182_v28 = vsel %vm405_vm0, %v5199_v26, 0  ;;  %v5290_v33 = vld [vmem:[%s7625_s1 + $0xe] sm:$0x3]  ;;  %v5381_v47 = vld [vmem:[%s7625_s1 + $0x10] sm:$0x3] }
  0x11   : > { %v5479_v8 = vld [vmem:[%s5751_s27 + $0x28] sm:$0xff]  ;;  %v5484_v9 = vld [vmem:[%s5751_s27 + $0x50] sm:$0xff]  ;;  %v5474_v10 = vld [vmem:[%s5751_s27] sm:$0xff]  ;;  %v3749_v34 = vsel %vm405_vm0, %v5290_v33, 0  ;;  %v4183_v52 = vsel %vm405_vm0, %v5381_v47, 0  ;;  %vm508_vm5 = vcmask 64512  }
  0x12   : > { %890 = vmatpush.bf16.msrb.mxu1 %v881_v4  ;;  %1324 = vmatpush.bf16.msrb.mxu2 %v1315_v5  ;;  %v5489_v11 = vld [vmem:[%s5751_s27 + $0x78] sm:$0xff]  ;;  %v5480_v14 = vld [vmem:[%s5751_s27 + $0x30] sm:$0xff]  ;;  %v5475_v16 = vld [vmem:[%s5751_s27 + $0x8] sm:$0xff]  ;;  %vm677_vm3 = vsmask.f32 7424  ;;  %vm2656_vm7 = vcmask 1045504  }
  0x13   : > { %2324 = vmatpush.bf16.msrb.mxu0 %v2315_v7  ;;  %4731 = vmatmul.msk.bf16.vlgmr.msra.gmra.mxu1 %vm350_vm1, %v5479_v8  ;;  %v5485_v15 = vld [vmem:[%s5751_s27 + $0x58] sm:$0xff]  ;;  %v5490_v17 = vld [vmem:[%s5751_s27 + $0x80] sm:$0xff]  ;;  %v5476_v20 = vld [vmem:[%s5751_s27 + $0x10] sm:$0xff]  ;;  %vm2089_vm4 = vsmask.f32 6400  ;;  %vm4090_vm8 = vcmask 1044480  }
  0x14   : > { %4736 = vmatmul.msk.bf16.vlgmr.msra.gmra.mxu2 %vm350_vm1, %v5484_v9  ;;  %4726 = vmatmul.msk.bf16.vlgmr.msra.gmra.mxu0 %vm350_vm1, %v5474_v10  ;;  %v5481_v18 = vld [vmem:[%s5751_s27 + $0x38] sm:$0xff]  ;;  %v5486_v19 = vld [vmem:[%s5751_s27 + $0x60] sm:$0xff]  ;;  %v5491_v21 = vld [vmem:[%s5751_s27 + $0x88] sm:$0xff]  ;;  %vm3523_vm6 = vsmask.f32 5376  ;;  %s5640_s17 = smul.u32 288, %s7633_s12 }
  0x15   : > { %4741 = vmatmul.msk.bf16.vlgmr.msra.gmra.mxu3 %vm350_vm1, %v5489_v11  ;;  %v5482_v22 = vld [vmem:[%s5751_s27 + $0x40] sm:$0xff]  ;;  %v5487_v23 = vld [vmem:[%s5751_s27 + $0x68] sm:$0xff]  ;;  %v5477_v24 = vld [vmem:[%s5751_s27 + $0x18] sm:$0xff] }
  0x16   : > { %1757 = vmatpush.bf16.msrb.mxu3 %v1748_v13  ;;  %v4929_v29 = vld [vmem:[%s5751_s27 + $0x8] sm:$0xe]  ;;  %v5528_v30 = vld [vmem:[%s5751_s27 + $0x8] sm:$0xf0]  ;;  %2758 = vmatpush.bf16.msra.mxu1 %v2749_v27  ;;  %v5529_v31 = vld [vmem:[%s5751_s27 + $0x10] sm:$0xff]  ;;  %s7038_s19 = scalar_lea.vmem %s7627_s3, %s5640_s17 }
  0x17   : > { %3191 = vmatpush.bf16.msra.mxu2 %v3182_v28  ;;  %v4930_v32 = vor.u32 %v5528_v30, %v4929_v29  ;;  %v1657_v36 = vrot.slane %v5529_v31, 1  ;;  %v5483_v38 = vld [vmem:[%s5751_s27 + $0x48] sm:$0xff]  ;;  %v5488_v39 = vld [vmem:[%s5751_s27 + $0x70] sm:$0xff]  ;;  %v5492_v42 = vld [vmem:[%s5751_s27] sm:$0xff]  ;;  %4192 = vmatpush.bf16.msra.mxu0 %v4183_v52 }
  0x18   : > { %v5020_v40 = vld [vmem:[%s5751_s27 + $0x8] sm:$0xe]  ;;  %v5546_v41 = vld [vmem:[%s5751_s27 + $0x8] sm:$0xf0]  ;;  %v5478_v43 = vld [vmem:[%s5751_s27 + $0x20] sm:$0xff]  ;;  %v681_v49 = vshll.u32 %v5492_v42, 16 }
  0x19   : > { %v1656_v35 = vrot.slane %v4930_v32, 1  ;;  %v5021_v44 = vor.u32 %v5546_v41, %v5020_v40  ;;  %v5547_v45 = vld [vmem:[%s5751_s27 + $0x10] sm:$0xff]  ;;  %v5530_v46 = vld [vmem:[%s5751_s27 + $0x18] sm:$0xff]  ;;  %v5493_v48 = vld [vmem:[%s5751_s27 + $0x8] sm:$0xff]  ;;  %v679_v59 = vshrl.u32 %v5492_v42, 16 }
  0x1a   : > { %3758 = vmatpush.bf16.msra.mxu3 %v3749_v34  ;;  %v4838_v50 = vld [vmem:[%s5751_s27] sm:$0xe]  ;;  %v5510_v53 = vld [vmem:[%s5751_s27] sm:$0xf0]  ;;  %v1659_v54 = vrot.slane %v5530_v46, 1  ;;  %v2099_v56 = vshrl.u32 %v5547_v45, 16 }
  0x1b   : > { %v1658_v37 = vsel %vm1222_vm2, %v1656_v35, %v1657_v36  ;;  %v2091_v51 = vshrl.u32 %v5021_v44, 16  ;;  %v2094_v55 = vshll.u32 %v5021_v44, 16  ;;  %v2102_v57 = vshll.u32 %v5547_v45, 16  ;;  %v5511_v62 = vld [vmem:[%s5751_s27 + $0x8] sm:$0xff]  ;;  %v5548_v13 = vld [vmem:[%s5751_s27 + $0x18] sm:$0xff]  ;;  %v5549_v32 = vld [vmem:[%s5751_s27 + $0x20] sm:$0xff] }
  0x1c   : > { %v1660_v58 = vsel %vm1222_vm2, %v1657_v36, %v1659_v54  ;;  %v683_v60 = vrot.slane %v681_v49, 1  ;;  %v686_v61 = vshll.u32 %v5493_v48, 16  ;;  %v4839_v63 = vor.u32 %v5510_v53, %v4838_v50  ;;  %v5495_v33 = vld [vmem:[%s5751_s27 + $0x18] sm:$0xff]  ;;  %v5532_v34 = vld [vmem:[%s5751_s27 + $0x28] sm:$0xff]  ;;  %v5496_v52 = vld [vmem:[%s5751_s27 + $0x20] sm:$0xff] }
  0x1d   : > { %v2093_v0 = vrot.slane %v2091_v51, 1  ;;  %v2096_v1 = vrot.slane %v2094_v55, 2  ;;  %v2101_v2 = vrot.slane %v2099_v56, 1  ;;  %v2104_v3 = vrot.slane %v2102_v57, 2  ;;  %v5513_v40 = vld [vmem:[%s5751_s27 + $0x18] sm:$0xff]  ;;  %v5550_v51 = vld [vmem:[%s5751_s27 + $0x28] sm:$0xff] }
  0x1e   : > { %v684_v4 = vor.u32 %v683_v60, %v679_v59  ;;  %v688_v5 = vrot.slane %v686_v61, 1  ;;  %v1223_v6 = vrot.slane %v4839_v63, 1  ;;  %v1224_v7 = vrot.slane %v5511_v62, 1  ;;  %v5533_v53 = vld [vmem:[%s5751_s27 + $0x30] sm:$0xff]  ;;  %v5514_v59 = vld [vmem:[%s5751_s27 + $0x20] sm:$0xff] }
  0x1f   : > { %v2097_v8 = vor.u32 %v2096_v1, %v2093_v0  ;;  %v2105_v9 = vor.u32 %v2104_v3, %v2101_v2  ;;  %v2117_v35 = vshrl.u32 %v5549_v32, 16  ;;  %v2120_v36 = vshll.u32 %v5549_v32, 16 }
  0x20   : > { %v689_v10 = vsel %vm677_vm3, %v684_v4, %v688_v5  ;;  %v1225_v11 = vsel %vm1222_vm2, %v1223_v6, %v1224_v7  ;;  %v1228_v46 = vrot.slane %v5513_v40, 1  ;;  %v2129_v55 = vshll.u32 %v5550_v51, 16 }
  0x21   : > { %v2106_v12 = vsel %vm2089_vm4, %v2097_v8, %v2105_v9  ;;  %v2119_v42 = vrot.slane %v2117_v35, 1  ;;  %v1665_v56 = vrot.slane %v5533_v53, 1  ;;  %v706_v57 = vshrl.u32 %v5495_v33, 16  ;;  %v5551_v8 = vld [vmem:[%s5751_s27 + $0x30] sm:$0xff] }
  0x22   : > { %v2131_v62 = vrot.slane %v2129_v55, 2  ;;  %v1230_v1 = vrot.slane %v5514_v59, 1 }
  0x23   : > { %4732 = vmatmul.msk.bf16.gmra.mxu1 %vm350_vm1, %v5480_v14  ;;  %v5531_v14 = vld [vmem:[%s5751_s27 + $0x20] sm:$0xff] }
  0x24   : > { %4737 = vmatmul.msk.bf16.gmra.mxu2 %vm350_vm1, %v5485_v15  ;;  %4727 = vmatmul.msk.bf16.gmra.mxu0 %vm350_vm1, %v5475_v16  ;;  %v5494_v15 = vld [vmem:[%s5751_s27 + $0x10] sm:$0xff]  ;;  %v1661_v16 = vrot.slane %v5531_v14, 1 }
  0x25   : > { %4742 = vmatmul.msk.bf16.gmra.mxu3 %vm350_vm1, %v5490_v17  ;;  %v2108_v17 = vshrl.u32 %v5548_v13, 16 }
  0x33   : > { %4733 = vmatmul.msk.bf16.gmra.mxu1 %vm350_vm1, %v5481_v18  ;;  %v2111_v18 = vshll.u32 %v5548_v13, 16 }
  0x34   : > { %4738 = vmatmul.msk.bf16.gmra.mxu2 %vm350_vm1, %v5486_v19  ;;  %4728 = vmatmul.msk.bf16.gmra.mxu0 %vm350_vm1, %v5476_v20  ;;  %v1662_v19 = vsel %vm1222_vm2, %v1659_v54, %v1661_v16  ;;  %v690_v20 = vshrl.u32 %v5493_v48, 16  ;;  %v2126_v54 = vshrl.u32 %v5550_v51, 16 }
  0x35   : > { %4743 = vmatmul.msk.bf16.gmra.mxu3 %vm350_vm1, %v5491_v21  ;;  %v694_v21 = vshll.u32 %v5494_v15, 16 }
  0x36   : > { %v692_v25 = vor.u32 %v690_v20, %v688_v5  ;;  %v2128_v61 = vrot.slane %v2126_v54, 1  ;;  %v1231_v5 = vsel %vm1222_vm2, %v1228_v46, %v1230_v1 }
  0x37   : > { %v696_v26 = vrot.slane %v694_v21, 1 }
  0x38   : > { %v2132_v2 = vor.u32 %v2131_v62, %v2128_v61  ;;  %v5553_v61 = vld [vmem:[%s5751_s27 + $0x40] sm:$0xff] }
  0x39   : > { %v697_v29 = vsel %vm677_vm3, %v692_v25, %v696_v26 }
  0x43   : > { %4734 = vmatmul.msk.bf16.gmra.mxu1 %vm350_vm1, %v5482_v22  ;;  %v5512_v22 = vld [vmem:[%s5751_s27 + $0x10] sm:$0xff] }
  0x44   : > { %4739 = vmatmul.msk.bf16.gmra.mxu2 %vm350_vm1, %v5487_v23  ;;  %4729 = vmatmul.msk.bf16.gmra.mxu0 %vm350_vm1, %v5477_v24  ;;  %v2110_v23 = vrot.slane %v2108_v17, 1  ;;  %v2113_v24 = vrot.slane %v2111_v18, 2  ;;  %v1226_v27 = vrot.slane %v5512_v22, 1  ;;  %v5515_v18 = vld [vmem:[%s5751_s27 + $0x28] sm:$0xff] }
  0x45   : > { %4999 = vmatmul.msk.bf16.vlgmr.msrb.gmra.mxu3 %vm350_vm1, %v1658_v37  ;;  %v1663_v37 = vrot.slane %v5532_v34, 1  ;;  %v5552_v34 = vld [vmem:[%s5751_s27 + $0x38] sm:$0xff] }
  0x46   : > { %v2114_v28 = vor.u32 %v2113_v24, %v2110_v23  ;;  %v1227_v30 = vsel %vm1222_vm2, %v1224_v7, %v1226_v27  ;;  %v1229_v49 = vsel %vm1222_vm2, %v1226_v27, %v1228_v46 }
  0x47   : > { %v1664_v41 = vsel %vm1222_vm2, %v1661_v16, %v1663_v37  ;;  %v1666_v60 = vsel %vm1222_vm2, %v1663_v37, %v1665_v56  ;;  %v714_v16 = vshrl.u32 %v5496_v52, 16  ;;  %v5535_v37 = vld [vmem:[%s5751_s27 + $0x40] sm:$0xff] }
  0x48   : > { %v2115_v31 = vsel %vm2089_vm4, %v2105_v9, %v2114_v28  ;;  %v5497_v9 = vld [vmem:[%s5751_s27 + $0x28] sm:$0xff] }
  0x49   : > { %v718_v17 = vshll.u32 %v5497_v9, 16 }
  0x4b   : > { %v720_v25 = vrot.slane %v718_v17, 1 }
  0x53   : > { %4735 = vmatmul.msk.bf16.gmra.mxu1 %vm350_vm1, %v5483_v38  ;;  %v698_v38 = vshrl.u32 %v5494_v15, 16 }
  0x54   : > { %4740 = vmatmul.msk.bf16.gmra.mxu2 %vm350_vm1, %v5488_v39  ;;  %4730 = vmatmul.msk.bf16.gmra.mxu0 %vm350_vm1, %v5478_v43  ;;  %v702_v39 = vshll.u32 %v5495_v33, 16  ;;  %v2122_v43 = vrot.slane %v2120_v36, 2  ;;  %v5498_v36 = vld [vmem:[%s5751_s27 + $0x30] sm:$0xff] }
  0x55   : > { %5000 = vmatmul.msk.bf16.gmra.mxu3 %vm350_vm1, %v1660_v58  ;;  %v700_v44 = vor.u32 %v698_v38, %v696_v26  ;;  %v710_v58 = vshll.u32 %v5496_v52, 16  ;;  %v1232_v26 = vrot.slane %v5515_v18, 1  ;;  %v2144_v38 = vshrl.u32 %v5552_v34, 16 }
  0x56   : > { %v704_v45 = vrot.slane %v702_v39, 1  ;;  %v2123_v47 = vor.u32 %v2122_v43, %v2119_v42  ;;  %v2147_v39 = vshll.u32 %v5552_v34, 16  ;;  %v722_v43 = vshrl.u32 %v5497_v9, 16 }
  0x57   : > { %v712_v0 = vrot.slane %v710_v58, 1 }
  0x58   : > { %v705_v48 = vsel %vm677_vm3, %v700_v44, %v704_v45  ;;  %v2124_v50 = vsel %vm2089_vm4, %v2114_v28, %v2123_v47  ;;  %v708_v63 = vor.u32 %v706_v57, %v704_v45  ;;  %v2133_v7 = vsel %vm2089_vm4, %v2123_v47, %v2132_v2  ;;  %v5516_v45 = vld [vmem:[%s5751_s27 + $0x30] sm:$0xff] }
  0x59   : > { %v716_v24 = vor.u32 %v714_v16, %v712_v0  ;;  %v726_v44 = vshll.u32 %v5498_v36, 16  ;;  %v724_v51 = vor.u32 %v722_v43, %v720_v25  ;;  %v1234_v53 = vrot.slane %v5516_v45, 1 }
  0x5a   : > { %v713_v4 = vsel %vm677_vm3, %v708_v63, %v712_v0  ;;  %v5499_v63 = vld [vmem:[%s5751_s27 + $0x38] sm:$0xff]  ;;  %v5536_v0 = vld [vmem:[%s5751_s27 + $0x48] sm:$0xff] }
  0x5b   : > { %v728_v52 = vrot.slane %v726_v44, 1  ;;  %v1235_v58 = vsel %vm1222_vm2, %v1232_v26, %v1234_v53 }
  0x5d   : > { %v729_v57 = vsel %vm677_vm3, %v724_v51, %v728_v52  ;;  %v5555_v51 = vld [vmem:[%s5751_s27 + $0x50] sm:$0xff] }
  0x63   : > { %4817 = vmatmul.msk.bf16.vlgmr.msrb.gmra.mxu1 %vm350_vm1, %v689_v10  ;;  %v5534_v10 = vld [vmem:[%s5751_s27 + $0x38] sm:$0xff] }
  0x64   : > { %4908 = vmatmul.msk.bf16.vlgmr.msrb.gmra.mxu2 %vm350_vm1, %v1225_v11  ;;  %5090 = vmatmul.msk.bf16.vlgmr.msrb.gmra.mxu0 %vm350_vm1, %v2106_v12  ;;  %v2135_v11 = vshrl.u32 %v5551_v8, 16  ;;  %v2138_v12 = vshll.u32 %v5551_v8, 16  ;;  %v1667_v14 = vrot.slane %v5534_v10, 1  ;;  %v5517_v8 = vld [vmem:[%s5751_s27 + $0x38] sm:$0xff] }
  0x65   : > { %5001 = vmatmul.msk.bf16.gmra.mxu3 %vm350_vm1, %v1662_v19  ;;  %v1236_v16 = vrot.slane %v5517_v8, 1 }
  0x66   : > { %v1668_v19 = vsel %vm1222_vm2, %v1665_v56, %v1667_v14  ;;  %v2137_v21 = vrot.slane %v2135_v11, 1  ;;  %v2140_v22 = vrot.slane %v2138_v12, 2 }
  0x68   : > { %v2141_v27 = vor.u32 %v2140_v22, %v2137_v21  ;;  %v1237_v21 = vsel %vm1222_vm2, %v1234_v53, %v1236_v16  ;;  %v5538_v53 = vld [vmem:[%s5751_s27 + $0x58] sm:$0xff] }
  0x6a   : > { %v2142_v33 = vsel %vm2089_vm4, %v2132_v2, %v2141_v27  ;;  %v2156_v2 = vshll.u32 %v5553_v61, 16 }
  0x6c   : > { %v2158_v12 = vrot.slane %v2156_v2, 2 }
  0x73   : > { %4818 = vmatmul.msk.bf16.gmra.mxu1 %vm350_vm1, %v697_v29 }
  0x74   : > { %4909 = vmatmul.msk.bf16.gmra.mxu2 %vm350_vm1, %v1227_v30  ;;  %5091 = vmatmul.msk.bf16.gmra.mxu0 %vm350_vm1, %v2115_v31  ;;  %v721_v30 = vsel %vm677_vm3, %v716_v24, %v720_v25  ;;  %v1233_v31 = vsel %vm1222_vm2, %v1230_v1, %v1232_v26  ;;  %v2153_v1 = vshrl.u32 %v5553_v61, 16  ;;  %v5554_v24 = vld [vmem:[%s5751_s27 + $0x48] sm:$0xff]  ;;  %v5500_v26 = vld [vmem:[%s5751_s27 + $0x40] sm:$0xff] }
  0x75   : > { %5002 = vmatmul.msk.bf16.gmra.mxu3 %vm350_vm1, %v1664_v41  ;;  %v1669_v41 = vrot.slane %v5535_v37, 1  ;;  %v742_v34 = vshll.u32 %v5500_v26, 16 }
  0x76   : > { %v2155_v11 = vrot.slane %v2153_v1, 1 }
  0x77   : > { %v1670_v46 = vsel %vm1222_vm2, %v1667_v14, %v1669_v41 }
  0x78   : > { %v2159_v17 = vor.u32 %v2158_v12, %v2155_v11 }
  0x83   : > { %4819 = vmatmul.msk.bf16.gmra.mxu1 %vm350_vm1, %v705_v48  ;;  %v2146_v48 = vrot.slane %v2144_v38, 1 }
  0x84   : > { %4910 = vmatmul.msk.bf16.gmra.mxu2 %vm350_vm1, %v1229_v49  ;;  %5092 = vmatmul.msk.bf16.gmra.mxu0 %vm350_vm1, %v2124_v50  ;;  %v2149_v49 = vrot.slane %v2147_v39, 2 }
  0x85   : > { %5003 = vmatmul.msk.bf16.gmra.mxu3 %vm350_vm1, %v1666_v60 }
  0x86   : > { %v2150_v54 = vor.u32 %v2149_v49, %v2146_v48 }
  0x88   : > { %v2151_v60 = vsel %vm2089_vm4, %v2141_v27, %v2150_v54  ;;  %v5537_v27 = vld [vmem:[%s5751_s27 + $0x50] sm:$0xff] }
  0x90   : > { %v443_v3 = vpop.f32.mrf.mxu1 }
  0x91   : > { %519 = vst.msk [vmem:[#allocation2 + $0x50] sm:$0xff] %vm508_vm5, %v443_v3  ;;  %v418_v6 = vpop.f32.mrf.mxu0 }
  0x92   : > { %509 = vst.msk [vmem:[#allocation2] sm:$0xff] %vm508_vm5, %v418_v6  ;;  %v730_v6 = vshrl.u32 %v5498_v36, 16 }
  0x93   : > { %4820 = vmatmul.msk.bf16.gmra.mxu1 %vm350_vm1, %v713_v4  ;;  %v1671_v4 = vrot.slane %v5536_v0, 1 }
  0x94   : > { %4911 = vmatmul.msk.bf16.gmra.mxu2 %vm350_vm1, %v1231_v5  ;;  %5093 = vmatmul.msk.bf16.gmra.mxu0 %vm350_vm1, %v2133_v7  ;;  %v734_v7 = vshll.u32 %v5499_v63, 16  ;;  %v732_v14 = vor.u32 %v730_v6, %v728_v52  ;;  %v5501_v52 = vld [vmem:[%s5751_s27 + $0x48] sm:$0xff] }
  0x95   : > { %5004 = vmatmul.msk.bf16.gmra.mxu3 %vm350_vm1, %v1668_v19  ;;  %v1672_v9 = vsel %vm1222_vm2, %v1669_v41, %v1671_v4  ;;  %v744_v41 = vrot.slane %v742_v34, 1  ;;  %v750_v61 = vshll.u32 %v5501_v52, 16 }
  0x97   : > { %v468_v13 = vpop.f32.mrf.mxu2 }
  0x98   : > { %529 = vst.msk [vmem:[#allocation2 + $0xa0] sm:$0xff] %vm508_vm5, %v468_v13  ;;  %v445_v15 = vpop.f32.mrf.mxu1  ;;  %v493_v23 = vpop.f32.mrf.mxu3 }
  0x99   : > { %520 = vst.msk [vmem:[#allocation2 + $0x58] sm:$0xff] %vm508_vm5, %v445_v15  ;;  %v420_v20 = vpop.f32.mrf.mxu0  ;;  %v736_v15 = vrot.slane %v734_v7, 1 }
  0x9a   : > { %510 = vst.msk [vmem:[#allocation2 + $0x8] sm:$0xff] %vm508_vm5, %v420_v20 }
  0x9b   : > { %539 = vst.msk [vmem:[#allocation2 + $0xf0] sm:$0xff] %vm508_vm5, %v493_v23  ;;  %v737_v20 = vsel %vm677_vm3, %v732_v14, %v736_v15  ;;  %v2160_v23 = vsel %vm2089_vm4, %v2150_v54, %v2159_v17 }
  0x9f   : > { %v470_v28 = vpop.f32.mrf.mxu2 }
  0xa0   : > { %530 = vst.msk [vmem:[#allocation2 + $0xa8] sm:$0xff] %vm508_vm5, %v470_v28  ;;  %v448_v29 = vpop.f32.mrf.mxu1  ;;  %v495_v35 = vpop.f32.mrf.mxu3  ;;  %v2162_v28 = vshrl.u32 %v5554_v24, 16 }
  0xa1   : > { %521 = vst.msk [vmem:[#allocation2 + $0x60] sm:$0xff] %vm508_vm5, %v448_v29  ;;  %v423_v32 = vpop.f32.mrf.mxu0  ;;  %v2165_v29 = vshll.u32 %v5554_v24, 16 }
  0xa2   : > { %511 = vst.msk [vmem:[#allocation2 + $0x10] sm:$0xff] %vm508_vm5, %v423_v32  ;;  %v2164_v38 = vrot.slane %v2162_v28, 1  ;;  %v5981_v28 = vld [vmem:[%s5751_s27 + $0x50] sm:$0xff] }
  0xa3   : > { %4821 = vmatmul.msk.bf16.gmra.mxu1 %vm350_vm1, %v721_v30  ;;  %540 = vst.msk [vmem:[#allocation2 + $0xf8] sm:$0xff] %vm508_vm5, %v495_v35  ;;  %v5518_v35 = vld [vmem:[%s5751_s27 + $0x40] sm:$0xff]  ;;  %v2167_v39 = vrot.slane %v2165_v29, 2 }
  0xa4   : > { %4912 = vmatmul.msk.bf16.gmra.mxu2 %vm350_vm1, %v1233_v31  ;;  %5094 = vmatmul.msk.bf16.gmra.mxu0 %vm350_vm1, %v2142_v33  ;;  %v1673_v31 = vrot.slane %v5537_v27, 1  ;;  %v738_v33 = vshrl.u32 %v5499_v63, 16 }
  0xa5   : > { %5005 = vmatmul.msk.bf16.gmra.mxu3 %vm350_vm1, %v1670_v46  ;;  %v2168_v43 = vor.u32 %v2167_v39, %v2164_v38  ;;  %v1242_v38 = vrot.slane %v5981_v28, 1 }
  0xa6   : > { %v1674_v36 = vsel %vm1222_vm2, %v1671_v4, %v1673_v31  ;;  %v752_v4 = vrot.slane %v750_v61, 1 }
  0xa7   : > { %v473_v40 = vpop.f32.mrf.mxu2 }
  0xa8   : > { %531 = vst.msk [vmem:[#allocation2 + $0xb0] sm:$0xff] %vm508_vm5, %v473_v40  ;;  %v450_v42 = vpop.f32.mrf.mxu1  ;;  %v498_v50 = vpop.f32.mrf.mxu3  ;;  %v740_v40 = vor.u32 %v738_v33, %v736_v15 }
  0xa9   : > { %522 = vst.msk [vmem:[#allocation2 + $0x68] sm:$0xff] %vm508_vm5, %v450_v42  ;;  %v425_v47 = vpop.f32.mrf.mxu0  ;;  %v1238_v42 = vrot.slane %v5518_v35, 1 }
  0xaa   : > { %512 = vst.msk [vmem:[#allocation2 + $0x18] sm:$0xff] %vm508_vm5, %v425_v47  ;;  %v745_v47 = vsel %vm677_vm3, %v740_v40, %v744_v41 }
  0xab   : > { %541 = vst.msk [vmem:[#allocation2 + $0x100] sm:$0xff] %vm508_vm5, %v498_v50  ;;  %v1239_v48 = vsel %vm1222_vm2, %v1236_v16, %v1238_v42  ;;  %v2169_v50 = vsel %vm2089_vm4, %v2159_v17, %v2168_v43  ;;  %v5556_v16 = vld [vmem:[%s5751_s27 + $0x58] sm:$0xff]  ;;  %v5973_v17 = vld [vmem:[%s5751_s27 + $0x50] sm:$0xff] }
  0xac   : > { %v758_v27 = vshll.u32 %v5973_v17, 16 }
  0xaf   : > { %v475_v55 = vpop.f32.mrf.mxu2 }
  0xb0   : > { %532 = vst.msk [vmem:[#allocation2 + $0xb8] sm:$0xff] %vm508_vm5, %v475_v55  ;;  %v453_v56 = vpop.f32.mrf.mxu1  ;;  %v500_v62 = vpop.f32.mrf.mxu3  ;;  %v2171_v55 = vshrl.u32 %v5555_v51, 16 }
  0xb1   : > { %523 = vst.msk [vmem:[#allocation2 + $0x70] sm:$0xff] %vm508_vm5, %v453_v56  ;;  %v428_v59 = vpop.f32.mrf.mxu0  ;;  %v2174_v56 = vshll.u32 %v5555_v51, 16 }
  0xb2   : > { %513 = vst.msk [vmem:[#allocation2 + $0x20] sm:$0xff] %vm508_vm5, %v428_v59  ;;  %v2173_v1 = vrot.slane %v2171_v55, 1  ;;  %v6002_v55 = vld [vmem:[%s5751_s27 + $0x58] sm:$0xff] }
  0xb3   : > { %4822 = vmatmul.msk.bf16.gmra.mxu1 %vm350_vm1, %v729_v57  ;;  %542 = vst.msk [vmem:[#allocation2 + $0x108] sm:$0xff] %vm508_vm5, %v500_v62  ;;  %v5519_v62 = vld [vmem:[%s5751_s27 + $0x48] sm:$0xff]  ;;  %v2176_v2 = vrot.slane %v2174_v56, 2 }
  0xb4   : > { %4913 = vmatmul.msk.bf16.gmra.mxu2 %vm350_vm1, %v1235_v58  ;;  %5095 = vmatmul.msk.bf16.gmra.mxu0 %vm350_vm1, %v2151_v60  ;;  %v1675_v58 = vrot.slane %v5538_v53, 1  ;;  %v746_v60 = vshrl.u32 %v5500_v26, 16  ;;  %v754_v26 = vshrl.u32 %v5501_v52, 16  ;;  %v6006_v56 = vld [vmem:[%s5751_s27 + $0x68] sm:$0xff] }
  0xb5   : > { %5006 = vmatmul.msk.bf16.gmra.mxu3 %vm350_vm1, %v1672_v9  ;;  %v2177_v6 = vor.u32 %v2176_v2, %v2173_v1  ;;  %v762_v1 = vshrl.u32 %v5973_v17, 16  ;;  %v766_v2 = vshll.u32 %v6002_v55, 16 }
  0xb6   : > { %v1676_v63 = vsel %vm1222_vm2, %v1673_v31, %v1675_v58 }
  0xb7   : > { %v478_v3 = vpop.f32.mrf.mxu2  ;;  %v2178_v15 = vsel %vm2089_vm4, %v2168_v43, %v2177_v6  ;;  %v984_v43 = vld [vmem:[#allocation2 + $0x10] sm:$0xff] }
  0xb8   : > { %533 = vst.msk [vmem:[#allocation2 + $0xc0] sm:$0xff] %vm508_vm5, %v478_v3  ;;  %v455_v5 = vpop.f32.mrf.mxu1  ;;  %v503_v13 = vpop.f32.mrf.mxu3  ;;  %v748_v3 = vor.u32 %v746_v60, %v744_v41 }
  0xb9   : > { %524 = vst.msk [vmem:[#allocation2 + $0x78] sm:$0xff] %vm508_vm5, %v455_v5  ;;  %v430_v10 = vpop.f32.mrf.mxu0  ;;  %v1240_v5 = vrot.slane %v5519_v62, 1  ;;  %v1679_v62 = vrot.slane %v6006_v56, 1 }
  0xba   : > { %514 = vst.msk [vmem:[#allocation2 + $0x28] sm:$0xff] %vm508_vm5, %v430_v10  ;;  %v982_v10 = vld [vmem:[#allocation2] sm:$0xff]  ;;  %v753_v11 = vsel %vm677_vm3, %v748_v3, %v752_v4  ;;  %v6017_v3 = vld [vmem:[%s5751_s27 + $0x58] sm:$0xff] }
  0xbb   : > { %543 = vst.msk [vmem:[#allocation2 + $0x110] sm:$0xff] %vm508_vm5, %v503_v13  ;;  %v1241_v12 = vsel %vm1222_vm2, %v1238_v42, %v1240_v5 }
  0xbf   : > { %v480_v18 = vpop.f32.mrf.mxu2 }
  0xc0   : > { %534 = vst.msk [vmem:[#allocation2 + $0xc8] sm:$0xff] %vm508_vm5, %v480_v18  ;;  %v458_v19 = vpop.f32.mrf.mxu1  ;;  %v505_v25 = vpop.f32.mrf.mxu3  ;;  %v5539_v18 = vld [vmem:[%s5751_s27 + $0x60] sm:$0xff] }
  0xc1   : > { %525 = vst.msk [vmem:[#allocation2 + $0x80] sm:$0xff] %vm508_vm5, %v458_v19  ;;  %v433_v22 = vpop.f32.mrf.mxu0 }
  0xc2   : > { %515 = vst.msk [vmem:[#allocation2 + $0x30] sm:$0xff] %vm508_vm5, %v433_v22 }
  0xc3   : > { %4823 = vmatmul.msk.bf16.gmra.mxu1 %vm350_vm1, %v737_v20  ;;  %544 = vst.msk [vmem:[#allocation2 + $0x118] sm:$0xff] %vm508_vm5, %v505_v25  ;;  %v2180_v20 = vshrl.u32 %v5556_v16, 16  ;;  %v983_v25 = vld [vmem:[#allocation2 + $0x8] sm:$0xff] }
  0xc4   : > { %4914 = vmatmul.msk.bf16.gmra.mxu2 %vm350_vm1, %v1237_v21  ;;  %5096 = vmatmul.msk.bf16.gmra.mxu0 %vm350_vm1, %v2160_v23  ;;  %v2183_v21 = vshll.u32 %v5556_v16, 16  ;;  %v1677_v23 = vrot.slane %v5539_v18, 1 }
  0xc5   : > { %5007 = vmatmul.msk.bf16.gmra.mxu3 %vm350_vm1, %v1674_v36  ;;  %v756_v36 = vor.u32 %v754_v26, %v752_v4 }
  0xc6   : > { %v1678_v29 = vsel %vm1222_vm2, %v1675_v58, %v1677_v23  ;;  %v2185_v33 = vrot.slane %v2183_v21, 2 }
  0xc7   : > { %v483_v30 = vpop.f32.mrf.mxu2 }
  0xc8   : > { %535 = vst.msk [vmem:[#allocation2 + $0xd0] sm:$0xff] %vm508_vm5, %v483_v30  ;;  %v460_v32 = vpop.f32.mrf.mxu1  ;;  %v5938_v44 = vpop.f32.mrf.mxu3 }
  0xc9   : > { %526 = vst.msk [vmem:[#allocation2 + $0x88] sm:$0xff] %vm508_vm5, %v460_v32  ;;  %v435_v37 = vpop.f32.mrf.mxu0  ;;  %v2182_v32 = vrot.slane %v2180_v20, 1 }
  0xca   : > { %516 = vst.msk [vmem:[#allocation2 + $0x38] sm:$0xff] %vm508_vm5, %v435_v37  ;;  %v760_v37 = vrot.slane %v758_v27, 1 }
  0xcb   : > { %v2186_v39 = vor.u32 %v2185_v33, %v2182_v32  ;;  %v6047_v33 = vld [vmem:[%s5751_s27 + $0x60] sm:$0xff] }
  0xcf   : > { %v485_v45 = vpop.f32.mrf.mxu2 }
  0xd0   : > { %536 = vst.msk [vmem:[#allocation2 + $0xd8] sm:$0xff] %vm508_vm5, %v485_v45  ;;  %v463_v46 = vpop.f32.mrf.mxu1  ;;  %v5952_v54 = vpop.f32.mrf.mxu3  ;;  %v761_v45 = vsel %vm677_vm3, %v756_v36, %v760_v37 }
  0xd1   : > { %527 = vst.msk [vmem:[#allocation2 + $0x90] sm:$0xff] %vm508_vm5, %v463_v46  ;;  %v438_v49 = vpop.f32.mrf.mxu0  ;;  %v1243_v46 = vsel %vm1222_vm2, %v1240_v5, %v1242_v38 }
  0xd2   : > { %517 = vst.msk [vmem:[#allocation2 + $0x40] sm:$0xff] %vm508_vm5, %v438_v49  ;;  %v2187_v49 = vsel %vm2089_vm4, %v2177_v6, %v2186_v39 }
  0xd3   : > { %4824 = vmatmul.msk.bf16.gmra.mxu1 %vm350_vm1, %v745_v47 }
  0xd4   : > { %4915 = vmatmul.msk.bf16.gmra.mxu2 %vm350_vm1, %v1239_v48  ;;  %5097 = vmatmul.msk.bf16.gmra.mxu0 %vm350_vm1, %v2169_v50  ;;  %v5557_v50 = vld [vmem:[%s5751_s27 + $0x60] sm:$0xff] }
  0xd5   : > { %5008 = vmatmul.msk.bf16.gmra.mxu3 %vm350_vm1, %v1676_v63  ;;  %v2192_v60 = vshll.u32 %v5557_v50, 16 }
  0xd7   : > { %v488_v57 = vpop.f32.mrf.mxu2 }
  0xd8   : > { %537 = vst.msk [vmem:[#allocation2 + $0xe0] sm:$0xff] %vm508_vm5, %v488_v57  ;;  %v465_v59 = vpop.f32.mrf.mxu1  ;;  %v5960_v7 = vpop.f32.mrf.mxu3 }
  0xd9   : > { %528 = vst.msk [vmem:[#allocation2 + $0x98] sm:$0xff] %vm508_vm5, %v465_v59  ;;  %v440_v0 = vpop.f32.mrf.mxu0  ;;  %v2189_v59 = vshrl.u32 %v5557_v50, 16 }
  0xda   : > { %518 = vst.msk [vmem:[#allocation2 + $0x48] sm:$0xff] %vm508_vm5, %v440_v0  ;;  %v985_v0 = vld [vmem:[#allocation2 + $0x18] sm:$0xff] }
  0xdb   : > { %v2191_v6 = vrot.slane %v2189_v59, 1 }
  0xdf   : > { %v490_v8 = vpop.f32.mrf.mxu2 }
  0xe0   : > { %538 = vst.msk [vmem:[#allocation2 + $0xe8] sm:$0xff] %vm508_vm5, %v490_v8  ;;  %v892_v9 = vpop.f32.mrf.mxu1  ;;  %v5977_v19 = vpop.f32.mrf.mxu3  ;;  %v2194_v8 = vrot.slane %v2192_v60, 2 }
  0xe1   : > { %v1018_v13 = vadd.f32 %v982_v10, %v892_v9  ;;  %v5965_v14 = vpop.f32.mrf.mxu0 }
  0xe2   : > { %v6027_v17 = vor.u32 %v2194_v8, %v2191_v6  ;;  %v988_v6 = vld [vmem:[#allocation2 + $0x30] sm:$0xff] }
  0xe3   : > { %1054 = vst.msk [vmem:[#allocation2] sm:$0xff] %vm508_vm5, %v1018_v13  ;;  %4825 = vmatmul.msk.bf16.gmra.mxu1 %vm350_vm1, %v753_v11  ;;  %v768_v13 = vrot.slane %v766_v2, 1 }
  0xe4   : > { %4916 = vmatmul.msk.bf16.gmra.mxu2 %vm350_vm1, %v1241_v12  ;;  %5098 = vmatmul.msk.bf16.gmra.mxu0 %vm350_vm1, %v2178_v15  ;;  %v764_v12 = vor.u32 %v762_v1, %v760_v37  ;;  %v1244_v15 = vrot.slane %v6017_v3, 1  ;;  %v2196_v28 = vsel %vm2089_vm4, %v2186_v39, %v6027_v17 }
  0xe5   : > { %5009 = vmatmul.msk.bf16.gmra.mxu3 %vm350_vm1, %v1678_v29  ;;  %v5558_v29 = vld [vmem:[%s5751_s27 + $0x68] sm:$0xff] }
  0xe6   : > { %v2198_v37 = vshrl.u32 %v5558_v29, 16 }
  0xe7   : > { %v1326_v22 = vpop.f32.mrf.mxu2 }
  0xe8   : > { %v894_v24 = vpop.f32.mrf.mxu1  ;;  %v5990_v40 = vpop.f32.mrf.mxu3 }
  0xe9   : > { %v1019_v30 = vadd.f32 %v983_v25, %v894_v24  ;;  %v5984_v31 = vpop.f32.mrf.mxu0  ;;  %v986_v24 = vld [vmem:[#allocation2 + $0x20] sm:$0xff]  ;;  %v769_v25 = vsel %vm677_vm3, %v764_v12, %v768_v13 }
  0xea   : > { %v1416_v34 = vld [vmem:[#allocation2] sm:$0xff] }
  0xeb   : > { %v1452_v35 = vadd.f32 %v1416_v34, %v1326_v22  ;;  %1055 = vst.msk [vmem:[#allocation2 + $0x8] sm:$0xff] %vm508_vm5, %v1019_v30  ;;  %v6051_v34 = vld [vmem:[%s5751_s27 + $0x70] sm:$0xff] }
  0xed   : > { %1488 = vst.msk [vmem:[#allocation2] sm:$0xff] %vm508_vm5, %v1452_v35 }
  0xef   : > { %v1328_v41 = vpop.f32.mrf.mxu2 }
  0xf0   : > { %v897_v42 = vpop.f32.mrf.mxu1  ;;  %v6010_v58 = vpop.f32.mrf.mxu3 }
  0xf1   : > { %v1020_v47 = vadd.f32 %v984_v43, %v897_v42  ;;  %v5994_v48 = vpop.f32.mrf.mxu0  ;;  %v1681_v42 = vrot.slane %v6051_v34, 1 }
  0xf2   : > { %v1417_v51 = vld [vmem:[#allocation2 + $0x8] sm:$0xff] }
  0xf3   : > { %v1453_v52 = vadd.f32 %v1417_v51, %v1328_v41  ;;  %1056 = vst.msk [vmem:[#allocation2 + $0x10] sm:$0xff] %vm508_vm5, %v1020_v47  ;;  %4826 = vmatmul.msk.bf16.gmra.mxu1 %vm350_vm1, %v761_v45  ;;  %v770_v47 = vshrl.u32 %v6002_v55, 16  ;;  %v1682_v50 = vsel %vm1222_vm2, %v1679_v62, %v1681_v42 }
  0xf4   : > { %4917 = vmatmul.msk.bf16.gmra.mxu2 %vm350_vm1, %v1243_v46  ;;  %v1849_v53 = vld [vmem:[#allocation2] sm:$0xff]  ;;  %5099 = vmatmul.msk.bf16.gmra.mxu0 %vm350_vm1, %v2187_v49  ;;  %v987_v46 = vld [vmem:[#allocation2 + $0x28] sm:$0xff] }
  0xf5   : > { %v1885_v57 = vadd.f32 %v1849_v53, %v5938_v44  ;;  %1489 = vst.msk [vmem:[#allocation2 + $0x8] sm:$0xff] %vm508_vm5, %v1453_v52  ;;  %v1680_v44 = vsel %vm1222_vm2, %v1677_v23, %v1679_v62  ;;  %v6063_v49 = vld [vmem:[%s5751_s27 + $0x60] sm:$0xff]  ;;  %v2200_v53 = vrot.slane %v2198_v37, 1  ;;  %v772_v59 = vor.u32 %v770_v47, %v768_v13 }
  0xf6   : > { %5010 = vmatmul.msk.bf16.gmra.mxu3 %vm350_vm1, %v1680_v44 }
  0xf7   : > { %v1331_v61 = vpop.f32.mrf.mxu2  ;;  %1921 = vst.msk [vmem:[#allocation2] sm:$0xff] %vm508_vm5, %v1885_v57 }
  0xf8   : > { %v899_v63 = vpop.f32.mrf.mxu1  ;;  %v6029_v18 = vpop.f32.mrf.mxu3 }
  0xf9   : > { %v1021_v4 = vadd.f32 %v985_v0, %v899_v63  ;;  %v6020_v5 = vpop.f32.mrf.mxu0 }
  0xfa   : > { %v1418_v9 = vld [vmem:[#allocation2 + $0x10] sm:$0xff] }
  0xfb   : > { %v1454_v10 = vadd.f32 %v1418_v9, %v1331_v61  ;;  %1057 = vst.msk [vmem:[#allocation2 + $0x18] sm:$0xff] %vm508_vm5, %v1021_v4  ;;  %v1246_v61 = vrot.slane %v6063_v49, 1 }
  0xfc   : > { %v1850_v11 = vld [vmem:[#allocation2 + $0x8] sm:$0xff] }
  0xfd   : > { %v1886_v16 = vadd.f32 %v1850_v11, %v5952_v54  ;;  %1490 = vst.msk [vmem:[#allocation2 + $0x10] sm:$0xff] %vm508_vm5, %v1454_v10  ;;  %v1245_v54 = vsel %vm1222_vm2, %v1242_v38, %v1244_v15  ;;  %v2201_v38 = vshll.u32 %v5558_v29, 16  ;;  %v5559_v11 = vld [vmem:[%s5751_s27 + $0x70] sm:$0xff]  ;;  %v778_v29 = vshrl.u32 %v6047_v33, 16 }
  0xfe   : > { %v2416_v20 = vld [vmem:[#allocation2] sm:$0xff] }
  0xff   : > { %v1333_v21 = vpop.f32.mrf.mxu2  ;;  %1922 = vst.msk [vmem:[#allocation2 + $0x8] sm:$0xff] %vm508_vm5, %v1886_v16  ;;  %v2452_v22 = vadd.f32 %v2416_v20, %v5965_v14  ;;  %v2203_v56 = vrot.slane %v2201_v38, 2  ;;  %v6103_v16 = vld [vmem:[%s5751_s27 + $0x78] sm:$0xff] }
 0x100   : > { %v902_v23 = vpop.f32.mrf.mxu1  ;;  %v6055_v36 = vpop.f32.mrf.mxu3 }
 0x101   : > { %2488 = vst.msk [vmem:[#allocation2] sm:$0xff] %vm508_vm5, %v2452_v22  ;;  %v1022_v26 = vadd.f32 %v986_v24, %v902_v23  ;;  %v6038_v27 = vpop.f32.mrf.mxu0  ;;  %v6076_v63 = vor.u32 %v2203_v56, %v2200_v53  ;;  %v2210_v22 = vshll.u32 %v5559_v11, 16  ;;  %v990_v53 = vld [vmem:[#allocation2 + $0x40] sm:$0xff] }
 0x102   : > { %v1419_v14 = vld [vmem:[#allocation2 + $0x18] sm:$0xff] }
 0x103   : > { %v1455_v30 = vadd.f32 %v1419_v14, %v1333_v21  ;;  %1058 = vst.msk [vmem:[#allocation2 + $0x20] sm:$0xff] %vm508_vm5, %v1022_v26  ;;  %4827 = vmatmul.msk.bf16.gmra.mxu1 %vm350_vm1, %v769_v25  ;;  %v2207_v21 = vshrl.u32 %v5559_v11, 16  ;;  %v1683_v25 = vrot.slane %v6103_v16, 1  ;;  %v6115_v14 = vld [vmem:[%s5751_s27 + $0x68] sm:$0xff]  ;;  %v2212_v37 = vrot.slane %v2210_v22, 2 }
 0x104   : > { %4918 = vmatmul.msk.bf16.gmra.mxu2 %vm350_vm1, %v1245_v54  ;;  %v1851_v32 = vld [vmem:[#allocation2 + $0x10] sm:$0xff]  ;;  %5100 = vmatmul.msk.bf16.gmra.mxu0 %vm350_vm1, %v2196_v28  ;;  %v989_v28 = vld [vmem:[#allocation2 + $0x38] sm:$0xff]  ;;  %v1248_v34 = vrot.slane %v6115_v14, 1 }
 0x105   : > { %v1887_v35 = vadd.f32 %v1851_v32, %v5960_v7  ;;  %1491 = vst.msk [vmem:[#allocation2 + $0x18] sm:$0xff] %vm508_vm5, %v1455_v30  ;;  %v774_v7 = vshll.u32 %v6047_v33, 16  ;;  %v1684_v30 = vsel %vm1222_vm2, %v1681_v42, %v1683_v25 }
 0x106   : > { %v2417_v39 = vld [vmem:[#allocation2 + $0x8] sm:$0xff]  ;;  %5011 = vmatmul.msk.bf16.gmra.mxu3 %vm350_vm1, %v1682_v50 }
 0x107   : > { %v1336_v41 = vpop.f32.mrf.mxu2  ;;  %1923 = vst.msk [vmem:[#allocation2 + $0x10] sm:$0xff] %vm508_vm5, %v1887_v35  ;;  %v2453_v43 = vadd.f32 %v2417_v39, %v5984_v31  ;;  %v776_v60 = vrot.slane %v774_v7, 1 }
 0x108   : > { %v904_v45 = vpop.f32.mrf.mxu1  ;;  %v6078_v0 = vpop.f32.mrf.mxu3 }
 0x109   : > { %2489 = vst.msk [vmem:[#allocation2 + $0x8] sm:$0xff] %vm508_vm5, %v2453_v43  ;;  %v1023_v51 = vadd.f32 %v987_v46, %v904_v45  ;;  %v6069_v52 = vpop.f32.mrf.mxu0  ;;  %v777_v8 = vsel %vm677_vm3, %v772_v59, %v776_v60 }
 0x10a   : > { %v1420_v31 = vld [vmem:[#allocation2 + $0x20] sm:$0xff] }
 0x10b   : > { %v1456_v57 = vadd.f32 %v1420_v31, %v1336_v41  ;;  %1059 = vst.msk [vmem:[#allocation2 + $0x28] sm:$0xff] %vm508_vm5, %v1023_v51  ;;  %v780_v41 = vor.u32 %v778_v29, %v776_v60 }
 0x10c   : > { %v1852_v55 = vld [vmem:[#allocation2 + $0x18] sm:$0xff] }
 0x10d   : > { %v1888_v62 = vadd.f32 %v1852_v55, %v5977_v19  ;;  %1492 = vst.msk [vmem:[#allocation2 + $0x20] sm:$0xff] %vm508_vm5, %v1456_v57  ;;  %v1247_v19 = vsel %vm1222_vm2, %v1244_v15, %v1246_v61  ;;  %v6099_v15 = vld [vmem:[%s5751_s27 + $0x68] sm:$0xff]  ;;  %v5560_v55 = vld [vmem:[%s5751_s27 + $0x78] sm:$0xff] }
 0x10e   : > { %v2418_v1 = vld [vmem:[#allocation2 + $0x10] sm:$0xff]  ;;  %v786_v11 = vshrl.u32 %v6099_v15, 16 }
 0x10f   : > { %v1338_v2 = vpop.f32.mrf.mxu2  ;;  %1924 = vst.msk [vmem:[#allocation2 + $0x18] sm:$0xff] %vm508_vm5, %v1888_v62  ;;  %v2454_v44 = vadd.f32 %v2418_v1, %v5994_v48  ;;  %v2205_v48 = vsel %vm2089_vm4, %v6027_v17, %v6076_v63  ;;  %v6157_v62 = vld [vmem:[%s5751_s27 + $0x80] sm:$0xff] }
 0x110   : > { %v907_v4 = vpop.f32.mrf.mxu1  ;;  %v6107_v17 = vpop.f32.mrf.mxu3 }
 0x111   : > { %2490 = vst.msk [vmem:[#allocation2 + $0x10] sm:$0xff] %vm508_vm5, %v2454_v44  ;;  %v1024_v9 = vadd.f32 %v988_v6, %v907_v4  ;;  %v6089_v10 = vpop.f32.mrf.mxu0  ;;  %v2219_v44 = vshll.u32 %v5560_v55, 16 }
 0x112   : > { %v1421_v12 = vld [vmem:[#allocation2 + $0x28] sm:$0xff] }
 0x113   : > { %v1457_v13 = vadd.f32 %v1421_v12, %v1338_v2  ;;  %1060 = vst.msk [vmem:[#allocation2 + $0x30] sm:$0xff] %vm508_vm5, %v1024_v9  ;;  %4828 = vmatmul.msk.bf16.gmra.mxu1 %vm350_vm1, %v777_v8  ;;  %v2216_v2 = vshrl.u32 %v5560_v55, 16  ;;  %v1685_v8 = vrot.slane %v6157_v62, 1  ;;  %v6169_v12 = vld [vmem:[%s5751_s27 + $0x70] sm:$0xff] }
 0x114   : > { %4919 = vmatmul.msk.bf16.gmra.mxu2 %vm350_vm1, %v1247_v19  ;;  %v1853_v3 = vld [vmem:[#allocation2 + $0x20] sm:$0xff]  ;;  %5101 = vmatmul.msk.bf16.gmra.mxu0 %vm350_vm1, %v2205_v48  ;;  %v991_v48 = vld [vmem:[#allocation2 + $0x48] sm:$0xff]  ;;  %v1250_v16 = vrot.slane %v6169_v12, 1 }
 0x115   : > { %v1889_v20 = vadd.f32 %v1853_v3, %v5990_v40  ;;  %1493 = vst.msk [vmem:[#allocation2 + $0x28] sm:$0xff] %vm508_vm5, %v1457_v13  ;;  %v782_v40 = vshll.u32 %v6099_v15, 16  ;;  %v1686_v13 = vsel %vm1222_vm2, %v1683_v25, %v1685_v8 }
 0x116   : > { %v2419_v23 = vld [vmem:[#allocation2 + $0x18] sm:$0xff]  ;;  %5012 = vmatmul.msk.bf16.gmra.mxu3 %vm350_vm1, %v1684_v30 }
 0x117   : > { %v1341_v24 = vpop.f32.mrf.mxu2  ;;  %1925 = vst.msk [vmem:[#allocation2 + $0x20] sm:$0xff] %vm508_vm5, %v1889_v20  ;;  %v2455_v54 = vadd.f32 %v2419_v23, %v6020_v5  ;;  %v2209_v5 = vrot.slane %v2207_v21, 1  ;;  %v784_v43 = vrot.slane %v782_v40, 1  ;;  %v2221_v21 = vrot.slane %v2219_v44, 2 }
 0x118   : > { %v909_v26 = vpop.f32.mrf.mxu1  ;;  %v6132_v46 = vpop.f32.mrf.mxu3 }
 0x119   : > { %2491 = vst.msk [vmem:[#allocation2 + $0x18] sm:$0xff] %vm508_vm5, %v2455_v54  ;;  %v1025_v32 = vadd.f32 %v989_v28, %v909_v26  ;;  %v6123_v35 = vpop.f32.mrf.mxu0  ;;  %v6130_v45 = vor.u32 %v2212_v37, %v2209_v5  ;;  %v785_v56 = vsel %vm677_vm3, %v780_v41, %v784_v43  ;;  %v992_v5 = vld [vmem:[#allocation2 + $0x50] sm:$0xff] }
 0x11a   : > { %v1422_v38 = vld [vmem:[#allocation2 + $0x30] sm:$0xff] }
 0x11b   : > { %v1458_v33 = vadd.f32 %v1422_v38, %v1341_v24  ;;  %1061 = vst.msk [vmem:[#allocation2 + $0x38] sm:$0xff] %vm508_vm5, %v1025_v32  ;;  %v788_v24 = vor.u32 %v786_v11, %v784_v43 }
 0x11c   : > { %v1854_v39 = vld [vmem:[#allocation2 + $0x28] sm:$0xff] }
 0x11d   : > { %v1890_v42 = vadd.f32 %v1854_v39, %v6010_v58  ;;  %1494 = vst.msk [vmem:[#allocation2 + $0x30] sm:$0xff] %vm508_vm5, %v1458_v33  ;;  %v1249_v58 = vsel %vm1222_vm2, %v1246_v61, %v1248_v34  ;;  %v6153_v61 = vld [vmem:[%s5751_s27 + $0x70] sm:$0xff]  ;;  %v5561_v39 = vld [vmem:[%s5751_s27 + $0x80] sm:$0xff] }
 0x11e   : > { %v2420_v47 = vld [vmem:[#allocation2 + $0x20] sm:$0xff]  ;;  %v794_v55 = vshrl.u32 %v6153_v61, 16 }
 0x11f   : > { %v1343_v7 = vpop.f32.mrf.mxu2  ;;  %1926 = vst.msk [vmem:[#allocation2 + $0x28] sm:$0xff] %vm508_vm5, %v1890_v42  ;;  %v2456_v50 = vadd.f32 %v2420_v47, %v6038_v27  ;;  %v2214_v27 = vsel %vm2089_vm4, %v6076_v63, %v6130_v45  ;;  %v6211_v42 = vld [vmem:[%s5751_s27 + $0x88] sm:$0xff] }
 0x120   : > { %v912_v51 = vpop.f32.mrf.mxu1  ;;  %v6161_v63 = vpop.f32.mrf.mxu3 }
 0x121   : > { %2492 = vst.msk [vmem:[#allocation2 + $0x20] sm:$0xff] %vm508_vm5, %v2456_v50  ;;  %v1026_v31 = vadd.f32 %v990_v53, %v912_v51  ;;  %v6143_v57 = vpop.f32.mrf.mxu0  ;;  %v2228_v50 = vshll.u32 %v5561_v39, 16 }
 0x122   : > { %v1423_v59 = vld [vmem:[#allocation2 + $0x38] sm:$0xff] }
 0x123   : > { %v1459_v60 = vadd.f32 %v1423_v59, %v1343_v7  ;;  %1062 = vst.msk [vmem:[#allocation2 + $0x40] sm:$0xff] %vm508_vm5, %v1026_v31  ;;  %4829 = vmatmul.msk.bf16.gmra.mxu1 %vm350_vm1, %v785_v56  ;;  %v2225_v7 = vshrl.u32 %v5561_v39, 16  ;;  %v1687_v56 = vrot.slane %v6211_v42, 1  ;;  %v6223_v59 = vld [vmem:[%s5751_s27 + $0x78] sm:$0xff] }
 0x124   : > { %4920 = vmatmul.msk.bf16.gmra.mxu2 %vm350_vm1, %v1249_v58  ;;  %v1855_v49 = vld [vmem:[#allocation2 + $0x30] sm:$0xff]  ;;  %5102 = vmatmul.msk.bf16.gmra.mxu0 %vm350_vm1, %v2214_v27  ;;  %v993_v27 = vld [vmem:[#allocation2 + $0x58] sm:$0xff]  ;;  %v1252_v62 = vrot.slane %v6223_v59, 1 }
 0x125   : > { %v1891_v1 = vadd.f32 %v1855_v49, %v6029_v18  ;;  %1495 = vst.msk [vmem:[#allocation2 + $0x38] sm:$0xff] %vm508_vm5, %v1459_v60  ;;  %v790_v18 = vshll.u32 %v6153_v61, 16  ;;  %v1688_v60 = vsel %vm1222_vm2, %v1685_v8, %v1687_v56 }
 0x126   : > { %v2421_v4 = vld [vmem:[#allocation2 + $0x28] sm:$0xff]  ;;  %5013 = vmatmul.msk.bf16.gmra.mxu3 %vm350_vm1, %v1686_v13 }
 0x127   : > { %v1346_v6 = vpop.f32.mrf.mxu2  ;;  %1927 = vst.msk [vmem:[#allocation2 + $0x30] sm:$0xff] %vm508_vm5, %v1891_v1  ;;  %v2457_v19 = vadd.f32 %v2421_v4, %v6069_v52  ;;  %v2218_v52 = vrot.slane %v2216_v2, 1  ;;  %v792_v54 = vrot.slane %v790_v18, 1  ;;  %v2230_v2 = vrot.slane %v2228_v50, 2 }
 0x128   : > { %v914_v9 = vpop.f32.mrf.mxu1  ;;  %v6186_v28 = vpop.f32.mrf.mxu3 }
 0x129   : > { %2493 = vst.msk [vmem:[#allocation2 + $0x28] sm:$0xff] %vm508_vm5, %v2457_v19  ;;  %v1027_v3 = vadd.f32 %v991_v48, %v914_v9  ;;  %v6177_v20 = vpop.f32.mrf.mxu0  ;;  %v6184_v26 = vor.u32 %v2221_v21, %v2218_v52  ;;  %v793_v37 = vsel %vm677_vm3, %v788_v24, %v792_v54  ;;  %v994_v52 = vld [vmem:[#allocation2 + $0x60] sm:$0xff] }
 0x12a   : > { %v1424_v22 = vld [vmem:[#allocation2 + $0x40] sm:$0xff] }
 0x12b   : > { %v1460_v15 = vadd.f32 %v1424_v22, %v1346_v6  ;;  %1063 = vst.msk [vmem:[#allocation2 + $0x48] sm:$0xff] %vm508_vm5, %v1027_v3  ;;  %v796_v6 = vor.u32 %v794_v55, %v792_v54 }
 0x12c   : > { %v1856_v23 = vld [vmem:[#allocation2 + $0x38] sm:$0xff] }
 0x12d   : > { %v1892_v25 = vadd.f32 %v1856_v23, %v6055_v36  ;;  %1496 = vst.msk [vmem:[#allocation2 + $0x40] sm:$0xff] %vm508_vm5, %v1460_v15  ;;  %v1251_v36 = vsel %vm1222_vm2, %v1248_v34, %v1250_v16  ;;  %v6207_v34 = vld [vmem:[%s5751_s27 + $0x78] sm:$0xff]  ;;  %v5562_v23 = vld [vmem:[%s5751_s27 + $0x88] sm:$0xff] }
 0x12e   : > { %v2422_v29 = vld [vmem:[#allocation2 + $0x30] sm:$0xff]  ;;  %v802_v39 = vshrl.u32 %v6207_v34, 16 }
 0x12f   : > { %v1348_v40 = vpop.f32.mrf.mxu2  ;;  %1928 = vst.msk [vmem:[#allocation2 + $0x38] sm:$0xff] %vm508_vm5, %v1892_v25  ;;  %v2458_v30 = vadd.f32 %v2422_v29, %v6089_v10  ;;  %v2223_v10 = vsel %vm2089_vm4, %v6130_v45, %v6184_v26  ;;  %v6265_v25 = vld [vmem:[%s5751_s27 + $0x90] sm:$0xff] }
 0x130   : > { %v917_v32 = vpop.f32.mrf.mxu1  ;;  %v6215_v45 = vpop.f32.mrf.mxu3 }
 0x131   : > { %2494 = vst.msk [vmem:[#allocation2 + $0x30] sm:$0xff] %vm508_vm5, %v2458_v30  ;;  %v1028_v38 = vadd.f32 %v992_v5, %v917_v32  ;;  %v6197_v33 = vpop.f32.mrf.mxu0  ;;  %v2237_v30 = vshll.u32 %v5562_v23, 16 }
 0x132   : > { %v1425_v41 = vld [vmem:[#allocation2 + $0x48] sm:$0xff] }
 0x133   : > { %v1461_v43 = vadd.f32 %v1425_v41, %v1348_v40  ;;  %1064 = vst.msk [vmem:[#allocation2 + $0x50] sm:$0xff] %vm508_vm5, %v1028_v38  ;;  %4830 = vmatmul.msk.bf16.gmra.mxu1 %vm350_vm1, %v793_v37  ;;  %v2234_v40 = vshrl.u32 %v5562_v23, 16  ;;  %v1689_v37 = vrot.slane %v6265_v25, 1  ;;  %v6277_v41 = vld [vmem:[%s5751_s27 + $0x80] sm:$0xff] }
 0x134   : > { %4921 = vmatmul.msk.bf16.gmra.mxu2 %vm350_vm1, %v1251_v36  ;;  %v1857_v14 = vld [vmem:[#allocation2 + $0x40] sm:$0xff]  ;;  %5103 = vmatmul.msk.bf16.gmra.mxu0 %vm350_vm1, %v2223_v10  ;;  %v995_v10 = vld [vmem:[#allocation2 + $0x68] sm:$0xff]  ;;  %v1254_v42 = vrot.slane %v6277_v41, 1 }
 0x135   : > { %v1893_v47 = vadd.f32 %v1857_v14, %v6078_v0  ;;  %1497 = vst.msk [vmem:[#allocation2 + $0x48] sm:$0xff] %vm508_vm5, %v1461_v43  ;;  %v798_v0 = vshll.u32 %v6207_v34, 16  ;;  %v1690_v43 = vsel %vm1222_vm2, %v1687_v56, %v1689_v37 }
 0x136   : > { %v2423_v51 = vld [vmem:[#allocation2 + $0x38] sm:$0xff]  ;;  %5014 = vmatmul.msk.bf16.gmra.mxu3 %vm350_vm1, %v1688_v60 }
 0x137   : > { %v1351_v53 = vpop.f32.mrf.mxu2  ;;  %1929 = vst.msk [vmem:[#allocation2 + $0x40] sm:$0xff] %vm508_vm5, %v1893_v47  ;;  %v2459_v58 = vadd.f32 %v2423_v51, %v6123_v35  ;;  %v2227_v35 = vrot.slane %v2225_v7, 1  ;;  %v800_v19 = vrot.slane %v798_v0, 1  ;;  %v2239_v7 = vrot.slane %v2237_v30, 2 }
 0x138   : > { %v919_v31 = vpop.f32.mrf.mxu1  ;;  %v6240_v48 = vpop.f32.mrf.mxu3 }
 0x139   : > { %2495 = vst.msk [vmem:[#allocation2 + $0x38] sm:$0xff] %vm508_vm5, %v2459_v58  ;;  %v1029_v49 = vadd.f32 %v993_v27, %v919_v31  ;;  %v6231_v1 = vpop.f32.mrf.mxu0  ;;  %v6238_v9 = vor.u32 %v2230_v2, %v2227_v35  ;;  %v801_v21 = vsel %vm677_vm3, %v796_v6, %v800_v19  ;;  %v996_v35 = vld [vmem:[#allocation2 + $0x70] sm:$0xff] }
 0x13a   : > { %v1426_v44 = vld [vmem:[#allocation2 + $0x50] sm:$0xff] }
 0x13b   : > { %v1462_v61 = vadd.f32 %v1426_v44, %v1351_v53  ;;  %1065 = vst.msk [vmem:[#allocation2 + $0x58] sm:$0xff] %vm508_vm5, %v1029_v49  ;;  %v804_v53 = vor.u32 %v802_v39, %v800_v19  ;;  %v5563_v6 = vld [vmem:[%s5751_s27 + $0x90] sm:$0xff] }
 0x13c   : > { %v1858_v4 = vld [vmem:[#allocation2 + $0x48] sm:$0xff] }
 0x13d   : > { %v1894_v8 = vadd.f32 %v1858_v4, %v6107_v17  ;;  %1498 = vst.msk [vmem:[#allocation2 + $0x50] sm:$0xff] %vm508_vm5, %v1462_v61  ;;  %v1253_v17 = vsel %vm1222_vm2, %v1250_v16, %v1252_v62  ;;  %v6261_v16 = vld [vmem:[%s5751_s27 + $0x80] sm:$0xff]  ;;  %v1560_v4 = vld [vmem:[%s5751_s27 + $0x98] sm:$0x1] }
 0x13e   : > { %v2424_v11 = vld [vmem:[#allocation2 + $0x40] sm:$0xff] }
 0x13f   : > { %v1353_v18 = vpop.f32.mrf.mxu2  ;;  %1930 = vst.msk [vmem:[#allocation2 + $0x48] sm:$0xff] %vm508_vm5, %v1894_v8  ;;  %v2460_v13 = vadd.f32 %v2424_v11, %v6143_v57  ;;  %v2232_v57 = vsel %vm2089_vm4, %v6184_v26, %v6238_v9  ;;  %v1636_v8 = vunpack.c.l.b16 %v1560_v4 }
 0x140   : > { %v922_v3 = vpop.f32.mrf.mxu1  ;;  %v6269_v26 = vpop.f32.mrf.mxu3 }
 0x141   : > { %2496 = vst.msk [vmem:[#allocation2 + $0x40] sm:$0xff] %vm508_vm5, %v2460_v13  ;;  %v1030_v22 = vadd.f32 %v994_v52, %v922_v3  ;;  %v6251_v15 = vpop.f32.mrf.mxu0  ;;  %v2243_v3 = vshrl.u32 %v5563_v6, 16  ;;  %v2246_v52 = vshll.u32 %v5563_v6, 16 }
 0x142   : > { %v1427_v24 = vld [vmem:[#allocation2 + $0x58] sm:$0xff] }
 0x143   : > { %v1463_v54 = vadd.f32 %v1427_v24, %v1353_v18  ;;  %1066 = vst.msk [vmem:[#allocation2 + $0x60] sm:$0xff] %vm508_vm5, %v1030_v22  ;;  %4831 = vmatmul.msk.bf16.gmra.mxu1 %vm350_vm1, %v801_v21  ;;  %v1655_v18 = vpack.c.b16 %v1636_v8, %v1636_v8  ;;  %v997_v24 = vld [vmem:[#allocation2 + $0x78] sm:$0xff] }
 0x144   : > { %4922 = vmatmul.msk.bf16.gmra.mxu2 %vm350_vm1, %v1253_v17  ;;  %v1859_v12 = vld [vmem:[#allocation2 + $0x50] sm:$0xff]  ;;  %5104 = vmatmul.msk.bf16.gmra.mxu0 %vm350_vm1, %v2232_v57 }
 0x145   : > { %v1895_v29 = vadd.f32 %v1859_v12, %v6132_v46  ;;  %1499 = vst.msk [vmem:[#allocation2 + $0x58] sm:$0xff] %vm508_vm5, %v1463_v54  ;;  %v806_v46 = vshll.u32 %v6261_v16, 16  ;;  %v1691_v22 = vrot.slane %v1655_v18, 1  ;;  %v810_v54 = vshrl.u32 %v6261_v16, 16  ;;  %v6328_v12 = vld [vmem:[%s5751_s27 + $0x88] sm:$0xff] }
 0x146   : > { %v2425_v32 = vld [vmem:[#allocation2 + $0x48] sm:$0xff]  ;;  %5015 = vmatmul.msk.bf16.gmra.mxu3 %vm350_vm1, %v1690_v43  ;;  %v581_v16 = vld [vmem:[%s5751_s27 + $0x90] sm:$0x1] }
 0x147   : > { %v1356_v5 = vpop.f32.mrf.mxu2  ;;  %1931 = vst.msk [vmem:[#allocation2 + $0x50] sm:$0xff] %vm508_vm5, %v1895_v29  ;;  %v2461_v36 = vadd.f32 %v2425_v32, %v6177_v20  ;;  %v2236_v20 = vrot.slane %v2234_v40, 1  ;;  %v808_v58 = vrot.slane %v806_v46, 1  ;;  %v1692_v29 = vsel %vm1222_vm2, %v1689_v37, %v1691_v22 }
 0x148   : > { %v924_v38 = vpop.f32.mrf.mxu1  ;;  %v6294_v27 = vpop.f32.mrf.mxu3  ;;  %v2245_v32 = vrot.slane %v2243_v3, 1  ;;  %v1256_v37 = vrot.slane %v6328_v12, 1  ;;  %v5111_v12 = vld [vmem:[%s5751_s27 + $0x8] sm:$0xc] }
 0x149   : > { %2497 = vst.msk [vmem:[#allocation2 + $0x48] sm:$0xff] %vm508_vm5, %v2461_v36  ;;  %v1031_v14 = vadd.f32 %v995_v10, %v924_v38  ;;  %v6285_v47 = vpop.f32.mrf.mxu0  ;;  %v6292_v31 = vor.u32 %v2239_v7, %v2236_v20  ;;  %v809_v2 = vsel %vm677_vm3, %v804_v53, %v808_v58  ;;  %v812_v10 = vor.u32 %v810_v54, %v808_v58  ;;  %v998_v53 = vld [vmem:[#allocation2 + $0x80] sm:$0xff] }
 0x14a   : > { %v1428_v50 = vld [vmem:[#allocation2 + $0x60] sm:$0xff]  ;;  %v657_v7 = vunpack.c.l.b16 %v581_v16  ;;  %v1257_v58 = vsel %vm1222_vm2, %v1254_v42, %v1256_v37 }
 0x14b   : > { %v1464_v34 = vadd.f32 %v1428_v50, %v1356_v5  ;;  %1067 = vst.msk [vmem:[#allocation2 + $0x68] sm:$0xff] %vm508_vm5, %v1031_v14 }
 0x14c   : > { %v1860_v51 = vld [vmem:[#allocation2 + $0x58] sm:$0xff] }
 0x14d   : > { %v1896_v56 = vadd.f32 %v1860_v51, %v6161_v63  ;;  %1500 = vst.msk [vmem:[#allocation2 + $0x60] sm:$0xff] %vm508_vm5, %v1464_v34  ;;  %v1255_v63 = vsel %vm1222_vm2, %v1252_v62, %v1254_v42  ;;  %v6316_v62 = vld [vmem:[%s5751_s27 + $0x88] sm:$0xff]  ;;  %v1993_v34 = vld [vmem:[%s5751_s27 + $0x98] sm:$0x3] }
 0x14e   : > { %v2426_v55 = vld [vmem:[#allocation2 + $0x50] sm:$0xff] }
 0x14f   : > { %v1358_v0 = vpop.f32.mrf.mxu2  ;;  %1932 = vst.msk [vmem:[#allocation2 + $0x58] sm:$0xff] %vm508_vm5, %v1896_v56  ;;  %v2462_v60 = vadd.f32 %v2426_v55, %v6197_v33  ;;  %v2241_v33 = vsel %vm2089_vm4, %v6238_v9, %v6292_v31  ;;  %v2069_v56 = vunpack.c.l.b16 %v1993_v34  ;;  %v5293_v55 = vld [vmem:[%s5751_s27 + $0x10] sm:$0xc] }
 0x150   : > { %v927_v49 = vpop.f32.mrf.mxu1  ;;  %v6321_v13 = vpop.f32.mrf.mxu3 }
 0x151   : > { %2498 = vst.msk [vmem:[#allocation2 + $0x50] sm:$0xff] %vm508_vm5, %v2462_v60  ;;  %v1032_v44 = vadd.f32 %v996_v35, %v927_v49  ;;  %v6305_v61 = vpop.f32.mrf.mxu0  ;;  %v1126_v49 = vld [vmem:[%s5751_s27 + $0x90] sm:$0x1]  ;;  %v2088_v41 = vpack.c.b16 %v2069_v56, %v2069_v56 }
 0x152   : > { %v1429_v19 = vld [vmem:[#allocation2 + $0x68] sm:$0xff] }
 0x153   : > { %v1465_v11 = vadd.f32 %v1429_v19, %v1358_v0  ;;  %1068 = vst.msk [vmem:[#allocation2 + $0x70] sm:$0xff] %vm508_vm5, %v1032_v44  ;;  %4832 = vmatmul.msk.bf16.gmra.mxu1 %vm350_vm1, %v809_v2  ;;  %v5600_v0 = vld [vmem:[%s5751_s27 + $0x10] sm:$0xf0]  ;;  %v5601_v2 = vld [vmem:[%s5751_s27 + $0x18] sm:$0xff] }
 0x154   : > { %4923 = vmatmul.msk.bf16.gmra.mxu2 %vm350_vm1, %v1255_v63  ;;  %v1861_v59 = vld [vmem:[#allocation2 + $0x60] sm:$0xff]  ;;  %5105 = vmatmul.msk.bf16.gmra.mxu0 %vm350_vm1, %v2241_v33  ;;  %v5294_v63 = vor.u32 %v5600_v0, %v5293_v55  ;;  %v676_v33 = vpack.c.b16 %v657_v7, %v657_v7  ;;  %v3533_v19 = vshrl.u32 %v5601_v2, 16  ;;  %v3536_v18 = vshll.u32 %v5601_v2, 16  ;;  %v1000_v55 = vld [vmem:[#allocation2 + $0x90] sm:$0xff] }
 0x155   : > { %v1897_v9 = vadd.f32 %v1861_v59, %v6186_v28  ;;  %1501 = vst.msk [vmem:[#allocation2 + $0x68] sm:$0xff] %vm508_vm5, %v1465_v11  ;;  %v814_v28 = vshll.u32 %v6316_v62, 16  ;;  %v1202_v11 = vunpack.c.l.b16 %v1126_v49  ;;  %v2255_v59 = vshll.u32 %v2088_v41, 16  ;;  %v5602_v0 = vld [vmem:[%s5751_s27 + $0x20] sm:$0xff] }
 0x156   : > { %v2427_v21 = vld [vmem:[#allocation2 + $0x58] sm:$0xff]  ;;  %5016 = vmatmul.msk.bf16.gmra.mxu3 %vm350_vm1, %v1692_v29  ;;  %v3525_v42 = vshrl.u32 %v5294_v63, 16  ;;  %v3528_v6 = vshll.u32 %v5294_v63, 16  ;;  %v999_v29 = vld [vmem:[#allocation2 + $0x88] sm:$0xff]  ;;  %v3542_v2 = vshrl.u32 %v5602_v0, 16  ;;  %v3545_v63 = vshll.u32 %v5602_v0, 16 }
 0x157   : > { %v1361_v17 = vpop.f32.mrf.mxu2  ;;  %1933 = vst.msk [vmem:[#allocation2 + $0x60] sm:$0xff] %vm508_vm5, %v1897_v9  ;;  %v2463_v57 = vadd.f32 %v2427_v21, %v6231_v1  ;;  %v2248_v1 = vrot.slane %v2246_v52, 2  ;;  %v6339_v25 = vrot.slane %v814_v28, 1 }
 0x158   : > { %v929_v23 = vpop.f32.mrf.mxu1  ;;  %v6346_v43 = vpop.f32.mrf.mxu3  ;;  %v3527_v52 = vrot.slane %v3525_v42, 2  ;;  %v3530_v21 = vrot.slane %v3528_v6, 3  ;;  %v5202_v42 = vld [vmem:[%s5751_s27 + $0x10] sm:$0xc]  ;;  %v5582_v6 = vld [vmem:[%s5751_s27 + $0x10] sm:$0xf0] }
 0x159   : > { %2499 = vst.msk [vmem:[#allocation2 + $0x58] sm:$0xff] %vm508_vm5, %v2463_v57  ;;  %v1033_v40 = vadd.f32 %v997_v24, %v929_v23  ;;  %v6334_v30 = vpop.f32.mrf.mxu0  ;;  %v6344_v46 = vor.u32 %v2248_v1, %v2245_v32  ;;  %v3538_v23 = vrot.slane %v3536_v18, 3  ;;  %v1221_v32 = vpack.c.b16 %v1202_v11, %v1202_v11  ;;  %v5618_v18 = vld [vmem:[%s5751_s27 + $0x10] sm:$0xf0] }
 0x15a   : > { %v1430_v5 = vld [vmem:[#allocation2 + $0x70] sm:$0xff]  ;;  %v3531_v54 = vor.u32 %v3530_v21, %v3527_v52 }
 0x15b   : > { %v1466_v36 = vadd.f32 %v1430_v5, %v1361_v17  ;;  %1069 = vst.msk [vmem:[#allocation2 + $0x78] sm:$0xff] %vm508_vm5, %v1033_v40  ;;  %v2250_v35 = vsel %vm2089_vm4, %v6292_v31, %v6344_v46  ;;  %v2252_v31 = vshrl.u32 %v2088_v41, 16  ;;  %v3535_v17 = vrot.slane %v3533_v19, 2  ;;  %v6424_v21 = vld [vmem:[%s5751_s27 + $0x10] sm:$0xff] }
 0x15c   : > { %v1862_v38 = vld [vmem:[#allocation2 + $0x68] sm:$0xff]  ;;  %v822_v40 = vshll.u32 %v676_v33, 16  ;;  %v1258_v7 = vrot.slane %v1221_v32, 1  ;;  %v3547_v41 = vrot.slane %v3545_v63, 3 }
 0x15d   : > { %v1898_v39 = vadd.f32 %v1862_v38, %v6215_v45  ;;  %1502 = vst.msk [vmem:[#allocation2 + $0x70] sm:$0xff] %vm508_vm5, %v1466_v36  ;;  %v817_v45 = vsel %vm677_vm3, %v812_v10, %v6339_v25  ;;  %v6379_v1 = vor.u32 %v3538_v23, %v3535_v17  ;;  %v2254_v16 = vrot.slane %v2252_v31, 1  ;;  %v5564_v33 = vld [vmem:[%s5751_s27 + $0x8] sm:$0xf0] }
 0x15e   : > { %v2428_v14 = vld [vmem:[#allocation2 + $0x60] sm:$0xff]  ;;  %v2257_v38 = vrot.slane %v2255_v59, 2  ;;  %v5384_v59 = vld [vmem:[%s5751_s27 + $0x10] sm:$0x8]  ;;  %v5112_v17 = vor.u32 %v5564_v33, %v5111_v12 }
 0x15f   : > { %v1363_v20 = vpop.f32.mrf.mxu2  ;;  %1934 = vst.msk [vmem:[#allocation2 + $0x68] sm:$0xff] %vm508_vm5, %v1898_v39  ;;  %v2464_v50 = vadd.f32 %v2428_v14, %v6251_v15 }
 0x160   : > { %v932_v51 = vpop.f32.mrf.mxu1  ;;  %v6374_v3 = vpop.f32.mrf.mxu3  ;;  %v2258_v34 = vor.u32 %v2257_v38, %v2254_v16  ;;  %v2657_v32 = vrot.slane %v5112_v17, 2 }
 0x161   : > { %2500 = vst.msk [vmem:[#allocation2 + $0x60] sm:$0xff] %vm508_vm5, %v2464_v50  ;;  %v1034_v60 = vadd.f32 %v998_v53, %v932_v51  ;;  %v6362_v15 = vpop.f32.mrf.mxu0 }
 0x162   : > { %v1431_v44 = vld [vmem:[#allocation2 + $0x78] sm:$0xff] }
 0x163   : > { %v1467_v4 = vadd.f32 %v1431_v44, %v1363_v20  ;;  %1070 = vst.msk [vmem:[#allocation2 + $0x80] sm:$0xff] %vm508_vm5, %v1034_v60  ;;  %4833 = vmatmul.msk.bf16.gmra.mxu1 %vm350_vm1, %v817_v45  ;;  %v824_v20 = vrot.slane %v822_v40, 1 }
 0x164   : > { %4924 = vmatmul.msk.bf16.gmra.mxu2 %vm350_vm1, %v1257_v58  ;;  %v1863_v8 = vld [vmem:[#allocation2 + $0x70] sm:$0xff]  ;;  %5106 = vmatmul.msk.bf16.gmra.mxu0 %vm350_vm1, %v2250_v35  ;;  %v2259_v35 = vsel %vm2089_vm4, %v6344_v46, %v2258_v34  ;;  %v3544_v46 = vrot.slane %v3542_v2, 2 }
 0x165   : > { %v1899_v9 = vadd.f32 %v1863_v8, %v6240_v48  ;;  %1503 = vst.msk [vmem:[#allocation2 + $0x78] sm:$0xff] %vm508_vm5, %v1467_v4  ;;  %v818_v48 = vshrl.u32 %v6316_v62, 16 }
 0x166   : > { %v2429_v22 = vld [vmem:[#allocation2 + $0x68] sm:$0xff]  ;;  %v6417_v31 = vor.u32 %v3547_v41, %v3544_v46  ;;  %v6473_v41 = vld [vmem:[%s5751_s27 + $0x18] sm:$0xff] }
 0x167   : > { %v1366_v57 = vpop.f32.mrf.mxu2  ;;  %1935 = vst.msk [vmem:[#allocation2 + $0x70] sm:$0xff] %vm508_vm5, %v1899_v9  ;;  %v2465_v24 = vadd.f32 %v2429_v22, %v6285_v47  ;;  %v3540_v47 = vsel %vm3523_vm6, %v3531_v54, %v6379_v1  ;;  %v820_v14 = vor.u32 %v818_v48, %v6339_v25  ;;  %v6427_v22 = vld [vmem:[%s5751_s27 + $0x18] sm:$0xff]  ;;  %v1003_v46 = vld [vmem:[#allocation2 + $0xa8] sm:$0xff] }
 0x168   : > { %v934_v28 = vpop.f32.mrf.mxu1  ;;  %5363 = vmatmul.msk.bf16.vlgmr.msra.gmra.mxu3 %vm350_vm1, %v3540_v47  ;;  %v6391_v51 = vpop.f32.mrf.mxu3  ;;  %v3549_v23 = vsel %vm3523_vm6, %v6379_v1, %v6417_v31  ;;  %v3091_v1 = vrot.slane %v6427_v22, 2 }
 0x169   : > { %2501 = vst.msk [vmem:[#allocation2 + $0x68] sm:$0xff] %vm508_vm5, %v2465_v24  ;;  %v1035_v5 = vadd.f32 %v999_v29, %v934_v28  ;;  %v6382_v36 = vpop.f32.mrf.mxu0  ;;  %v825_v25 = vsel %vm677_vm3, %v820_v14, %v824_v20  ;;  %v6436_v28 = vld [vmem:[%s5751_s27 + $0x18] sm:$0xff] }
 0x16a   : > { %v1432_v10 = vld [vmem:[#allocation2 + $0x80] sm:$0xff]  ;;  %v4092_v47 = vrot.slane %v6436_v28, 3 }
 0x16b   : > { %v1468_v39 = vadd.f32 %v1432_v10, %v1366_v57  ;;  %1071 = vst.msk [vmem:[#allocation2 + $0x88] sm:$0xff] %vm508_vm5, %v1035_v5  ;;  %v5203_v57 = vor.u32 %v5582_v6, %v5202_v42  ;;  %v2658_v5 = vrot.slane %v6424_v21, 2 }
 0x16c   : > { %v1864_v62 = vld [vmem:[#allocation2 + $0x78] sm:$0xff] }
 0x16d   : > { %v1900_v50 = vadd.f32 %v1864_v62, %v6269_v26  ;;  %1504 = vst.msk [vmem:[#allocation2 + $0x80] sm:$0xff] %vm508_vm5, %v1468_v39  ;;  %v1259_v26 = vsel %vm1222_vm2, %v1256_v37, %v1258_v7  ;;  %v3090_v16 = vrot.slane %v5203_v57, 2 }
 0x16e   : > { %v2430_v53 = vld [vmem:[#allocation2 + $0x70] sm:$0xff] }
 0x16f   : > { %v1368_v45 = vpop.f32.mrf.mxu2  ;;  %1936 = vst.msk [vmem:[#allocation2 + $0x78] sm:$0xff] %vm508_vm5, %v1900_v50  ;;  %v2466_v58 = vadd.f32 %v2430_v53, %v6305_v61  ;;  %v1002_v50 = vld [vmem:[#allocation2 + $0xa0] sm:$0xff]  ;;  %v3092_v34 = vsel %vm2656_vm7, %v3090_v16, %v3091_v1  ;;  %v5603_v53 = vld [vmem:[%s5751_s27 + $0x28] sm:$0xff] }
 0x170   : > { %v937_v56 = vpop.f32.mrf.mxu1  ;;  %v6415_v19 = vpop.f32.mrf.mxu3 }
 0x171   : > { %2502 = vst.msk [vmem:[#allocation2 + $0x70] sm:$0xff] %vm508_vm5, %v2466_v58  ;;  %v1036_v60 = vadd.f32 %v1000_v55, %v937_v56  ;;  %v6401_v49 = vpop.f32.mrf.mxu0  ;;  %v3551_v55 = vshrl.u32 %v5603_v53, 16 }
 0x172   : > { %v1433_v61 = vld [vmem:[#allocation2 + $0x88] sm:$0xff] }
 0x173   : > { %v1469_v44 = vadd.f32 %v1433_v61, %v1368_v45  ;;  %1072 = vst.msk [vmem:[#allocation2 + $0x90] sm:$0xff] %vm508_vm5, %v1036_v60  ;;  %4834 = vmatmul.msk.bf16.gmra.mxu1 %vm350_vm1, %v825_v25  ;;  %v3554_v25 = vshll.u32 %v5603_v53, 16  ;;  %v3553_v60 = vrot.slane %v3551_v55, 2  ;;  %v6530_v53 = vld [vmem:[%s5751_s27 + $0x28] sm:$0xff] }
 0x174   : > { %4925 = vmatmul.msk.bf16.gmra.mxu2 %vm350_vm1, %v1259_v26  ;;  %v1865_v37 = vld [vmem:[#allocation2 + $0x80] sm:$0xff]  ;;  %5107 = vmatmul.msk.bf16.gmra.mxu0 %vm350_vm1, %v2259_v35 }
 0x175   : > { %v1901_v4 = vadd.f32 %v1865_v37, %v6294_v27  ;;  %1505 = vst.msk [vmem:[#allocation2 + $0x88] sm:$0xff] %vm508_vm5, %v1469_v44  ;;  %v1001_v27 = vld [vmem:[#allocation2 + $0x98] sm:$0xff]  ;;  %v3556_v35 = vrot.slane %v3554_v25, 3 }
 0x176   : > { %v2431_v8 = vld [vmem:[#allocation2 + $0x78] sm:$0xff] }
 0x177   : > { %v1371_v11 = vpop.f32.mrf.mxu2  ;;  %1937 = vst.msk [vmem:[#allocation2 + $0x80] sm:$0xff] %vm508_vm5, %v1901_v4  ;;  %v2467_v9 = vadd.f32 %v2431_v8, %v6334_v30  ;;  %v5385_v30 = vor.u32 %v5618_v18, %v5384_v59  ;;  %v3557_v12 = vor.u32 %v3556_v35, %v3553_v60  ;;  %v6476_v4 = vld [vmem:[%s5751_s27 + $0x20] sm:$0xff]  ;;  %v2660_v18 = vrot.slane %v6473_v41, 2 }
 0x178   : > { %v939_v52 = vpop.f32.mrf.mxu1  ;;  %5364 = vmatmul.msk.bf16.gmra.mxu3 %vm350_vm1, %v3549_v23  ;;  %v6484_v8 = vld [vmem:[%s5751_s27 + $0x20] sm:$0xff] }
 0x179   : > { %2503 = vst.msk [vmem:[#allocation2 + $0x78] sm:$0xff] %vm508_vm5, %v2467_v9  ;;  %v1037_v24 = vadd.f32 %v1001_v27, %v939_v52  ;;  %v6433_v54 = vpop.f32.mrf.mxu0  ;;  %v4091_v10 = vrot.slane %v5385_v30, 3  ;;  %v6445_v39 = vpop.f32.mrf.mxu3  ;;  %v3093_v9 = vrot.slane %v6476_v4, 2  ;;  %v4094_v52 = vrot.slane %v6484_v8, 3  ;;  %v1004_v30 = vld [vmem:[#allocation2 + $0xb0] sm:$0xff] }
 0x17a   : > { %v1434_v29 = vld [vmem:[#allocation2 + $0x90] sm:$0xff] }
 0x17b   : > { %v1470_v48 = vadd.f32 %v1434_v29, %v1371_v11  ;;  %1073 = vst.msk [vmem:[#allocation2 + $0x98] sm:$0xff] %vm508_vm5, %v1037_v24  ;;  %v3094_v29 = vsel %vm2656_vm7, %v3091_v1, %v3093_v9 }
 0x17c   : > { %v1866_v40 = vld [vmem:[#allocation2 + $0x88] sm:$0xff] }
 0x17d   : > { %v1902_v38 = vadd.f32 %v1866_v40, %v6321_v13  ;;  %1506 = vst.msk [vmem:[#allocation2 + $0x90] sm:$0xff] %vm508_vm5, %v1470_v48  ;;  %v2659_v13 = vsel %vm2656_vm7, %v2657_v32, %v2658_v5  ;;  %v5604_v48 = vld [vmem:[%s5751_s27 + $0x30] sm:$0xff] }
 0x17e   : > { %v2432_v62 = vld [vmem:[#allocation2 + $0x80] sm:$0xff]  ;;  %v3563_v16 = vshll.u32 %v5604_v48, 16 }
 0x17f   : > { %v1373_v14 = vpop.f32.mrf.mxu2  ;;  %1938 = vst.msk [vmem:[#allocation2 + $0x88] sm:$0xff] %vm508_vm5, %v1902_v38  ;;  %v2468_v20 = vadd.f32 %v2432_v62, %v6362_v15  ;;  %v4093_v15 = vsel %vm4090_vm8, %v4091_v10, %v4092_v47 }
 0x180   : > { %v942_v7 = vpop.f32.mrf.mxu1  ;;  %v3565_v10 = vrot.slane %v3563_v16, 3 }
 0x181   : > { %2504 = vst.msk [vmem:[#allocation2 + $0x80] sm:$0xff] %vm508_vm5, %v2468_v20  ;;  %v1038_v45 = vadd.f32 %v1002_v50, %v942_v7  ;;  %v6457_v58 = vpop.f32.mrf.mxu0  ;;  %v6468_v2 = vpop.f32.mrf.mxu3 }
 0x182   : > { %v1435_v56 = vld [vmem:[#allocation2 + $0x98] sm:$0xff] }
 0x183   : > { %v1471_v26 = vadd.f32 %v1435_v56, %v1373_v14  ;;  %1074 = vst.msk [vmem:[#allocation2 + $0xa0] sm:$0xff] %vm508_vm5, %v1038_v45  ;;  %5181 = vmatmul.msk.bf16.vlgmr.msra.gmra.mxu1 %vm350_vm1, %v2659_v13  ;;  %v1005_v13 = vld [vmem:[#allocation2 + $0xb8] sm:$0xff]  ;;  %v6537_v56 = vld [vmem:[%s5751_s27 + $0x28] sm:$0xff] }
 0x184   : > { %5272 = vmatmul.msk.bf16.vlgmr.msra.gmra.mxu2 %vm350_vm1, %v3092_v34  ;;  %v1867_v0 = vld [vmem:[#allocation2 + $0x90] sm:$0xff]  ;;  %5454 = vmatmul.msk.bf16.vlgmr.msra.gmra.mxu0 %vm350_vm1, %v4093_v15  ;;  %v6527_v34 = vld [vmem:[%s5751_s27 + $0x20] sm:$0xff]  ;;  %v4096_v35 = vrot.slane %v6537_v56, 3 }
 0x185   : > { %v1903_v61 = vadd.f32 %v1867_v0, %v6346_v43  ;;  %1507 = vst.msk [vmem:[#allocation2 + $0x98] sm:$0xff] %vm508_vm5, %v1471_v26  ;;  %v3558_v43 = vsel %vm3523_vm6, %v6417_v31, %v3557_v12  ;;  %v2662_v26 = vrot.slane %v6527_v34, 2  ;;  %v3095_v0 = vrot.slane %v6530_v53, 2 }
 0x186   : > { %v2433_v63 = vld [vmem:[#allocation2 + $0x88] sm:$0xff] }
 0x187   : > { %v1376_v44 = vpop.f32.mrf.mxu2  ;;  %1939 = vst.msk [vmem:[#allocation2 + $0x90] sm:$0xff] %vm508_vm5, %v1903_v61  ;;  %v2469_v37 = vadd.f32 %v2433_v63, %v6382_v36 }
 0x188   : > { %v944_v33 = vpop.f32.mrf.mxu1  ;;  %5365 = vmatmul.msk.bf16.gmra.mxu3 %vm350_vm1, %v3558_v43  ;;  %v5605_v43 = vld [vmem:[%s5751_s27 + $0x38] sm:$0xff] }
 0x189   : > { %2505 = vst.msk [vmem:[#allocation2 + $0x88] sm:$0xff] %vm508_vm5, %v2469_v37  ;;  %v1039_v42 = vadd.f32 %v1003_v46, %v944_v33  ;;  %v6481_v6 = vpop.f32.mrf.mxu0  ;;  %v6493_v27 = vpop.f32.mrf.mxu3  ;;  %v1006_v33 = vld [vmem:[#allocation2 + $0xc0] sm:$0xff]  ;;  %v3096_v46 = vsel %vm2656_vm7, %v3093_v9, %v3095_v0 }
 0x18a   : > { %v1436_v11 = vld [vmem:[#allocation2 + $0xa0] sm:$0xff] }
 0x18b   : > { %v1472_v59 = vadd.f32 %v1436_v11, %v1376_v44  ;;  %1075 = vst.msk [vmem:[#allocation2 + $0xa8] sm:$0xff] %vm508_vm5, %v1039_v42 }
 0x18c   : > { %v1868_v36 = vld [vmem:[#allocation2 + $0x98] sm:$0xff] }
 0x18d   : > { %v1904_v31 = vadd.f32 %v1868_v36, %v6374_v3  ;;  %1508 = vst.msk [vmem:[#allocation2 + $0xa0] sm:$0xff] %vm508_vm5, %v1472_v59  ;;  %v2661_v3 = vsel %vm2656_vm7, %v2658_v5, %v2660_v18  ;;  %v3560_v5 = vshrl.u32 %v5604_v48, 16  ;;  %v3569_v59 = vshrl.u32 %v5605_v43, 16  ;;  %v6583_v48 = vld [vmem:[%s5751_s27 + $0x30] sm:$0xff] }
 0x18e   : > { %v2434_v17 = vld [vmem:[#allocation2 + $0x90] sm:$0xff]  ;;  %v3572_v36 = vshll.u32 %v5605_v43, 16  ;;  %v6636_v43 = vld [vmem:[%s5751_s27 + $0x38] sm:$0xff] }
 0x18f   : > { %v1378_v57 = vpop.f32.mrf.mxu2  ;;  %1940 = vst.msk [vmem:[#allocation2 + $0x98] sm:$0xff] %vm508_vm5, %v1904_v31  ;;  %v2470_v23 = vadd.f32 %v2434_v17, %v6401_v49  ;;  %v4095_v49 = vsel %vm4090_vm8, %v4092_v47, %v4094_v52  ;;  %v3562_v1 = vrot.slane %v3560_v5, 2  ;;  %v3571_v9 = vrot.slane %v3569_v59, 2 }
 0x190   : > { %v947_v24 = vpop.f32.mrf.mxu1  ;;  %v3574_v31 = vrot.slane %v3572_v36, 3 }
 0x191   : > { %2506 = vst.msk [vmem:[#allocation2 + $0x90] sm:$0xff] %vm508_vm5, %v2470_v23  ;;  %v1040_v40 = vadd.f32 %v1004_v30, %v947_v24  ;;  %v6509_v32 = vpop.f32.mrf.mxu0  ;;  %v6522_v47 = vpop.f32.mrf.mxu3  ;;  %v3566_v20 = vor.u32 %v3565_v10, %v3562_v1 }
 0x192   : > { %v1437_v21 = vld [vmem:[#allocation2 + $0xa8] sm:$0xff]  ;;  %v3575_v23 = vor.u32 %v3574_v31, %v3571_v9 }
 0x193   : > { %v1473_v38 = vadd.f32 %v1437_v21, %v1378_v57  ;;  %1076 = vst.msk [vmem:[#allocation2 + $0xb0] sm:$0xff] %vm508_vm5, %v1040_v40  ;;  %5182 = vmatmul.msk.bf16.gmra.mxu1 %vm350_vm1, %v2661_v3  ;;  %v1007_v3 = vld [vmem:[#allocation2 + $0xc8] sm:$0xff]  ;;  %v6590_v21 = vld [vmem:[%s5751_s27 + $0x30] sm:$0xff] }
 0x194   : > { %5273 = vmatmul.msk.bf16.gmra.mxu2 %vm350_vm1, %v3094_v29  ;;  %v1869_v22 = vld [vmem:[#allocation2 + $0xa0] sm:$0xff]  ;;  %5455 = vmatmul.msk.bf16.gmra.mxu0 %vm350_vm1, %v4095_v49  ;;  %v6580_v29 = vld [vmem:[%s5751_s27 + $0x28] sm:$0xff]  ;;  %v4098_v10 = vrot.slane %v6590_v21, 3 }
 0x195   : > { %v1905_v28 = vadd.f32 %v1869_v22, %v6391_v51  ;;  %1509 = vst.msk [vmem:[#allocation2 + $0xa8] sm:$0xff] %vm508_vm5, %v1473_v38  ;;  %v3567_v51 = vsel %vm3523_vm6, %v3557_v12, %v3566_v20  ;;  %v2664_v38 = vrot.slane %v6580_v29, 2  ;;  %v3097_v22 = vrot.slane %v6583_v48, 2 }
 0x196   : > { %v2435_v62 = vld [vmem:[#allocation2 + $0x98] sm:$0xff] }
 0x197   : > { %v1381_v14 = vpop.f32.mrf.mxu2  ;;  %1941 = vst.msk [vmem:[#allocation2 + $0xa0] sm:$0xff] %vm508_vm5, %v1905_v28  ;;  %v2471_v7 = vadd.f32 %v2435_v62, %v6433_v54 }
 0x198   : > { %v949_v50 = vpop.f32.mrf.mxu1  ;;  %5366 = vmatmul.msk.bf16.gmra.mxu3 %vm350_vm1, %v3567_v51  ;;  %v5606_v51 = vld [vmem:[%s5751_s27 + $0x40] sm:$0xff] }
 0x199   : > { %2507 = vst.msk [vmem:[#allocation2 + $0x98] sm:$0xff] %vm508_vm5, %v2471_v7  ;;  %v1041_v45 = vadd.f32 %v1005_v13, %v949_v50  ;;  %v6534_v15 = vpop.f32.mrf.mxu0  ;;  %v6546_v61 = vpop.f32.mrf.mxu3  ;;  %v1008_v50 = vld [vmem:[#allocation2 + $0xd0] sm:$0xff]  ;;  %v3098_v13 = vsel %vm2656_vm7, %v3095_v0, %v3097_v22 }
 0x19a   : > { %v1438_v55 = vld [vmem:[#allocation2 + $0xb0] sm:$0xff] }
 0x19b   : > { %v1474_v25 = vadd.f32 %v1438_v55, %v1381_v14  ;;  %1077 = vst.msk [vmem:[#allocation2 + $0xb8] sm:$0xff] %vm508_vm5, %v1041_v45 }
 0x19c   : > { %v1870_v54 = vld [vmem:[#allocation2 + $0xa8] sm:$0xff] }
 0x19d   : > { %v1906_v60 = vadd.f32 %v1870_v54, %v6415_v19  ;;  %1510 = vst.msk [vmem:[#allocation2 + $0xb0] sm:$0xff] %vm508_vm5, %v1474_v25  ;;  %v2663_v19 = vsel %vm2656_vm7, %v2660_v18, %v2662_v26  ;;  %v3578_v25 = vshrl.u32 %v5606_v51, 16  ;;  %v3581_v54 = vshll.u32 %v5606_v51, 16  ;;  %v6689_v51 = vld [vmem:[%s5751_s27 + $0x40] sm:$0xff] }
 0x19e   : > { %v2436_v63 = vld [vmem:[#allocation2 + $0xa0] sm:$0xff] }
 0x19f   : > { %v1383_v44 = vpop.f32.mrf.mxu2  ;;  %1942 = vst.msk [vmem:[#allocation2 + $0xa8] sm:$0xff] %vm508_vm5, %v1906_v60  ;;  %v2472_v12 = vadd.f32 %v2436_v63, %v6457_v58  ;;  %v4097_v58 = vsel %vm4090_vm8, %v4094_v52, %v4096_v35  ;;  %v3580_v0 = vrot.slane %v3578_v25, 2  ;;  %v3583_v60 = vrot.slane %v3581_v54, 3 }
 0x1a0   : > { %v952_v37 = vpop.f32.mrf.mxu1 }
 0x1a1   : > { %2508 = vst.msk [vmem:[#allocation2 + $0xa0] sm:$0xff] %vm508_vm5, %v2472_v12  ;;  %v1042_v42 = vadd.f32 %v1006_v33, %v952_v37  ;;  %v6562_v11 = vpop.f32.mrf.mxu0  ;;  %v6575_v52 = vpop.f32.mrf.mxu3  ;;  %v3584_v12 = vor.u32 %v3583_v60, %v3580_v0 }
 0x1a2   : > { %v1439_v41 = vld [vmem:[#allocation2 + $0xb8] sm:$0xff] }
 0x1a3   : > { %v1475_v18 = vadd.f32 %v1439_v41, %v1383_v44  ;;  %1078 = vst.msk [vmem:[#allocation2 + $0xc0] sm:$0xff] %vm508_vm5, %v1042_v42  ;;  %5183 = vmatmul.msk.bf16.gmra.mxu1 %vm350_vm1, %v2663_v19  ;;  %v1009_v19 = vld [vmem:[#allocation2 + $0xd8] sm:$0xff] }
 0x1a4   : > { %5274 = vmatmul.msk.bf16.gmra.mxu2 %vm350_vm1, %v3096_v46  ;;  %v1871_v4 = vld [vmem:[#allocation2 + $0xb0] sm:$0xff]  ;;  %5456 = vmatmul.msk.bf16.gmra.mxu0 %vm350_vm1, %v4097_v58  ;;  %v6643_v41 = vld [vmem:[%s5751_s27 + $0x38] sm:$0xff] }
 0x1a5   : > { %v1907_v8 = vadd.f32 %v1871_v4, %v6445_v39  ;;  %1511 = vst.msk [vmem:[#allocation2 + $0xb8] sm:$0xff] %vm508_vm5, %v1475_v18  ;;  %v3576_v39 = vsel %vm3523_vm6, %v3566_v20, %v3575_v23  ;;  %v6633_v46 = vld [vmem:[%s5751_s27 + $0x30] sm:$0xff]  ;;  %v3099_v4 = vrot.slane %v6636_v43, 2  ;;  %v4100_v31 = vrot.slane %v6643_v41, 3 }
 0x1a6   : > { %v2437_v17 = vld [vmem:[#allocation2 + $0xa8] sm:$0xff]  ;;  %v2666_v18 = vrot.slane %v6633_v46, 2 }
 0x1a7   : > { %v1386_v57 = vpop.f32.mrf.mxu2  ;;  %1943 = vst.msk [vmem:[#allocation2 + $0xb0] sm:$0xff] %vm508_vm5, %v1907_v8  ;;  %v2473_v24 = vadd.f32 %v2437_v17, %v6481_v6 }
 0x1a8   : > { %v954_v30 = vpop.f32.mrf.mxu1  ;;  %5367 = vmatmul.msk.bf16.gmra.mxu3 %vm350_vm1, %v3576_v39  ;;  %v5607_v39 = vld [vmem:[%s5751_s27 + $0x48] sm:$0xff] }
 0x1a9   : > { %2509 = vst.msk [vmem:[#allocation2 + $0xa8] sm:$0xff] %vm508_vm5, %v2473_v24  ;;  %v1043_v40 = vadd.f32 %v1007_v3, %v954_v30  ;;  %v6587_v49 = vpop.f32.mrf.mxu0  ;;  %v6599_v28 = vpop.f32.mrf.mxu3  ;;  %v1010_v30 = vld [vmem:[#allocation2 + $0xe0] sm:$0xff]  ;;  %v3100_v3 = vsel %vm2656_vm7, %v3097_v22, %v3099_v4 }
 0x1aa   : > { %v1440_v5 = vld [vmem:[#allocation2 + $0xc0] sm:$0xff] }
 0x1ab   : > { %v1476_v16 = vadd.f32 %v1440_v5, %v1386_v57  ;;  %1079 = vst.msk [vmem:[#allocation2 + $0xc8] sm:$0xff] %vm508_vm5, %v1043_v40 }
 0x1ac   : > { %v1872_v6 = vld [vmem:[#allocation2 + $0xb8] sm:$0xff] }
 0x1ad   : > { %v1908_v1 = vadd.f32 %v1872_v6, %v6468_v2  ;;  %1512 = vst.msk [vmem:[#allocation2 + $0xc0] sm:$0xff] %vm508_vm5, %v1476_v16  ;;  %v2665_v2 = vsel %vm2656_vm7, %v2662_v26, %v2664_v38  ;;  %v3587_v16 = vshrl.u32 %v5607_v39, 16  ;;  %v3590_v6 = vshll.u32 %v5607_v39, 16  ;;  %v6742_v39 = vld [vmem:[%s5751_s27 + $0x48] sm:$0xff] }
 0x1ae   : > { %v2438_v62 = vld [vmem:[#allocation2 + $0xb0] sm:$0xff] }
 0x1af   : > { %v1388_v14 = vpop.f32.mrf.mxu2  ;;  %1944 = vst.msk [vmem:[#allocation2 + $0xb8] sm:$0xff] %vm508_vm5, %v1908_v1  ;;  %v2474_v20 = vadd.f32 %v2438_v62, %v6509_v32  ;;  %v4099_v32 = vsel %vm4090_vm8, %v4096_v35, %v4098_v10  ;;  %v3589_v22 = vrot.slane %v3587_v16, 2  ;;  %v3592_v1 = vrot.slane %v3590_v6, 3 }
 0x1b0   : > { %v957_v7 = vpop.f32.mrf.mxu1 }
 0x1b1   : > { %2510 = vst.msk [vmem:[#allocation2 + $0xb0] sm:$0xff] %vm508_vm5, %v2474_v20  ;;  %v1044_v45 = vadd.f32 %v1008_v50, %v957_v7  ;;  %v6615_v55 = vpop.f32.mrf.mxu0  ;;  %v6628_v35 = vpop.f32.mrf.mxu3  ;;  %v3593_v20 = vor.u32 %v3592_v1, %v3589_v22 }
 0x1b2   : > { %v1441_v34 = vld [vmem:[#allocation2 + $0xc8] sm:$0xff] }
 0x1b3   : > { %v1477_v26 = vadd.f32 %v1441_v34, %v1388_v14  ;;  %1080 = vst.msk [vmem:[#allocation2 + $0xd0] sm:$0xff] %vm508_vm5, %v1044_v45  ;;  %5184 = vmatmul.msk.bf16.gmra.mxu1 %vm350_vm1, %v2665_v2  ;;  %v1011_v2 = vld [vmem:[#allocation2 + $0xe8] sm:$0xff]  ;;  %v6696_v34 = vld [vmem:[%s5751_s27 + $0x40] sm:$0xff] }
 0x1b4   : > { %5275 = vmatmul.msk.bf16.gmra.mxu2 %vm350_vm1, %v3098_v13  ;;  %v1873_v53 = vld [vmem:[#allocation2 + $0xc0] sm:$0xff]  ;;  %5457 = vmatmul.msk.bf16.gmra.mxu0 %vm350_vm1, %v4099_v32  ;;  %v6686_v13 = vld [vmem:[%s5751_s27 + $0x38] sm:$0xff]  ;;  %v4102_v60 = vrot.slane %v6696_v34, 3 }
 0x1b5   : > { %v1909_v56 = vadd.f32 %v1873_v53, %v6493_v27  ;;  %1513 = vst.msk [vmem:[#allocation2 + $0xc8] sm:$0xff] %vm508_vm5, %v1477_v26  ;;  %v3585_v27 = vsel %vm3523_vm6, %v3575_v23, %v3584_v12  ;;  %v2668_v26 = vrot.slane %v6686_v13, 2  ;;  %v3101_v53 = vrot.slane %v6689_v51, 2 }
 0x1b6   : > { %v2439_v63 = vld [vmem:[#allocation2 + $0xb8] sm:$0xff] }
 0x1b7   : > { %v1391_v44 = vpop.f32.mrf.mxu2  ;;  %1945 = vst.msk [vmem:[#allocation2 + $0xc0] sm:$0xff] %vm508_vm5, %v1909_v56  ;;  %v2475_v37 = vadd.f32 %v2439_v63, %v6534_v15 }
 0x1b8   : > { %v959_v33 = vpop.f32.mrf.mxu1  ;;  %5368 = vmatmul.msk.bf16.gmra.mxu3 %vm350_vm1, %v3585_v27  ;;  %v5608_v27 = vld [vmem:[%s5751_s27 + $0x50] sm:$0xff] }
 0x1b9   : > { %2511 = vst.msk [vmem:[#allocation2 + $0xb8] sm:$0xff] %vm508_vm5, %v2475_v37  ;;  %v1045_v42 = vadd.f32 %v1009_v19, %v959_v33  ;;  %v6640_v58 = vpop.f32.mrf.mxu0  ;;  %v6652_v8 = vpop.f32.mrf.mxu3  ;;  %v1012_v33 = vld [vmem:[#allocation2 + $0xf0] sm:$0xff]  ;;  %v3102_v19 = vsel %vm2656_vm7, %v3099_v4, %v3101_v53 }
 0x1ba   : > { %v1442_v59 = vld [vmem:[#allocation2 + $0xd0] sm:$0xff] }
 0x1bb   : > { %v1478_v36 = vadd.f32 %v1442_v59, %v1391_v44  ;;  %1081 = vst.msk [vmem:[#allocation2 + $0xd8] sm:$0xff] %vm508_vm5, %v1045_v42 }
 0x1bc   : > { %v1874_v15 = vld [vmem:[#allocation2 + $0xc8] sm:$0xff] }
 0x1bd   : > { %v1910_v9 = vadd.f32 %v1874_v15, %v6522_v47  ;;  %1514 = vst.msk [vmem:[#allocation2 + $0xd0] sm:$0xff] %vm508_vm5, %v1478_v36  ;;  %v2667_v47 = vsel %vm2656_vm7, %v2664_v38, %v2666_v18  ;;  %v3596_v36 = vshrl.u32 %v5608_v27, 16  ;;  %v3599_v15 = vshll.u32 %v5608_v27, 16  ;;  %v6795_v27 = vld [vmem:[%s5751_s27 + $0x50] sm:$0xff] }
 0x1be   : > { %v2440_v17 = vld [vmem:[#allocation2 + $0xc0] sm:$0xff] }
 0x1bf   : > { %v1393_v57 = vpop.f32.mrf.mxu2  ;;  %1946 = vst.msk [vmem:[#allocation2 + $0xc8] sm:$0xff] %vm508_vm5, %v1910_v9  ;;  %v2476_v23 = vadd.f32 %v2440_v17, %v6562_v11  ;;  %v4101_v11 = vsel %vm4090_vm8, %v4098_v10, %v4100_v31  ;;  %v3598_v4 = vrot.slane %v3596_v36, 2  ;;  %v3601_v9 = vrot.slane %v3599_v15, 3 }
 0x1c0   : > { %v962_v24 = vpop.f32.mrf.mxu1 }
 0x1c1   : > { %2512 = vst.msk [vmem:[#allocation2 + $0xc0] sm:$0xff] %vm508_vm5, %v2476_v23  ;;  %v1046_v40 = vadd.f32 %v1010_v30, %v962_v24  ;;  %v6668_v5 = vpop.f32.mrf.mxu0  ;;  %v6681_v10 = vpop.f32.mrf.mxu3  ;;  %v3602_v23 = vor.u32 %v3601_v9, %v3598_v4 }
 0x1c2   : > { %v1443_v29 = vld [vmem:[#allocation2 + $0xd8] sm:$0xff] }
 0x1c3   : > { %v1479_v38 = vadd.f32 %v1443_v29, %v1393_v57  ;;  %1082 = vst.msk [vmem:[#allocation2 + $0xe0] sm:$0xff] %vm508_vm5, %v1046_v40  ;;  %5185 = vmatmul.msk.bf16.gmra.mxu1 %vm350_vm1, %v2667_v47  ;;  %v1013_v47 = vld [vmem:[#allocation2 + $0xf8] sm:$0xff]  ;;  %v6749_v29 = vld [vmem:[%s5751_s27 + $0x48] sm:$0xff] }
 0x1c4   : > { %5276 = vmatmul.msk.bf16.gmra.mxu2 %vm350_vm1, %v3100_v3  ;;  %v1875_v48 = vld [vmem:[#allocation2 + $0xd0] sm:$0xff]  ;;  %5458 = vmatmul.msk.bf16.gmra.mxu0 %vm350_vm1, %v4101_v11  ;;  %v6739_v3 = vld [vmem:[%s5751_s27 + $0x40] sm:$0xff]  ;;  %v4104_v1 = vrot.slane %v6749_v29, 3 }
 0x1c5   : > { %v1911_v21 = vadd.f32 %v1875_v48, %v6546_v61  ;;  %1515 = vst.msk [vmem:[#allocation2 + $0xd8] sm:$0xff] %vm508_vm5, %v1479_v38  ;;  %v3594_v61 = vsel %vm3523_vm6, %v3584_v12, %v3593_v20  ;;  %v2670_v38 = vrot.slane %v6739_v3, 2  ;;  %v3103_v48 = vrot.slane %v6742_v39, 2 }
 0x1c6   : > { %v2441_v62 = vld [vmem:[#allocation2 + $0xc8] sm:$0xff] }
 0x1c7   : > { %v1396_v14 = vpop.f32.mrf.mxu2  ;;  %1947 = vst.msk [vmem:[#allocation2 + $0xd0] sm:$0xff] %vm508_vm5, %v1911_v21  ;;  %v2477_v7 = vadd.f32 %v2441_v62, %v6587_v49 }
 0x1c8   : > { %v964_v50 = vpop.f32.mrf.mxu1  ;;  %5369 = vmatmul.msk.bf16.gmra.mxu3 %vm350_vm1, %v3594_v61  ;;  %v5609_v61 = vld [vmem:[%s5751_s27 + $0x58] sm:$0xff] }
 0x1c9   : > { %2513 = vst.msk [vmem:[#allocation2 + $0xc8] sm:$0xff] %vm508_vm5, %v2477_v7  ;;  %v1047_v45 = vadd.f32 %v1011_v2, %v964_v50  ;;  %v6693_v32 = vpop.f32.mrf.mxu0  ;;  %v6705_v56 = vpop.f32.mrf.mxu3  ;;  %v1014_v50 = vld [vmem:[#allocation2 + $0x100] sm:$0xff]  ;;  %v3104_v2 = vsel %vm2656_vm7, %v3101_v53, %v3103_v48 }
 0x1ca   : > { %v1444_v25 = vld [vmem:[#allocation2 + $0xe0] sm:$0xff] }
 0x1cb   : > { %v1480_v54 = vadd.f32 %v1444_v25, %v1396_v14  ;;  %1083 = vst.msk [vmem:[#allocation2 + $0xe8] sm:$0xff] %vm508_vm5, %v1047_v45 }
 0x1cc   : > { %v1876_v49 = vld [vmem:[#allocation2 + $0xd8] sm:$0xff] }
 0x1cd   : > { %v1912_v0 = vadd.f32 %v1876_v49, %v6575_v52  ;;  %1516 = vst.msk [vmem:[#allocation2 + $0xe0] sm:$0xff] %vm508_vm5, %v1480_v54  ;;  %v2669_v52 = vsel %vm2656_vm7, %v2666_v18, %v2668_v26  ;;  %v3605_v54 = vshrl.u32 %v5609_v61, 16  ;;  %v3608_v49 = vshll.u32 %v5609_v61, 16  ;;  %v6850_v61 = vld [vmem:[%s5751_s27 + $0x58] sm:$0xff] }
 0x1ce   : > { %v2442_v63 = vld [vmem:[#allocation2 + $0xd0] sm:$0xff] }
 0x1cf   : > { %v1398_v44 = vpop.f32.mrf.mxu2  ;;  %1948 = vst.msk [vmem:[#allocation2 + $0xd8] sm:$0xff] %vm508_vm5, %v1912_v0  ;;  %v2478_v12 = vadd.f32 %v2442_v63, %v6615_v55  ;;  %v4103_v55 = vsel %vm4090_vm8, %v4100_v31, %v4102_v60  ;;  %v3607_v53 = vrot.slane %v3605_v54, 2  ;;  %v3610_v0 = vrot.slane %v3608_v49, 3 }
 0x1d0   : > { %v967_v37 = vpop.f32.mrf.mxu1 }
 0x1d1   : > { %2514 = vst.msk [vmem:[#allocation2 + $0xd0] sm:$0xff] %vm508_vm5, %v2478_v12  ;;  %v1048_v42 = vadd.f32 %v1012_v33, %v967_v37  ;;  %v6721_v59 = vpop.f32.mrf.mxu0  ;;  %v6734_v31 = vpop.f32.mrf.mxu3  ;;  %v3611_v12 = vor.u32 %v3610_v0, %v3607_v53 }
 0x1d2   : > { %v1445_v46 = vld [vmem:[#allocation2 + $0xe8] sm:$0xff] }
 0x1d3   : > { %v1481_v18 = vadd.f32 %v1445_v46, %v1398_v44  ;;  %1084 = vst.msk [vmem:[#allocation2 + $0xf0] sm:$0xff] %vm508_vm5, %v1048_v42  ;;  %5186 = vmatmul.msk.bf16.gmra.mxu1 %vm350_vm1, %v2669_v52  ;;  %v1015_v52 = vld [vmem:[#allocation2 + $0x108] sm:$0xff]  ;;  %v6802_v46 = vld [vmem:[%s5751_s27 + $0x50] sm:$0xff] }
 0x1d4   : > { %5277 = vmatmul.msk.bf16.gmra.mxu2 %vm350_vm1, %v3102_v19  ;;  %v1877_v43 = vld [vmem:[#allocation2 + $0xe0] sm:$0xff]  ;;  %5459 = vmatmul.msk.bf16.gmra.mxu0 %vm350_vm1, %v4103_v55  ;;  %v6792_v19 = vld [vmem:[%s5751_s27 + $0x48] sm:$0xff]  ;;  %v4106_v9 = vrot.slane %v6802_v46, 3 }
 0x1d5   : > { %v1913_v41 = vadd.f32 %v1877_v43, %v6599_v28  ;;  %1517 = vst.msk [vmem:[#allocation2 + $0xe8] sm:$0xff] %vm508_vm5, %v1481_v18  ;;  %v3603_v28 = vsel %vm3523_vm6, %v3593_v20, %v3602_v23  ;;  %v2672_v18 = vrot.slane %v6792_v19, 2  ;;  %v3105_v43 = vrot.slane %v6795_v27, 2  ;;  %v5611_v19 = vld [vmem:[%s5751_s27 + $0x68] sm:$0xff] }
 0x1d6   : > { %v2443_v17 = vld [vmem:[#allocation2 + $0xd8] sm:$0xff]  ;;  %v3623_v27 = vshrl.u32 %v5611_v19, 16 }
 0x1d7   : > { %v1401_v57 = vpop.f32.mrf.mxu2  ;;  %1949 = vst.msk [vmem:[#allocation2 + $0xe0] sm:$0xff] %vm508_vm5, %v1913_v41  ;;  %v2479_v24 = vadd.f32 %v2443_v17, %v6640_v58 }
 0x1d8   : > { %v969_v30 = vpop.f32.mrf.mxu1  ;;  %5370 = vmatmul.msk.bf16.gmra.mxu3 %vm350_vm1, %v3603_v28  ;;  %v5610_v28 = vld [vmem:[%s5751_s27 + $0x60] sm:$0xff] }
 0x1d9   : > { %2515 = vst.msk [vmem:[#allocation2 + $0xd8] sm:$0xff] %vm508_vm5, %v2479_v24  ;;  %v1049_v40 = vadd.f32 %v1013_v47, %v969_v30  ;;  %v6746_v11 = vpop.f32.mrf.mxu0  ;;  %v6758_v21 = vpop.f32.mrf.mxu3  ;;  %v1016_v30 = vld [vmem:[#allocation2 + $0x110] sm:$0xff]  ;;  %v3106_v47 = vsel %vm2656_vm7, %v3103_v48, %v3105_v43 }
 0x1da   : > { %v1446_v16 = vld [vmem:[#allocation2 + $0xf0] sm:$0xff] }
 0x1db   : > { %v1482_v6 = vadd.f32 %v1446_v16, %v1401_v57  ;;  %1085 = vst.msk [vmem:[#allocation2 + $0xf8] sm:$0xff] %vm508_vm5, %v1049_v40 }
 0x1dc   : > { %v1878_v58 = vld [vmem:[#allocation2 + $0xe8] sm:$0xff] }
 0x1dd   : > { %v1914_v22 = vadd.f32 %v1878_v58, %v6628_v35  ;;  %1518 = vst.msk [vmem:[#allocation2 + $0xf0] sm:$0xff] %vm508_vm5, %v1482_v6  ;;  %v2671_v35 = vsel %vm2656_vm7, %v2668_v26, %v2670_v38  ;;  %v3614_v6 = vshrl.u32 %v5610_v28, 16  ;;  %v3617_v58 = vshll.u32 %v5610_v28, 16 }
 0x1de   : > { %v2444_v62 = vld [vmem:[#allocation2 + $0xe0] sm:$0xff] }
 0x1df   : > { %v1403_v14 = vpop.f32.mrf.mxu2  ;;  %1950 = vst.msk [vmem:[#allocation2 + $0xe8] sm:$0xff] %vm508_vm5, %v1914_v22  ;;  %v2480_v20 = vadd.f32 %v2444_v62, %v6668_v5  ;;  %v4105_v5 = vsel %vm4090_vm8, %v4102_v60, %v4104_v1  ;;  %v3616_v48 = vrot.slane %v3614_v6, 2  ;;  %v3619_v22 = vrot.slane %v3617_v58, 3 }
 0x1e0   : > { %v972_v7 = vpop.f32.mrf.mxu1 }
 0x1e1   : > { %2516 = vst.msk [vmem:[#allocation2 + $0xe0] sm:$0xff] %vm508_vm5, %v2480_v20  ;;  %v1050_v45 = vadd.f32 %v1014_v50, %v972_v7  ;;  %v6774_v25 = vpop.f32.mrf.mxu0  ;;  %v6787_v60 = vpop.f32.mrf.mxu3  ;;  %v6842_v20 = vor.u32 %v3619_v22, %v3616_v48 }
 0x1e2   : > { %v1447_v13 = vld [vmem:[#allocation2 + $0xf8] sm:$0xff] }
 0x1e3   : > { %v1483_v26 = vadd.f32 %v1447_v13, %v1403_v14  ;;  %1086 = vst.msk [vmem:[#allocation2 + $0x100] sm:$0xff] %vm508_vm5, %v1050_v45  ;;  %5187 = vmatmul.msk.bf16.gmra.mxu1 %vm350_vm1, %v2671_v35  ;;  %v1017_v35 = vld [vmem:[#allocation2 + $0x118] sm:$0xff] }
 0x1e4   : > { %5278 = vmatmul.msk.bf16.gmra.mxu2 %vm350_vm1, %v3104_v2  ;;  %v1879_v51 = vld [vmem:[#allocation2 + $0xf0] sm:$0xff]  ;;  %5460 = vmatmul.msk.bf16.gmra.mxu0 %vm350_vm1, %v4105_v5  ;;  %v6858_v13 = vld [vmem:[%s5751_s27 + $0x58] sm:$0xff] }
 0x1e5   : > { %v1915_v34 = vadd.f32 %v1879_v51, %v6652_v8  ;;  %1519 = vst.msk [vmem:[#allocation2 + $0xf8] sm:$0xff] %vm508_vm5, %v1483_v26  ;;  %v3612_v8 = vsel %vm3523_vm6, %v3602_v23, %v3611_v12  ;;  %v6847_v2 = vld [vmem:[%s5751_s27 + $0x50] sm:$0xff]  ;;  %v3107_v51 = vrot.slane %v6850_v61, 2  ;;  %v4108_v0 = vrot.slane %v6858_v13, 3 }
 0x1e6   : > { %v2445_v63 = vld [vmem:[#allocation2 + $0xe8] sm:$0xff]  ;;  %v2674_v26 = vrot.slane %v6847_v2, 2  ;;  %v5612_v2 = vld [vmem:[%s5751_s27 + $0x70] sm:$0xff] }
 0x1e7   : > { %v1406_v44 = vpop.f32.mrf.mxu2  ;;  %1951 = vst.msk [vmem:[#allocation2 + $0xf0] sm:$0xff] %vm508_vm5, %v1915_v34  ;;  %v2481_v37 = vadd.f32 %v2445_v63, %v6693_v32 }
 0x1e8   : > { %v974_v33 = vpop.f32.mrf.mxu1  ;;  %5371 = vmatmul.msk.bf16.gmra.mxu3 %vm350_vm1, %v3612_v8 }
 0x1e9   : > { %2517 = vst.msk [vmem:[#allocation2 + $0xe8] sm:$0xff] %vm508_vm5, %v2481_v37  ;;  %v1051_v42 = vadd.f32 %v1015_v52, %v974_v33  ;;  %v6799_v55 = vpop.f32.mrf.mxu0  ;;  %v2850_v33 = vld [vmem:[#allocation2] sm:$0xff]  ;;  %v3108_v52 = vsel %vm2656_vm7, %v3105_v43, %v3107_v51  ;;  %v3625_v43 = vrot.slane %v3623_v27, 2 }
 0x1ea   : > { %v1448_v36 = vld [vmem:[#allocation2 + $0x100] sm:$0xff] }
 0x1eb   : > { %v1484_v15 = vadd.f32 %v1448_v36, %v1406_v44  ;;  %1087 = vst.msk [vmem:[#allocation2 + $0x108] sm:$0xff] %vm508_vm5, %v1051_v42  ;;  %v6811_v57 = vpop.f32.mrf.mxu3 }
 0x1ec   : > { %v1880_v32 = vld [vmem:[#allocation2 + $0xf8] sm:$0xff] }
 0x1ed   : > { %v1916_v4 = vadd.f32 %v1880_v32, %v6681_v10  ;;  %1520 = vst.msk [vmem:[#allocation2 + $0x100] sm:$0xff] %vm508_vm5, %v1484_v15  ;;  %v2673_v10 = vsel %vm2656_vm7, %v2670_v38, %v2672_v18  ;;  %v3626_v32 = vshll.u32 %v5611_v19, 16  ;;  %v6969_v19 = vld [vmem:[%s5751_s27 + $0x68] sm:$0xff] }
 0x1ee   : > { %v2446_v41 = vld [vmem:[#allocation2 + $0xf0] sm:$0xff] }
 0x1ef   : > { %v1408_v17 = vpop.f32.mrf.mxu2  ;;  %1952 = vst.msk [vmem:[#allocation2 + $0xf8] sm:$0xff] %vm508_vm5, %v1916_v4  ;;  %v2482_v23 = vadd.f32 %v2446_v41, %v6721_v59  ;;  %v4107_v59 = vsel %vm4090_vm8, %v4104_v1, %v4106_v9  ;;  %v3628_v4 = vrot.slane %v3626_v32, 3 }
 0x1f0   : > { %v977_v24 = vpop.f32.mrf.mxu1 }
 0x1f1   : > { %2518 = vst.msk [vmem:[#allocation2 + $0xf0] sm:$0xff] %vm508_vm5, %v2482_v23  ;;  %v1052_v40 = vadd.f32 %v1016_v30, %v977_v24  ;;  %v6827_v16 = vpop.f32.mrf.mxu0  ;;  %v6900_v24 = vor.u32 %v3628_v4, %v3625_v43  ;;  %v4112_v43 = vrot.slane %v6969_v19, 3 }
 0x1f2   : > { %v1449_v3 = vld [vmem:[#allocation2 + $0x108] sm:$0xff] }
 0x1f3   : > { %v1485_v38 = vadd.f32 %v1449_v3, %v1408_v17  ;;  %1088 = vst.msk [vmem:[#allocation2 + $0x110] sm:$0xff] %vm508_vm5, %v1052_v40  ;;  %5188 = vmatmul.msk.bf16.gmra.mxu1 %vm350_vm1, %v2673_v10  ;;  %v6840_v14 = vpop.f32.mrf.mxu3  ;;  %v2851_v10 = vld [vmem:[#allocation2 + $0x8] sm:$0xff]  ;;  %v6915_v3 = vld [vmem:[%s5751_s27 + $0x60] sm:$0xff] }
 0x1f4   : > { %5279 = vmatmul.msk.bf16.gmra.mxu2 %vm350_vm1, %v3106_v47  ;;  %v1881_v39 = vld [vmem:[#allocation2 + $0x100] sm:$0xff]  ;;  %5461 = vmatmul.msk.bf16.gmra.mxu0 %vm350_vm1, %v4107_v59  ;;  %v6903_v47 = vld [vmem:[%s5751_s27 + $0x58] sm:$0xff]  ;;  %v3630_v59 = vsel %vm3523_vm6, %v6842_v20, %v6900_v24  ;;  %v4110_v22 = vrot.slane %v6915_v3, 3 }
 0x1f5   : > { %v1917_v29 = vadd.f32 %v1881_v39, %v6705_v56  ;;  %1521 = vst.msk [vmem:[#allocation2 + $0x108] sm:$0xff] %vm508_vm5, %v1485_v38  ;;  %v3621_v56 = vsel %vm3523_vm6, %v3611_v12, %v6842_v20  ;;  %v2676_v38 = vrot.slane %v6903_v47, 2  ;;  %v5613_v47 = vld [vmem:[%s5751_s27 + $0x78] sm:$0xff]  ;;  %v7011_v3 = vld [vmem:[%s7626_s2] ss:$0 sm:$0xff] }
 0x1f6   : > { %v2447_v1 = vld [vmem:[#allocation2 + $0xf8] sm:$0xff] }
 0x1f7   : > { %v1411_v62 = vpop.f32.mrf.mxu2  ;;  %1953 = vst.msk [vmem:[#allocation2 + $0x100] sm:$0xff] %vm508_vm5, %v1917_v29  ;;  %v2483_v7 = vadd.f32 %v2447_v1, %v6746_v11 }
 0x1f8   : > { %v979_v50 = vpop.f32.mrf.mxu1  ;;  %5372 = vmatmul.msk.bf16.gmra.mxu3 %vm350_vm1, %v3621_v56 }
 0x1f9   : > { %2519 = vst.msk [vmem:[#allocation2 + $0xf8] sm:$0xff] %vm508_vm5, %v2483_v7  ;;  %v1053_v45 = vadd.f32 %v1017_v35, %v979_v50  ;;  %v6855_v5 = vpop.f32.mrf.mxu0  ;;  %v2852_v50 = vld [vmem:[#allocation2 + $0x10] sm:$0xff] }
 0x1fa   : > { %v1450_v54 = vld [vmem:[#allocation2 + $0x110] sm:$0xff] }
 0x1fb   : > { %v1486_v49 = vadd.f32 %v1450_v54, %v1411_v62  ;;  %1089 = vst.msk [vmem:[#allocation2 + $0x118] sm:$0xff] %vm508_vm5, %v1053_v45  ;;  %v6867_v44 = vpop.f32.mrf.mxu3 }
 0x1fc   : > { %v1882_v11 = vld [vmem:[#allocation2 + $0x108] sm:$0xff] }
 0x1fd   : > { %v1918_v53 = vadd.f32 %v1882_v11, %v6734_v31  ;;  %1522 = vst.msk [vmem:[#allocation2 + $0x110] sm:$0xff] %vm508_vm5, %v1486_v49  ;;  %v2675_v31 = vsel %vm2656_vm7, %v2672_v18, %v2674_v26  ;;  %v3632_v11 = vshrl.u32 %v5612_v2, 16 }
 0x1fe   : > { %v2448_v34 = vld [vmem:[#allocation2 + $0x100] sm:$0xff] }
 0x1ff   : > { %v1413_v63 = vpop.f32.mrf.mxu2  ;;  %1954 = vst.msk [vmem:[#allocation2 + $0x108] sm:$0xff] %vm508_vm5, %v1918_v53  ;;  %v2484_v12 = vadd.f32 %v2448_v34, %v6774_v25  ;;  %v4109_v25 = vsel %vm4090_vm8, %v4106_v9, %v4108_v0  ;;  %v3634_v34 = vrot.slane %v3632_v11, 2 }
 0x200   : > { %v2760_v37 = vpop.f32.mrf.mxu1 }
 0x201   : > { %2520 = vst.msk [vmem:[#allocation2 + $0x100] sm:$0xff] %vm508_vm5, %v2484_v12  ;;  %v2886_v8 = vadd.f32 %v2850_v33, %v2760_v37  ;;  %v6882_v42 = vpop.f32.mrf.mxu0  ;;  %v2853_v33 = vld [vmem:[#allocation2 + $0x18] sm:$0xff] }
 0x202   : > { %v1451_v36 = vld [vmem:[#allocation2 + $0x118] sm:$0xff] }
 0x203   : > { %v1487_v15 = vadd.f32 %v1451_v36, %v1413_v63  ;;  %2922 = vst.msk [vmem:[#allocation2] sm:$0xff] %vm508_vm5, %v2886_v8  ;;  %5189 = vmatmul.msk.bf16.gmra.mxu1 %vm350_vm1, %v2675_v31  ;;  %v6896_v17 = vpop.f32.mrf.mxu3  ;;  %v6958_v31 = vld [vmem:[%s5751_s27 + $0x60] sm:$0xff] }
 0x204   : > { %5280 = vmatmul.msk.bf16.gmra.mxu2 %vm350_vm1, %v3108_v52  ;;  %v1883_v18 = vld [vmem:[#allocation2 + $0x110] sm:$0xff]  ;;  %5462 = vmatmul.msk.bf16.gmra.mxu0 %vm350_vm1, %v4109_v25  ;;  %v6961_v52 = vld [vmem:[%s5751_s27 + $0x68] sm:$0xff]  ;;  %v2678_v32 = vrot.slane %v6958_v31, 2 }
 0x205   : > { %v1919_v46 = vadd.f32 %v1883_v18, %v6758_v21  ;;  %1523 = vst.msk [vmem:[#allocation2 + $0x118] sm:$0xff] %vm508_vm5, %v1487_v15  ;;  %v6906_v21 = vld [vmem:[%s5751_s27 + $0x60] sm:$0xff]  ;;  %v3111_v18 = vrot.slane %v6961_v52, 2 }
 0x206   : > { %v2449_v9 = vld [vmem:[#allocation2 + $0x108] sm:$0xff]  ;;  %v3109_v39 = vrot.slane %v6906_v21, 2 }
 0x207   : > { %v3193_v41 = vpop.f32.mrf.mxu2  ;;  %1955 = vst.msk [vmem:[#allocation2 + $0x110] sm:$0xff] %vm508_vm5, %v1919_v46  ;;  %v2485_v23 = vadd.f32 %v2449_v9, %v6799_v55 }
 0x208   : > { %v2762_v30 = vpop.f32.mrf.mxu1  ;;  %5373 = vmatmul.msk.bf16.gmra.mxu3 %vm350_vm1, %v3630_v59  ;;  %v3110_v35 = vsel %vm2656_vm7, %v3107_v51, %v3109_v39 }
 0x209   : > { %2521 = vst.msk [vmem:[#allocation2 + $0x108] sm:$0xff] %vm508_vm5, %v2485_v23  ;;  %v2887_v28 = vadd.f32 %v2851_v10, %v2762_v30  ;;  %v6909_v40 = vpop.f32.mrf.mxu0  ;;  %v2854_v30 = vld [vmem:[#allocation2 + $0x20] sm:$0xff]  ;;  %v3112_v10 = vsel %vm2656_vm7, %v3109_v39, %v3111_v18 }
 0x20a   : > { %v3283_v55 = vld [vmem:[#allocation2] sm:$0xff] }
 0x20b   : > { %v3319_v6 = vadd.f32 %v3283_v55, %v3193_v41  ;;  %2923 = vst.msk [vmem:[#allocation2 + $0x8] sm:$0xff] %vm508_vm5, %v2887_v28  ;;  %v6924_v62 = vpop.f32.mrf.mxu3 }
 0x20c   : > { %v1884_v58 = vld [vmem:[#allocation2 + $0x118] sm:$0xff] }
 0x20d   : > { %v1920_v48 = vadd.f32 %v1884_v58, %v6787_v60  ;;  %3355 = vst.msk [vmem:[#allocation2] sm:$0xff] %vm508_vm5, %v3319_v6  ;;  %v2677_v60 = vsel %vm2656_vm7, %v2674_v26, %v2676_v38  ;;  %v3635_v26 = vshll.u32 %v5612_v2, 16  ;;  %v3641_v58 = vshrl.u32 %v5613_v47, 16 }
 0x20e   : > { %v2450_v29 = vld [vmem:[#allocation2 + $0x110] sm:$0xff] }
 0x20f   : > { %v3195_v1 = vpop.f32.mrf.mxu2  ;;  %1956 = vst.msk [vmem:[#allocation2 + $0x118] sm:$0xff] %vm508_vm5, %v1920_v48  ;;  %v2486_v20 = vadd.f32 %v2450_v29, %v6827_v16  ;;  %v4111_v16 = vsel %vm4090_vm8, %v4108_v0, %v4110_v22  ;;  %v3637_v63 = vrot.slane %v3635_v26, 3 }
 0x210   : > { %v2765_v7 = vpop.f32.mrf.mxu1 }
 0x211   : > { %2522 = vst.msk [vmem:[#allocation2 + $0x110] sm:$0xff] %vm508_vm5, %v2486_v20  ;;  %v2888_v56 = vadd.f32 %v2852_v50, %v2765_v7  ;;  %v6939_v45 = vpop.f32.mrf.mxu0  ;;  %v2855_v50 = vld [vmem:[#allocation2 + $0x28] sm:$0xff] }
 0x212   : > { %v3284_v54 = vld [vmem:[#allocation2 + $0x8] sm:$0xff] }
 0x213   : > { %v3320_v49 = vadd.f32 %v3284_v54, %v3195_v1  ;;  %2924 = vst.msk [vmem:[#allocation2 + $0x10] sm:$0xff] %vm508_vm5, %v2888_v56  ;;  %5190 = vmatmul.msk.bf16.gmra.mxu1 %vm350_vm1, %v2677_v60  ;;  %v6953_v0 = vpop.f32.mrf.mxu3  ;;  %v3643_v1 = vrot.slane %v3641_v58, 2  ;;  %v7021_v56 = vld [vmem:[%s5751_s27 + $0x68] sm:$0xff]  ;;  %v7089_v58 = vld [vmem:[%s5751_s27 + $0x70] sm:$0xff] }
 0x214   : > { %5281 = vmatmul.msk.bf16.gmra.mxu2 %vm350_vm1, %v3110_v35  ;;  %v3850_v61 = vld [vmem:[#allocation2] sm:$0xff]  ;;  %5463 = vmatmul.msk.bf16.gmra.mxu0 %vm350_vm1, %v4111_v16 }
 0x215   : > { %v3886_v13 = vadd.f32 %v3850_v61, %v6811_v57  ;;  %3356 = vst.msk [vmem:[#allocation2 + $0x8] sm:$0xff] %vm508_vm5, %v3320_v49  ;;  %v6963_v57 = vor.u32 %v3637_v63, %v3634_v34  ;;  %v7033_v61 = vld [vmem:[%s5751_s27 + $0x70] sm:$0xff] }
 0x216   : > { %v2451_v51 = vld [vmem:[#allocation2 + $0x118] sm:$0xff] }
 0x217   : > { %v3198_v53 = vpop.f32.mrf.mxu2  ;;  %3922 = vst.msk [vmem:[#allocation2] sm:$0xff] %vm508_vm5, %v3886_v13  ;;  %v2487_v12 = vadd.f32 %v2451_v51, %v6855_v5  ;;  %v3639_v5 = vsel %vm3523_vm6, %v6900_v24, %v6963_v57 }
 0x218   : > { %v2767_v37 = vpop.f32.mrf.mxu1  ;;  %5374 = vmatmul.msk.bf16.gmra.mxu3 %vm350_vm1, %v3639_v5 }
 0x219   : > { %2523 = vst.msk [vmem:[#allocation2 + $0x118] sm:$0xff] %vm508_vm5, %v2487_v12  ;;  %v2889_v8 = vadd.f32 %v2853_v33, %v2767_v37  ;;  %v6966_v25 = vpop.f32.mrf.mxu0  ;;  %v4114_v12 = vrot.slane %v7033_v61, 3 }
 0x21a   : > { %v3285_v36 = vld [vmem:[#allocation2 + $0x10] sm:$0xff] }
 0x21b   : > { %v3321_v15 = vadd.f32 %v3285_v36, %v3198_v53  ;;  %2925 = vst.msk [vmem:[#allocation2 + $0x18] sm:$0xff] %vm508_vm5, %v2889_v8  ;;  %v6981_v41 = vpop.f32.mrf.mxu3  ;;  %v2680_v53 = vrot.slane %v7021_v56, 2  ;;  %v4115_v31 = vsel %vm4090_vm8, %v4112_v43, %v4114_v12  ;;  %v5615_v56 = vld [vmem:[%s5751_s27 + $0x88] sm:$0xff] }
 0x21c   : > { %v3851_v27 = vld [vmem:[#allocation2 + $0x8] sm:$0xff]  ;;  %v3662_v61 = vshll.u32 %v5615_v56, 16 }
 0x21d   : > { %v3887_v46 = vadd.f32 %v3851_v27, %v6840_v14  ;;  %3357 = vst.msk [vmem:[#allocation2 + $0x10] sm:$0xff] %vm508_vm5, %v3321_v15  ;;  %v2679_v14 = vsel %vm2656_vm7, %v2676_v38, %v2678_v32  ;;  %v3644_v38 = vshll.u32 %v5613_v47, 16  ;;  %v2856_v15 = vld [vmem:[#allocation2 + $0x30] sm:$0xff] }
 0x21e   : > { %v4284_v4 = vld [vmem:[#allocation2] sm:$0xff] }
 0x21f   : > { %v3200_v9 = vpop.f32.mrf.mxu2  ;;  %3923 = vst.msk [vmem:[#allocation2 + $0x8] sm:$0xff] %vm508_vm5, %v3887_v46  ;;  %v4320_v23 = vadd.f32 %v4284_v4, %v6882_v42  ;;  %v4113_v42 = vsel %vm4090_vm8, %v4110_v22, %v4112_v43  ;;  %v3646_v20 = vrot.slane %v3644_v38, 3  ;;  %v7092_v38 = vld [vmem:[%s5751_s27 + $0x78] sm:$0xff] }
 0x220   : > { %v2770_v24 = vpop.f32.mrf.mxu1 }
 0x221   : > { %4356 = vst.msk [vmem:[#allocation2] sm:$0xff] %vm508_vm5, %v4320_v23  ;;  %v2890_v28 = vadd.f32 %v2854_v30, %v2770_v24  ;;  %v6996_v59 = vpop.f32.mrf.mxu0  ;;  %v7026_v16 = vor.u32 %v3646_v20, %v3643_v1 }
 0x222   : > { %v3286_v55 = vld [vmem:[#allocation2 + $0x18] sm:$0xff] }
 0x223   : > { %v3322_v6 = vadd.f32 %v3286_v55, %v3200_v9  ;;  %2926 = vst.msk [vmem:[#allocation2 + $0x20] sm:$0xff] %vm508_vm5, %v2890_v28  ;;  %5191 = vmatmul.msk.bf16.gmra.mxu1 %vm350_vm1, %v2679_v14  ;;  %v7016_v29 = vpop.f32.mrf.mxu3  ;;  %v3648_v11 = vsel %vm3523_vm6, %v6963_v57, %v7026_v16  ;;  %v2857_v55 = vld [vmem:[#allocation2 + $0x38] sm:$0xff] }
 0x224   : > { %5282 = vmatmul.msk.bf16.gmra.mxu2 %vm350_vm1, %v3112_v10  ;;  %v3852_v21 = vld [vmem:[#allocation2 + $0x10] sm:$0xff]  ;;  %5464 = vmatmul.msk.bf16.gmra.mxu0 %vm350_vm1, %v4113_v42 }
 0x225   : > { %v3888_v39 = vadd.f32 %v3852_v21, %v6867_v44  ;;  %3358 = vst.msk [vmem:[#allocation2 + $0x18] sm:$0xff] %vm508_vm5, %v3322_v6  ;;  %v7024_v44 = vld [vmem:[%s5751_s27 + $0x70] sm:$0xff] }
 0x226   : > { %v4285_v48 = vld [vmem:[#allocation2 + $0x8] sm:$0xff]  ;;  %v3113_v34 = vrot.slane %v7024_v44, 2 }
 0x227   : > { %v3203_v22 = vpop.f32.mrf.mxu2  ;;  %3924 = vst.msk [vmem:[#allocation2 + $0x10] sm:$0xff] %vm508_vm5, %v3888_v39  ;;  %v4321_v7 = vadd.f32 %v4285_v48, %v6909_v40 }
 0x228   : > { %v4392_v60 = vld [vmem:[#allocation2] sm:$0xff]  ;;  %v2772_v35 = vpop.f32.mrf.mxu1  ;;  %5375 = vmatmul.msk.bf16.gmra.mxu3 %vm350_vm1, %v3648_v11  ;;  %v3114_v27 = vsel %vm2656_vm7, %v3111_v18, %v3113_v34 }
 0x229   : > { %v4432_v2 = vadd.f32 %v7011_v3, %v4392_v60  ;;  %4357 = vst.msk [vmem:[#allocation2 + $0x8] sm:$0xff] %vm508_vm5, %v4321_v7  ;;  %v2891_v54 = vadd.f32 %v2855_v50, %v2772_v35  ;;  %v7030_v49 = vpop.f32.mrf.mxu0  ;;  %v2682_v60 = vrot.slane %v7089_v58, 2  ;;  %v3115_v35 = vrot.slane %v7092_v38, 2  ;;  %v5616_v58 = vld [vmem:[%s5751_s27 + $0x90] sm:$0xff] }
 0x22a   : > { %v3287_v40 = vld [vmem:[#allocation2 + $0x20] sm:$0xff] }
 0x22b   : > { %v4468_v26 = vmax.f32 %v4432_v2, 0.0  ;;  %v3323_v13 = vadd.f32 %v3287_v40, %v3203_v22  ;;  %2927 = vst.msk [vmem:[#allocation2 + $0x28] sm:$0xff] %vm508_vm5, %v2891_v54  ;;  %v7052_v57 = vpop.f32.mrf.mxu3 }
 0x22c   : > { %v3853_v51 = vld [vmem:[#allocation2 + $0x18] sm:$0xff] }
 0x22d   : > { %4504 = vst.msk [vmem:[%s7038_s19] sm:$0xff] %vm508_vm5, %v4468_v26  ;;  %v3889_v63 = vadd.f32 %v3853_v51, %v6896_v17  ;;  %v2681_v17 = vsel %vm2656_vm7, %v2678_v32, %v2680_v53  ;;  %v5614_v32 = vld [vmem:[%s5751_s27 + $0x80] sm:$0xff] }
 0x22e   : > { %3359 = vst.msk [vmem:[#allocation2 + $0x20] sm:$0xff] %vm508_vm5, %v3323_v13  ;;  %v4286_v37 = vld [vmem:[#allocation2 + $0x10] sm:$0xff]  ;;  %v3650_v18 = vshrl.u32 %v5614_v32, 16  ;;  %v3653_v24 = vshll.u32 %v5614_v32, 16 }
 0x22f   : > { %v3205_v33 = vpop.f32.mrf.mxu2  ;;  %3925 = vst.msk [vmem:[#allocation2 + $0x18] sm:$0xff] %vm508_vm5, %v3889_v63  ;;  %v4322_v8 = vadd.f32 %v4286_v37, %v6939_v45  ;;  %v2858_v37 = vld [vmem:[#allocation2 + $0x40] sm:$0xff] }
 0x230   : > { %v4393_v36 = vld [vmem:[#allocation2 + $0x8] sm:$0xff]  ;;  %v2775_v5 = vpop.f32.mrf.mxu1  ;;  %v3652_v43 = vrot.slane %v3650_v18, 2  ;;  %v3655_v42 = vrot.slane %v3653_v24, 3  ;;  %v7152_v18 = vld [vmem:[%s5751_s27 + $0x78] sm:$0xff]  ;;  %v7155_v24 = vld [vmem:[%s5751_s27 + $0x80] sm:$0xff] }
 0x231   : > { %v4433_v46 = vadd.f32 %v7011_v3, %v4393_v36  ;;  %4358 = vst.msk [vmem:[#allocation2 + $0x10] sm:$0xff] %vm508_vm5, %v4322_v8  ;;  %v2892_v45 = vadd.f32 %v2856_v15, %v2775_v5  ;;  %v7068_v4 = vpop.f32.mrf.mxu0 }
 0x232   : > { %v3288_v9 = vld [vmem:[#allocation2 + $0x28] sm:$0xff] }
 0x233   : > { %v4469_v23 = vmax.f32 %v4433_v46, 0.0  ;;  %v3324_v52 = vadd.f32 %v3288_v9, %v3205_v33  ;;  %2928 = vst.msk [vmem:[#allocation2 + $0x30] sm:$0xff] %vm508_vm5, %v2892_v45  ;;  %5192 = vmatmul.msk.bf16.gmra.mxu1 %vm350_vm1, %v2681_v17  ;;  %v7084_v28 = vpop.f32.mrf.mxu3  ;;  %v3116_v33 = vsel %vm2656_vm7, %v3113_v34, %v3115_v35  ;;  %v3659_v34 = vshrl.u32 %v5615_v56, 16 }
 0x234   : > { %5283 = vmatmul.msk.bf16.gmra.mxu2 %vm350_vm1, %v3114_v27  ;;  %5465 = vmatmul.msk.bf16.gmra.mxu0 %vm350_vm1, %v4115_v31  ;;  %v3664_v31 = vrot.slane %v3662_v61, 3 }
 0x235   : > { %4505 = vst.msk [vmem:[%s7038_s19 + $0x8] sm:$0xff] %vm508_vm5, %v4469_v23  ;;  %v3854_v19 = vld [vmem:[#allocation2 + $0x20] sm:$0xff]  ;;  %v3661_v17 = vrot.slane %v3659_v34, 2 }
 0x236   : > { %v3890_v30 = vadd.f32 %v3854_v19, %v6924_v62  ;;  %3360 = vst.msk [vmem:[#allocation2 + $0x28] sm:$0xff] %vm508_vm5, %v3324_v52  ;;  %v4287_v14 = vld [vmem:[#allocation2 + $0x18] sm:$0xff]  ;;  %v7094_v62 = vor.u32 %v3655_v42, %v3652_v43  ;;  %v2859_v52 = vld [vmem:[#allocation2 + $0x48] sm:$0xff]  ;;  %v7215_v34 = vld [vmem:[%s5751_s27 + $0x80] sm:$0xff] }
 0x237   : > { %v3208_v10 = vpop.f32.mrf.mxu2  ;;  %v4323_v47 = vadd.f32 %v4287_v14, %v6966_v25  ;;  %v7101_v25 = vld [vmem:[%s5751_s27 + $0x78] sm:$0xff]  ;;  %v7157_v19 = vor.u32 %v3664_v31, %v3661_v17  ;;  %v7162_v14 = vld [vmem:[%s5751_s27 + $0x80] sm:$0xff] }
 0x238   : > { %v4394_v6 = vld [vmem:[#allocation2 + $0x10] sm:$0xff]  ;;  %3926 = vst.msk [vmem:[#allocation2 + $0x20] sm:$0xff] %vm508_vm5, %v3890_v30  ;;  %v2777_v21 = vpop.f32.mrf.mxu1  ;;  %v3657_v20 = vsel %vm3523_vm6, %v7026_v16, %v7094_v62  ;;  %v4116_v54 = vrot.slane %v7101_v25, 3  ;;  %v3668_v25 = vshrl.u32 %v5616_v58, 16 }
 0x239   : > { %v4434_v39 = vadd.f32 %v7011_v3, %v4394_v6  ;;  %4359 = vst.msk [vmem:[#allocation2 + $0x18] sm:$0xff] %vm508_vm5, %v4323_v47  ;;  %v2893_v48 = vadd.f32 %v2857_v55, %v2777_v21  ;;  %v7098_v22 = vpop.f32.mrf.mxu0  ;;  %5376 = vmatmul.msk.bf16.gmra.mxu3 %vm350_vm1, %v3657_v20  ;;  %v3666_v42 = vsel %vm3523_vm6, %v7094_v62, %v7157_v19  ;;  %v2684_v6 = vrot.slane %v7152_v18, 2  ;;  %v5617_v18 = vld [vmem:[%s5751_s27 + $0x98] sm:$0xff] }
 0x23a   : > { %v3289_v1 = vld [vmem:[#allocation2 + $0x30] sm:$0xff]  ;;  %v3117_v21 = vrot.slane %v7155_v24, 2 }
 0x23b   : > { %v4470_v7 = vmax.f32 %v4434_v39, 0.0  ;;  %v3325_v50 = vadd.f32 %v3289_v1, %v3208_v10  ;;  %2929 = vst.msk [vmem:[#allocation2 + $0x38] sm:$0xff] %vm508_vm5, %v2893_v48  ;;  %v7115_v11 = vpop.f32.mrf.mxu3  ;;  %v4118_v48 = vrot.slane %v7162_v14, 3  ;;  %v3677_v14 = vshrl.u32 %v5617_v18, 16 }
 0x23d   : > { %4506 = vst.msk [vmem:[%s7038_s19 + $0x10] sm:$0xff] %vm508_vm5, %v4470_v7  ;;  %v3855_v2 = vld [vmem:[#allocation2 + $0x28] sm:$0xff] }
 0x23e   : > { %v3891_v40 = vadd.f32 %v3855_v2, %v6953_v0  ;;  %3361 = vst.msk [vmem:[#allocation2 + $0x30] sm:$0xff] %vm508_vm5, %v3325_v50  ;;  %v2683_v0 = vsel %vm2656_vm7, %v2680_v53, %v2682_v60 }
 0x23f   : > { %v3210_v16 = vpop.f32.mrf.mxu2  ;;  %v4288_v26 = vld [vmem:[#allocation2 + $0x20] sm:$0xff] }
 0x240   : > { %v4395_v13 = vld [vmem:[#allocation2 + $0x18] sm:$0xff]  ;;  %3927 = vst.msk [vmem:[#allocation2 + $0x28] sm:$0xff] %vm508_vm5, %v3891_v40  ;;  %v4324_v51 = vadd.f32 %v4288_v26, %v6996_v59  ;;  %v2780_v63 = vpop.f32.mrf.mxu1  ;;  %v4117_v59 = vsel %vm4090_vm8, %v4114_v12, %v4116_v54  ;;  %v2860_v40 = vld [vmem:[#allocation2 + $0x50] sm:$0xff] }
 0x241   : > { %v4435_v8 = vadd.f32 %v7011_v3, %v4395_v13  ;;  %v2894_v36 = vadd.f32 %v2858_v37, %v2780_v63  ;;  %v7130_v5 = vpop.f32.mrf.mxu0 }
 0x242   : > { %4360 = vst.msk [vmem:[#allocation2 + $0x20] sm:$0xff] %vm508_vm5, %v4324_v51  ;;  %v3290_v53 = vld [vmem:[#allocation2 + $0x38] sm:$0xff] }
 0x243   : > { %v4471_v15 = vmax.f32 %v4435_v8, 0.0  ;;  %v3326_v44 = vadd.f32 %v3290_v53, %v3210_v16  ;;  %2930 = vst.msk [vmem:[#allocation2 + $0x40] sm:$0xff] %vm508_vm5, %v2894_v36  ;;  %5193 = vmatmul.msk.bf16.gmra.mxu1 %vm350_vm1, %v2683_v0  ;;  %v7147_v45 = vpop.f32.mrf.mxu3  ;;  %v2685_v16 = vsel %vm2656_vm7, %v2682_v60, %v2684_v6  ;;  %v3670_v36 = vrot.slane %v3668_v25, 2  ;;  %v7278_v25 = vld [vmem:[%s5751_s27 + $0x88] sm:$0xff] }
 0x244   : > { %5284 = vmatmul.msk.bf16.gmra.mxu2 %vm350_vm1, %v3116_v33  ;;  %5466 = vmatmul.msk.bf16.gmra.mxu0 %vm350_vm1, %v4117_v59 }
 0x245   : > { %4507 = vst.msk [vmem:[%s7038_s19 + $0x18] sm:$0xff] %vm508_vm5, %v4471_v15  ;;  %v3856_v12 = vld [vmem:[#allocation2 + $0x30] sm:$0xff] }
 0x246   : > { %v3892_v27 = vadd.f32 %v3856_v12, %v6981_v41  ;;  %3362 = vst.msk [vmem:[#allocation2 + $0x38] sm:$0xff] %vm508_vm5, %v3326_v44  ;;  %v2861_v44 = vld [vmem:[#allocation2 + $0x58] sm:$0xff] }
 0x247   : > { %v3213_v46 = vpop.f32.mrf.mxu2  ;;  %v4289_v32 = vld [vmem:[#allocation2 + $0x28] sm:$0xff] }
 0x248   : > { %3928 = vst.msk [vmem:[#allocation2 + $0x30] sm:$0xff] %vm508_vm5, %v3892_v27  ;;  %v4325_v9 = vadd.f32 %v4289_v32, %v7030_v49  ;;  %v2782_v23 = vpop.f32.mrf.mxu1 }
 0x249   : > { %v4396_v41 = vld [vmem:[#allocation2 + $0x20] sm:$0xff]  ;;  %v2895_v43 = vadd.f32 %v2859_v52, %v2782_v23  ;;  %v7159_v30 = vpop.f32.mrf.mxu0  ;;  %5377 = vmatmul.msk.bf16.gmra.mxu3 %vm350_vm1, %v3666_v42 }
 0x24a   : > { %v4436_v10 = vadd.f32 %v7011_v3, %v4396_v41  ;;  %4361 = vst.msk [vmem:[#allocation2 + $0x28] sm:$0xff] %vm508_vm5, %v4325_v9  ;;  %v3291_v49 = vld [vmem:[#allocation2 + $0x40] sm:$0xff]  ;;  %v2686_v41 = vrot.slane %v7215_v34, 2 }
 0x24b   : > { %v3327_v47 = vadd.f32 %v3291_v49, %v3213_v46  ;;  %2931 = vst.msk [vmem:[#allocation2 + $0x48] sm:$0xff] %vm508_vm5, %v2895_v43  ;;  %v7178_v20 = vpop.f32.mrf.mxu3  ;;  %v7225_v46 = vld [vmem:[%s5751_s27 + $0x88] sm:$0xff] }
 0x24c   : > { %v4472_v55 = vmax.f32 %v4436_v10, 0.0  ;;  %v4120_v49 = vrot.slane %v7225_v46, 3 }
 0x24d   : > { %v3857_v39 = vld [vmem:[#allocation2 + $0x38] sm:$0xff]  ;;  %3363 = vst.msk [vmem:[#allocation2 + $0x40] sm:$0xff] %vm508_vm5, %v3327_v47 }
 0x24e   : > { %4508 = vst.msk [vmem:[%s7038_s19 + $0x20] sm:$0xff] %vm508_vm5, %v4472_v55  ;;  %v3893_v62 = vadd.f32 %v3857_v39, %v7016_v29  ;;  %v3118_v29 = vsel %vm2656_vm7, %v3115_v35, %v3117_v21 }
 0x24f   : > { %v3215_v1 = vpop.f32.mrf.mxu2  ;;  %v4290_v7 = vld [vmem:[#allocation2 + $0x30] sm:$0xff] }
 0x250   : > { %3929 = vst.msk [vmem:[#allocation2 + $0x38] sm:$0xff] %vm508_vm5, %v3893_v62  ;;  %v4326_v50 = vadd.f32 %v4290_v7, %v7068_v4  ;;  %v2785_v2 = vpop.f32.mrf.mxu1  ;;  %v4119_v4 = vsel %vm4090_vm8, %v4116_v54, %v4118_v48  ;;  %v3671_v54 = vshll.u32 %v5616_v58, 16  ;;  %v2862_v62 = vld [vmem:[#allocation2 + $0x60] sm:$0xff]  ;;  %v3679_v58 = vrot.slane %v3677_v14, 2 }
 0x251   : > { %v4397_v26 = vld [vmem:[#allocation2 + $0x28] sm:$0xff]  ;;  %v2896_v13 = vadd.f32 %v2860_v40, %v2785_v2  ;;  %v7192_v51 = vpop.f32.mrf.mxu0 }
 0x252   : > { %v4437_v60 = vadd.f32 %v7011_v3, %v4397_v26  ;;  %4362 = vst.msk [vmem:[#allocation2 + $0x30] sm:$0xff] %vm508_vm5, %v4326_v50  ;;  %v3292_v63 = vld [vmem:[#allocation2 + $0x48] sm:$0xff]  ;;  %v3673_v59 = vrot.slane %v3671_v54, 3 }
 0x253   : > { %v3328_v38 = vadd.f32 %v3292_v63, %v3215_v1  ;;  %2932 = vst.msk [vmem:[#allocation2 + $0x50] sm:$0xff] %vm508_vm5, %v2896_v13  ;;  %5194 = vmatmul.msk.bf16.gmra.mxu1 %vm350_vm1, %v2685_v16  ;;  %v7210_v8 = vpop.f32.mrf.mxu3 }
 0x254   : > { %5285 = vmatmul.msk.bf16.gmra.mxu2 %vm350_vm1, %v3118_v29  ;;  %v4473_v35 = vmax.f32 %v4437_v60, 0.0  ;;  %v3858_v37 = vld [vmem:[#allocation2 + $0x40] sm:$0xff]  ;;  %5467 = vmatmul.msk.bf16.gmra.mxu0 %vm350_vm1, %v4119_v4  ;;  %v7220_v61 = vor.u32 %v3673_v59, %v3670_v36  ;;  %v3680_v29 = vshll.u32 %v5617_v18, 16  ;;  %v7290_v59 = vld [vmem:[%s5751_s27 + $0x90] sm:$0xff] }
 0x255   : > { %v3894_v0 = vadd.f32 %v3858_v37, %v7052_v57  ;;  %3364 = vst.msk [vmem:[#allocation2 + $0x48] sm:$0xff] %vm508_vm5, %v3328_v38  ;;  %v7218_v57 = vld [vmem:[%s5751_s27 + $0x88] sm:$0xff] }
 0x256   : > { %4509 = vst.msk [vmem:[%s7038_s19 + $0x28] sm:$0xff] %vm508_vm5, %v4473_v35  ;;  %v3675_v32 = vsel %vm3523_vm6, %v7157_v19, %v7220_v61  ;;  %v3119_v43 = vrot.slane %v7218_v57, 2  ;;  %v3682_v60 = vrot.slane %v3680_v29, 3  ;;  %v2863_v38 = vld [vmem:[#allocation2 + $0x68] sm:$0xff] }
 0x257   : > { %v3218_v33 = vpop.f32.mrf.mxu2  ;;  %3930 = vst.msk [vmem:[#allocation2 + $0x40] sm:$0xff] %vm508_vm5, %v3894_v0  ;;  %v4291_v56 = vld [vmem:[#allocation2 + $0x38] sm:$0xff] }
 0x258   : > { %v4327_v53 = vadd.f32 %v4291_v56, %v7098_v22  ;;  %v2787_v15 = vpop.f32.mrf.mxu1  ;;  %v3120_v1 = vsel %vm2656_vm7, %v3117_v21, %v3119_v43  ;;  %v7283_v54 = vor.u32 %v3682_v60, %v3679_v58 }
 0x259   : > { %v4398_v12 = vld [vmem:[#allocation2 + $0x30] sm:$0xff]  ;;  %v2897_v17 = vadd.f32 %v2861_v44, %v2787_v15  ;;  %v7222_v27 = vpop.f32.mrf.mxu0  ;;  %5378 = vmatmul.msk.bf16.gmra.mxu3 %vm350_vm1, %v3675_v32 }
 0x25a   : > { %v4438_v31 = vadd.f32 %v7011_v3, %v4398_v12  ;;  %4363 = vst.msk [vmem:[#allocation2 + $0x38] sm:$0xff] %vm508_vm5, %v4327_v53  ;;  %v3293_v22 = vld [vmem:[#allocation2 + $0x50] sm:$0xff]  ;;  %v3684_v56 = vsel %vm3523_vm6, %v7220_v61, %v7283_v54  ;;  %v2688_v12 = vrot.slane %v7278_v25, 2 }
 0x25b   : > { %v3329_v9 = vadd.f32 %v3293_v22, %v3218_v33  ;;  %2933 = vst.msk [vmem:[#allocation2 + $0x58] sm:$0xff] %vm508_vm5, %v2897_v17  ;;  %v7241_v47 = vpop.f32.mrf.mxu3  ;;  %v4122_v22 = vrot.slane %v7290_v59, 3 }
 0x25c   : > { %v4474_v23 = vmax.f32 %v4438_v31, 0.0  ;;  %v3859_v52 = vld [vmem:[#allocation2 + $0x48] sm:$0xff] }
 0x25d   : > { %v3895_v10 = vadd.f32 %v3859_v52, %v7084_v28  ;;  %3365 = vst.msk [vmem:[#allocation2 + $0x50] sm:$0xff] %vm508_vm5, %v3329_v9  ;;  %v2687_v28 = vsel %vm2656_vm7, %v2684_v6, %v2686_v41  ;;  %v4123_v34 = vsel %vm4090_vm8, %v4120_v49, %v4122_v22 }
 0x25e   : > { %4510 = vst.msk [vmem:[%s7038_s19 + $0x30] sm:$0xff] %vm508_vm5, %v4474_v23  ;;  %v4292_v19 = vld [vmem:[#allocation2 + $0x40] sm:$0xff] }
 0x25f   : > { %v3220_v42 = vpop.f32.mrf.mxu2  ;;  %3931 = vst.msk [vmem:[#allocation2 + $0x48] sm:$0xff] %vm508_vm5, %v3895_v10  ;;  %v4328_v55 = vadd.f32 %v4292_v19, %v7130_v5  ;;  %v4121_v5 = vsel %vm4090_vm8, %v4118_v48, %v4120_v49  ;;  %v3427_v23 = vld [vmem:[%s5751_s27 + $0xa0] sm:$0x7] }
 0x260   : > { %v2790_v39 = vpop.f32.mrf.mxu1  ;;  %v3503_v10 = vunpack.c.l.b16 %v3427_v23 }
 0x261   : > { %v4399_v7 = vld [vmem:[#allocation2 + $0x38] sm:$0xff]  ;;  %4364 = vst.msk [vmem:[#allocation2 + $0x40] sm:$0xff] %vm508_vm5, %v4328_v55  ;;  %v2898_v50 = vadd.f32 %v2862_v62, %v2790_v39  ;;  %v7256_v2 = vpop.f32.mrf.mxu0  ;;  %v2864_v55 = vld [vmem:[#allocation2 + $0x70] sm:$0xff] }
 0x262   : > { %v4439_v6 = vadd.f32 %v7011_v3, %v4399_v7  ;;  %v3294_v40 = vld [vmem:[#allocation2 + $0x58] sm:$0xff] }
 0x263   : > { %v3330_v24 = vadd.f32 %v3294_v40, %v3220_v42  ;;  %2934 = vst.msk [vmem:[#allocation2 + $0x60] sm:$0xff] %vm508_vm5, %v2898_v50  ;;  %5195 = vmatmul.msk.bf16.gmra.mxu1 %vm350_vm1, %v2687_v28  ;;  %v7273_v4 = vpop.f32.mrf.mxu3 }
 0x264   : > { %5286 = vmatmul.msk.bf16.gmra.mxu2 %vm350_vm1, %v3120_v1  ;;  %v4475_v21 = vmax.f32 %v4439_v6, 0.0  ;;  %v3860_v16 = vld [vmem:[#allocation2 + $0x50] sm:$0xff]  ;;  %5468 = vmatmul.msk.bf16.gmra.mxu0 %vm350_vm1, %v4121_v5  ;;  %v3522_v1 = vpack.c.b16 %v3503_v10, %v3503_v10 }
 0x265   : > { %v3896_v48 = vadd.f32 %v3860_v16, %v7115_v11  ;;  %3366 = vst.msk [vmem:[#allocation2 + $0x58] sm:$0xff] %vm508_vm5, %v3330_v24  ;;  %v7281_v11 = vld [vmem:[%s5751_s27 + $0x90] sm:$0xff] }
 0x266   : > { %4511 = vst.msk [vmem:[%s7038_s19 + $0x38] sm:$0xff] %vm508_vm5, %v4475_v21  ;;  %v4293_v26 = vld [vmem:[#allocation2 + $0x48] sm:$0xff]  ;;  %v3121_v17 = vrot.slane %v7281_v11, 2  ;;  %v3689_v50 = vshll.u32 %v3522_v1, 16  ;;  %v2865_v21 = vld [vmem:[#allocation2 + $0x78] sm:$0xff] }
 0x267   : > { %v3223_v13 = vpop.f32.mrf.mxu2  ;;  %3932 = vst.msk [vmem:[#allocation2 + $0x50] sm:$0xff] %vm508_vm5, %v3896_v48  ;;  %v4329_v63 = vadd.f32 %v4293_v26, %v7159_v30  ;;  %v7341_v48 = vld [vmem:[%s5751_s27 + $0x90] sm:$0xff] }
 0x268   : > { %v4400_v35 = vld [vmem:[#allocation2 + $0x40] sm:$0xff]  ;;  %v2792_v37 = vpop.f32.mrf.mxu1  ;;  %v3122_v39 = vsel %vm2656_vm7, %v3119_v43, %v3121_v17  ;;  %v3686_v43 = vshrl.u32 %v3522_v1, 16  ;;  %v3691_v40 = vrot.slane %v3689_v50, 3 }
 0x269   : > { %v4440_v0 = vadd.f32 %v7011_v3, %v4400_v35  ;;  %4365 = vst.msk [vmem:[#allocation2 + $0x48] sm:$0xff] %vm508_vm5, %v4329_v63  ;;  %v2899_v33 = vadd.f32 %v2863_v38, %v2792_v37  ;;  %v7287_v36 = vpop.f32.mrf.mxu0  ;;  %5379 = vmatmul.msk.bf16.gmra.mxu3 %vm350_vm1, %v3684_v56 }
 0x26a   : > { %v3295_v30 = vld [vmem:[#allocation2 + $0x60] sm:$0xff]  ;;  %v3688_v6 = vrot.slane %v3686_v43, 2 }
 0x26b   : > { %v4476_v53 = vmax.f32 %v4440_v0, 0.0  ;;  %v3331_v15 = vadd.f32 %v3295_v30, %v3223_v13  ;;  %2935 = vst.msk [vmem:[#allocation2 + $0x68] sm:$0xff] %vm508_vm5, %v2899_v33  ;;  %v7304_v9 = vpop.f32.mrf.mxu3  ;;  %v2690_v0 = vrot.slane %v7341_v48, 2 }
 0x26c   : > { %v3861_v44 = vld [vmem:[#allocation2 + $0x58] sm:$0xff]  ;;  %v3692_v26 = vor.u32 %v3691_v40, %v3688_v6 }
 0x26d   : > { %4512 = vst.msk [vmem:[%s7038_s19 + $0x40] sm:$0xff] %vm508_vm5, %v4476_v53  ;;  %v3897_v31 = vadd.f32 %v3861_v44, %v7147_v45  ;;  %v2689_v45 = vsel %vm2656_vm7, %v2686_v41, %v2688_v12  ;;  %v2691_v23 = vsel %vm2656_vm7, %v2688_v12, %v2690_v0 }
 0x26e   : > { %3367 = vst.msk [vmem:[#allocation2 + $0x60] sm:$0xff] %vm508_vm5, %v3331_v15  ;;  %v4294_v61 = vld [vmem:[#allocation2 + $0x50] sm:$0xff]  ;;  %v3693_v38 = vsel %vm3523_vm6, %v7283_v54, %v3692_v26 }
 0x26f   : > { %v3225_v32 = vpop.f32.mrf.mxu2  ;;  %3933 = vst.msk [vmem:[#allocation2 + $0x58] sm:$0xff] %vm508_vm5, %v3897_v31  ;;  %v4330_v52 = vadd.f32 %v4294_v61, %v7192_v51 }
 0x270   : > { %v4401_v19 = vld [vmem:[#allocation2 + $0x48] sm:$0xff]  ;;  %v2795_v42 = vpop.f32.mrf.mxu1 }
 0x271   : > { %v4441_v62 = vadd.f32 %v7011_v3, %v4401_v19  ;;  %4366 = vst.msk [vmem:[#allocation2 + $0x50] sm:$0xff] %vm508_vm5, %v4330_v52  ;;  %v2900_v51 = vadd.f32 %v2864_v55, %v2795_v42  ;;  %v7321_v28 = vpop.f32.mrf.mxu0  ;;  %v2560_v19 = vld [vmem:[%s5751_s27 + $0x98] sm:$0x3] }
 0x272   : > { %v3296_v41 = vld [vmem:[#allocation2 + $0x68] sm:$0xff] }
 0x273   : > { %v4477_v7 = vmax.f32 %v4441_v62, 0.0  ;;  %v3332_v57 = vadd.f32 %v3296_v41, %v3225_v32  ;;  %2936 = vst.msk [vmem:[#allocation2 + $0x70] sm:$0xff] %vm508_vm5, %v2900_v51  ;;  %5196 = vmatmul.msk.bf16.gmra.mxu1 %vm350_vm1, %v2689_v45  ;;  %v7337_v16 = vpop.f32.mrf.mxu3  ;;  %v2866_v32 = vld [vmem:[#allocation2 + $0x80] sm:$0xff] }
 0x274   : > { %5287 = vmatmul.msk.bf16.gmra.mxu2 %vm350_vm1, %v3122_v39  ;;  %5469 = vmatmul.msk.bf16.gmra.mxu0 %vm350_vm1, %v4123_v34  ;;  %v2636_v39 = vunpack.c.l.b16 %v2560_v19 }
 0x275   : > { %4513 = vst.msk [vmem:[%s7038_s19 + $0x48] sm:$0xff] %vm508_vm5, %v4477_v7  ;;  %v3862_v46 = vld [vmem:[#allocation2 + $0x60] sm:$0xff] }
 0x276   : > { %v3898_v49 = vadd.f32 %v3862_v46, %v7178_v20  ;;  %3368 = vst.msk [vmem:[#allocation2 + $0x68] sm:$0xff] %vm508_vm5, %v3332_v57  ;;  %v4295_v5 = vld [vmem:[#allocation2 + $0x58] sm:$0xff]  ;;  %v2867_v57 = vld [vmem:[#allocation2 + $0x88] sm:$0xff]  ;;  %v2655_v43 = vpack.c.b16 %v2636_v39, %v2636_v39 }
 0x277   : > { %v3228_v18 = vpop.f32.mrf.mxu2  ;;  %v4331_v24 = vadd.f32 %v4295_v5, %v7222_v27  ;;  %v7344_v20 = vld [vmem:[%s5751_s27 + $0x98] sm:$0xff] }
 0x278   : > { %v4402_v14 = vld [vmem:[#allocation2 + $0x50] sm:$0xff]  ;;  %3934 = vst.msk [vmem:[#allocation2 + $0x60] sm:$0xff] %vm508_vm5, %v3898_v49  ;;  %v2797_v29 = vpop.f32.mrf.mxu1  ;;  %v7351_v27 = vld [vmem:[%s5751_s27 + $0x98] sm:$0xff]  ;;  %v3123_v33 = vrot.slane %v7344_v20, 2 }
 0x279   : > { %v4442_v13 = vadd.f32 %v7011_v3, %v4402_v14  ;;  %4367 = vst.msk [vmem:[#allocation2 + $0x58] sm:$0xff] %vm508_vm5, %v4331_v24  ;;  %v2901_v58 = vadd.f32 %v2865_v21, %v2797_v29  ;;  %v7348_v60 = vpop.f32.mrf.mxu0  ;;  %5380 = vmatmul.msk.bf16.gmra.mxu3 %vm350_vm1, %v3693_v38  ;;  %v4124_v56 = vrot.slane %v7351_v27, 3  ;;  %v2692_v21 = vrot.slane %v2655_v43, 2 }
 0x27a   : > { %v3297_v63 = vld [vmem:[#allocation2 + $0x70] sm:$0xff] }
 0x27b   : > { %v4478_v35 = vmax.f32 %v4442_v13, 0.0  ;;  %v3333_v37 = vadd.f32 %v3297_v63, %v3228_v18  ;;  %2937 = vst.msk [vmem:[#allocation2 + $0x78] sm:$0xff] %vm508_vm5, %v2901_v58  ;;  %v4125_v25 = vsel %vm4090_vm8, %v4122_v22, %v4124_v56  ;;  %v7386_v12 = vpop.f32.mrf.mxu3 }
 0x27d   : > { %4514 = vst.msk [vmem:[%s7038_s19 + $0x50] sm:$0xff] %vm508_vm5, %v4478_v35  ;;  %v3863_v30 = vld [vmem:[#allocation2 + $0x68] sm:$0xff] }
 0x27e   : > { %v3899_v53 = vadd.f32 %v3863_v30, %v7210_v8  ;;  %3369 = vst.msk [vmem:[#allocation2 + $0x70] sm:$0xff] %vm508_vm5, %v3333_v37  ;;  %v3124_v8 = vsel %vm2656_vm7, %v3121_v17, %v3123_v33  ;;  %v3994_v17 = vld [vmem:[%s5751_s27 + $0xa0] sm:$0x7]  ;;  %v2868_v37 = vld [vmem:[#allocation2 + $0x90] sm:$0xff]  ;;  %v2693_v30 = vsel %vm2656_vm7, %v2690_v0, %v2692_v21 }
 0x27f   : > { %v3230_v54 = vpop.f32.mrf.mxu2  ;;  %v4296_v15 = vld [vmem:[#allocation2 + $0x60] sm:$0xff]  ;;  %v4070_v22 = vunpack.c.l.b16 %v3994_v17 }
 0x280   : > { %v4403_v44 = vld [vmem:[#allocation2 + $0x58] sm:$0xff]  ;;  %3935 = vst.msk [vmem:[#allocation2 + $0x68] sm:$0xff] %vm508_vm5, %v3899_v53  ;;  %v4332_v31 = vadd.f32 %v4296_v15, %v7256_v2  ;;  %v2800_v61 = vpop.f32.mrf.mxu1  ;;  %v2994_v2 = vld [vmem:[%s5751_s27 + $0xa0] sm:$0x3] }
 0x281   : > { %v4443_v52 = vadd.f32 %v7011_v3, %v4403_v44  ;;  %v2902_v10 = vadd.f32 %v2866_v32, %v2800_v61  ;;  %v7379_v42 = vpop.f32.mrf.mxu0  ;;  %v3070_v62 = vunpack.c.l.b16 %v2994_v2  ;;  %v4089_v18 = vpack.c.b16 %v4070_v22, %v4070_v22  ;;  %v2870_v22 = vld [vmem:[#allocation2 + $0xa0] sm:$0xff] }
 0x282   : > { %4368 = vst.msk [vmem:[#allocation2 + $0x60] sm:$0xff] %vm508_vm5, %v4332_v31  ;;  %v3298_v11 = vld [vmem:[#allocation2 + $0x78] sm:$0xff] }
 0x283   : > { %v4479_v55 = vmax.f32 %v4443_v52, 0.0  ;;  %v3334_v45 = vadd.f32 %v3298_v11, %v3230_v54  ;;  %2938 = vst.msk [vmem:[#allocation2 + $0x80] sm:$0xff] %vm508_vm5, %v2902_v10  ;;  %5197 = vmatmul.msk.bf16.gmra.mxu1 %vm350_vm1, %v2691_v23  ;;  %v3089_v50 = vpack.c.b16 %v3070_v62, %v3070_v62  ;;  %v7405_v24 = vpop.f32.mrf.mxu3  ;;  %v4126_v26 = vrot.slane %v4089_v18, 3 }
 0x284   : > { %5288 = vmatmul.msk.bf16.gmra.mxu2 %vm350_vm1, %v3124_v8  ;;  %5470 = vmatmul.msk.bf16.gmra.mxu0 %vm350_vm1, %v4125_v25  ;;  %v2869_v8 = vld [vmem:[#allocation2 + $0x98] sm:$0xff] }
 0x285   : > { %4515 = vst.msk [vmem:[%s7038_s19 + $0x58] sm:$0xff] %vm508_vm5, %v4479_v55  ;;  %v3864_v59 = vld [vmem:[#allocation2 + $0x70] sm:$0xff]  ;;  %v3125_v14 = vrot.slane %v3089_v50, 2  ;;  %v4127_v44 = vsel %vm4090_vm8, %v4124_v56, %v4126_v26 }
 0x286   : > { %v3900_v51 = vadd.f32 %v3864_v59, %v7241_v47  ;;  %3370 = vst.msk [vmem:[#allocation2 + $0x78] sm:$0xff] %vm508_vm5, %v3334_v45 }
 0x287   : > { %v3233_v34 = vpop.f32.mrf.mxu2  ;;  %v4297_v41 = vld [vmem:[#allocation2 + $0x68] sm:$0xff]  ;;  %v3126_v53 = vsel %vm2656_vm7, %v3123_v33, %v3125_v14 }
 0x288   : > { %3936 = vst.msk [vmem:[#allocation2 + $0x70] sm:$0xff] %vm508_vm5, %v3900_v51  ;;  %v4333_v1 = vadd.f32 %v4297_v41, %v7287_v36  ;;  %v2802_v7 = vpop.f32.mrf.mxu1 }
 0x289   : > { %v4404_v46 = vld [vmem:[#allocation2 + $0x60] sm:$0xff]  ;;  %v2903_v49 = vadd.f32 %v2867_v57, %v2802_v7  ;;  %v7400_v5 = vpop.f32.mrf.mxu0 }
 0x28a   : > { %v4444_v47 = vadd.f32 %v7011_v3, %v4404_v46  ;;  %4369 = vst.msk [vmem:[#allocation2 + $0x68] sm:$0xff] %vm508_vm5, %v4333_v1  ;;  %v3299_v6 = vld [vmem:[#allocation2 + $0x80] sm:$0xff] }
 0x28b   : > { %v3335_v40 = vadd.f32 %v3299_v6, %v3233_v34  ;;  %2939 = vst.msk [vmem:[#allocation2 + $0x88] sm:$0xff] %vm508_vm5, %v2903_v49  ;;  %v7432_v33 = vpop.f32.mrf.mxu3  ;;  %v2871_v6 = vld [vmem:[#allocation2 + $0xa8] sm:$0xff] }
 0x28c   : > { %v4480_v36 = vmax.f32 %v4444_v47, 0.0 }
 0x28d   : > { %v3865_v29 = vld [vmem:[#allocation2 + $0x78] sm:$0xff]  ;;  %3371 = vst.msk [vmem:[#allocation2 + $0x80] sm:$0xff] %vm508_vm5, %v3335_v40 }
 0x28e   : > { %4516 = vst.msk [vmem:[%s7038_s19 + $0x60] sm:$0xff] %vm508_vm5, %v4480_v36  ;;  %v3901_v13 = vadd.f32 %v3865_v29, %v7273_v4 }
 0x28f   : > { %v3235_v58 = vpop.f32.mrf.mxu2  ;;  %v4298_v63 = vld [vmem:[#allocation2 + $0x70] sm:$0xff] }
 0x290   : > { %3937 = vst.msk [vmem:[#allocation2 + $0x78] sm:$0xff] %vm508_vm5, %v3901_v13  ;;  %v4334_v38 = vadd.f32 %v4298_v63, %v7321_v28  ;;  %v2805_v35 = vpop.f32.mrf.mxu1 }
 0x291   : > { %v4405_v54 = vld [vmem:[#allocation2 + $0x68] sm:$0xff]  ;;  %v2904_v15 = vadd.f32 %v2868_v37, %v2805_v35  ;;  %v7419_v4 = vpop.f32.mrf.mxu0 }
 0x292   : > { %v4445_v28 = vadd.f32 %v7011_v3, %v4405_v54  ;;  %4370 = vst.msk [vmem:[#allocation2 + $0x70] sm:$0xff] %vm508_vm5, %v4334_v38  ;;  %v3300_v48 = vld [vmem:[#allocation2 + $0x88] sm:$0xff] }
 0x293   : > { %v3336_v31 = vadd.f32 %v3300_v48, %v3235_v58  ;;  %2940 = vst.msk [vmem:[#allocation2 + $0x90] sm:$0xff] %vm508_vm5, %v2904_v15  ;;  %5198 = vmatmul.msk.bf16.gmra.mxu1 %vm350_vm1, %v2693_v30  ;;  %v7449_v62 = vpop.f32.mrf.mxu3  ;;  %v2872_v30 = vld [vmem:[#allocation2 + $0xb0] sm:$0xff] }
 0x294   : > { %5289 = vmatmul.msk.bf16.gmra.mxu2 %vm350_vm1, %v3126_v53  ;;  %v4481_v20 = vmax.f32 %v4445_v28, 0.0  ;;  %v3866_v0 = vld [vmem:[#allocation2 + $0x80] sm:$0xff]  ;;  %5471 = vmatmul.msk.bf16.gmra.mxu0 %vm350_vm1, %v4127_v44 }
 0x295   : > { %v3902_v27 = vadd.f32 %v3866_v0, %v7304_v9  ;;  %3372 = vst.msk [vmem:[#allocation2 + $0x88] sm:$0xff] %vm508_vm5, %v3336_v31 }
 0x296   : > { %4517 = vst.msk [vmem:[%s7038_s19 + $0x68] sm:$0xff] %vm508_vm5, %v4481_v20 }
 0x297   : > { %v3238_v56 = vpop.f32.mrf.mxu2  ;;  %3938 = vst.msk [vmem:[#allocation2 + $0x80] sm:$0xff] %vm508_vm5, %v3902_v27  ;;  %v4299_v61 = vld [vmem:[#allocation2 + $0x78] sm:$0xff] }
 0x298   : > { %v4335_v32 = vadd.f32 %v4299_v61, %v7348_v60  ;;  %v2807_v23 = vpop.f32.mrf.mxu1 }
 0x299   : > { %v4406_v52 = vld [vmem:[#allocation2 + $0x70] sm:$0xff]  ;;  %v2905_v10 = vadd.f32 %v2869_v8, %v2807_v23  ;;  %v7438_v19 = vpop.f32.mrf.mxu0 }
 0x29a   : > { %v4446_v9 = vadd.f32 %v7011_v3, %v4406_v52  ;;  %4371 = vst.msk [vmem:[#allocation2 + $0x78] sm:$0xff] %vm508_vm5, %v4335_v32  ;;  %v3301_v2 = vld [vmem:[#allocation2 + $0x90] sm:$0xff]  ;;  %v2873_v32 = vld [vmem:[#allocation2 + $0xb8] sm:$0xff] }
 0x29b   : > { %v3337_v25 = vadd.f32 %v3301_v2, %v3238_v56  ;;  %2941 = vst.msk [vmem:[#allocation2 + $0x98] sm:$0xff] %vm508_vm5, %v2905_v10 }
 0x29c   : > { %v4482_v11 = vmax.f32 %v4446_v9, 0.0  ;;  %v3867_v17 = vld [vmem:[#allocation2 + $0x88] sm:$0xff] }
 0x29d   : > { %v3903_v55 = vadd.f32 %v3867_v17, %v7337_v16  ;;  %3373 = vst.msk [vmem:[#allocation2 + $0x90] sm:$0xff] %vm508_vm5, %v3337_v25 }
 0x29e   : > { %4518 = vst.msk [vmem:[%s7038_s19 + $0x70] sm:$0xff] %vm508_vm5, %v4482_v11  ;;  %v4300_v60 = vld [vmem:[#allocation2 + $0x80] sm:$0xff] }
 0x29f   : > { %v3240_v45 = vpop.f32.mrf.mxu2  ;;  %3939 = vst.msk [vmem:[#allocation2 + $0x88] sm:$0xff] %vm508_vm5, %v3903_v55  ;;  %v4336_v39 = vadd.f32 %v4300_v60, %v7379_v42 }
 0x2a0   : > { %v2810_v59 = vpop.f32.mrf.mxu1 }
 0x2a1   : > { %v4407_v51 = vld [vmem:[#allocation2 + $0x78] sm:$0xff]  ;;  %4372 = vst.msk [vmem:[#allocation2 + $0x80] sm:$0xff] %vm508_vm5, %v4336_v39  ;;  %v2906_v34 = vadd.f32 %v2870_v22, %v2810_v59  ;;  %v7452_v16 = vpop.f32.mrf.mxu0  ;;  %v7502_v39 = vld [vmem:[%s7626_s2] ss:$0 sm:$0xff] }
 0x2a2   : > { %v4447_v41 = vadd.f32 %v7011_v3, %v4407_v51  ;;  %v3302_v1 = vld [vmem:[#allocation2 + $0x98] sm:$0xff] }
 0x2a3   : > { %v3338_v7 = vadd.f32 %v3302_v1, %v3240_v45  ;;  %2942 = vst.msk [vmem:[#allocation2 + $0xa0] sm:$0xff] %vm508_vm5, %v2906_v34  ;;  %v2874_v45 = vld [vmem:[#allocation2 + $0xc0] sm:$0xff] }
 0x2a4   : > { %v4483_v57 = vmax.f32 %v4447_v41, 0.0  ;;  %v3868_v43 = vld [vmem:[#allocation2 + $0x90] sm:$0xff] }
 0x2a5   : > { %v3904_v42 = vadd.f32 %v3868_v43, %v7386_v12  ;;  %3374 = vst.msk [vmem:[#allocation2 + $0x98] sm:$0xff] %vm508_vm5, %v3338_v7  ;;  %v7464_v12 = vpop.f32.mrf.mxu3 }
 0x2a6   : > { %4519 = vst.msk [vmem:[%s7038_s19 + $0x78] sm:$0xff] %vm508_vm5, %v4483_v57  ;;  %v4301_v50 = vld [vmem:[#allocation2 + $0x88] sm:$0xff] }
 0x2a7   : > { %v3243_v46 = vpop.f32.mrf.mxu2  ;;  %3940 = vst.msk [vmem:[#allocation2 + $0x90] sm:$0xff] %vm508_vm5, %v3904_v42  ;;  %v4337_v49 = vadd.f32 %v4301_v50, %v7400_v5 }
 0x2a8   : > { %v4408_v18 = vld [vmem:[#allocation2 + $0x80] sm:$0xff]  ;;  %v2812_v47 = vpop.f32.mrf.mxu1 }
 0x2a9   : > { %v4448_v40 = vadd.f32 %v7011_v3, %v4408_v18  ;;  %4373 = vst.msk [vmem:[#allocation2 + $0x88] sm:$0xff] %vm508_vm5, %v4337_v49  ;;  %v2907_v36 = vadd.f32 %v2871_v6, %v2812_v47  ;;  %v7466_v21 = vpop.f32.mrf.mxu0 }
 0x2aa   : > { %v3303_v14 = vld [vmem:[#allocation2 + $0xa0] sm:$0xff] }
 0x2ab   : > { %v4484_v29 = vmax.f32 %v4448_v40, 0.0  ;;  %v3339_v26 = vadd.f32 %v3303_v14, %v3243_v46  ;;  %2943 = vst.msk [vmem:[#allocation2 + $0xa8] sm:$0xff] %vm508_vm5, %v2907_v36  ;;  %v2875_v46 = vld [vmem:[#allocation2 + $0xc8] sm:$0xff] }
 0x2ac   : > { %v3869_v13 = vld [vmem:[#allocation2 + $0x98] sm:$0xff] }
 0x2ad   : > { %4520 = vst.msk [vmem:[%s7038_s19 + $0x80] sm:$0xff] %vm508_vm5, %v4484_v29  ;;  %v3905_v5 = vadd.f32 %v3869_v13, %v7405_v24  ;;  %v7478_v28 = vpop.f32.mrf.mxu3 }
 0x2ae   : > { %3375 = vst.msk [vmem:[#allocation2 + $0xa0] sm:$0xff] %vm508_vm5, %v3339_v26  ;;  %v4302_v58 = vld [vmem:[#allocation2 + $0x90] sm:$0xff] }
 0x2af   : > { %v3245_v63 = vpop.f32.mrf.mxu2  ;;  %3941 = vst.msk [vmem:[#allocation2 + $0x98] sm:$0xff] %vm508_vm5, %v3905_v5  ;;  %v4338_v38 = vadd.f32 %v4302_v58, %v7419_v4  ;;  %v2876_v5 = vld [vmem:[#allocation2 + $0xd0] sm:$0xff] }
 0x2b0   : > { %v4409_v35 = vld [vmem:[#allocation2 + $0x88] sm:$0xff]  ;;  %v2815_v37 = vpop.f32.mrf.mxu1 }
 0x2b1   : > { %v4449_v53 = vadd.f32 %v7011_v3, %v4409_v35  ;;  %4374 = vst.msk [vmem:[#allocation2 + $0x90] sm:$0xff] %vm508_vm5, %v4338_v38  ;;  %v2908_v54 = vadd.f32 %v2872_v30, %v2815_v37  ;;  %v7480_v48 = vpop.f32.mrf.mxu0 }
 0x2b2   : > { %v3304_v15 = vld [vmem:[#allocation2 + $0xa8] sm:$0xff] }
 0x2b3   : > { %v4485_v44 = vmax.f32 %v4449_v53, 0.0  ;;  %v3340_v24 = vadd.f32 %v3304_v15, %v3245_v63  ;;  %2944 = vst.msk [vmem:[#allocation2 + $0xb0] sm:$0xff] %vm508_vm5, %v2908_v54 }
 0x2b5   : > { %4521 = vst.msk [vmem:[%s7038_s19 + $0x88] sm:$0xff] %vm508_vm5, %v4485_v44  ;;  %v3870_v4 = vld [vmem:[#allocation2 + $0xa0] sm:$0xff]  ;;  %v3820_v2 = vpop.f32.mrf.mxu3 }
 0x2b6   : > { %v3906_v31 = vadd.f32 %v3870_v4, %v7432_v33  ;;  %3376 = vst.msk [vmem:[#allocation2 + $0xa8] sm:$0xff] %vm508_vm5, %v3340_v24  ;;  %v4303_v20 = vld [vmem:[#allocation2 + $0x98] sm:$0xff] }
 0x2b7   : > { %v3248_v0 = vpop.f32.mrf.mxu2  ;;  %v4339_v27 = vadd.f32 %v4303_v20, %v7438_v19 }
 0x2b8   : > { %v4410_v56 = vld [vmem:[#allocation2 + $0x90] sm:$0xff]  ;;  %3942 = vst.msk [vmem:[#allocation2 + $0xa0] sm:$0xff] %vm508_vm5, %v3906_v31  ;;  %v2817_v61 = vpop.f32.mrf.mxu1  ;;  %v2877_v31 = vld [vmem:[#allocation2 + $0xd8] sm:$0xff] }
 0x2b9   : > { %v4450_v23 = vadd.f32 %v7011_v3, %v4410_v56  ;;  %4375 = vst.msk [vmem:[#allocation2 + $0x98] sm:$0xff] %vm508_vm5, %v4339_v27  ;;  %v2909_v8 = vadd.f32 %v2873_v32, %v2817_v61  ;;  %v7493_v19 = vpop.f32.mrf.mxu0 }
 0x2ba   : > { %v3305_v52 = vld [vmem:[#allocation2 + $0xb0] sm:$0xff] }
 0x2bb   : > { %v4486_v10 = vmax.f32 %v4450_v23, 0.0  ;;  %v3341_v33 = vadd.f32 %v3305_v52, %v3248_v0  ;;  %2945 = vst.msk [vmem:[#allocation2 + $0xb8] sm:$0xff] %vm508_vm5, %v2909_v8 }
 0x2bd   : > { %4522 = vst.msk [vmem:[%s7038_s19 + $0x90] sm:$0xff] %vm508_vm5, %v4486_v10  ;;  %v3871_v9 = vld [vmem:[#allocation2 + $0xa8] sm:$0xff]  ;;  %v3822_v57 = vpop.f32.mrf.mxu3 }
 0x2be   : > { %v3907_v25 = vadd.f32 %v3871_v9, %v7449_v62  ;;  %3377 = vst.msk [vmem:[#allocation2 + $0xb0] sm:$0xff] %vm508_vm5, %v3341_v33 }
 0x2bf   : > { %v3250_v3 = vpop.f32.mrf.mxu2  ;;  %v4304_v11 = vld [vmem:[#allocation2 + $0xa0] sm:$0xff] }
 0x2c0   : > { %v4411_v17 = vld [vmem:[#allocation2 + $0x98] sm:$0xff]  ;;  %3943 = vst.msk [vmem:[#allocation2 + $0xa8] sm:$0xff] %vm508_vm5, %v3907_v25  ;;  %v4340_v55 = vadd.f32 %v4304_v11, %v7452_v16  ;;  %v2820_v60 = vpop.f32.mrf.mxu1  ;;  %v2878_v25 = vld [vmem:[#allocation2 + $0xe0] sm:$0xff] }
 0x2c1   : > { %v4451_v59 = vadd.f32 %v7502_v39, %v4411_v17  ;;  %v2910_v62 = vadd.f32 %v2874_v45, %v2820_v60  ;;  %v4254_v43 = vpop.f32.mrf.mxu0 }
 0x2c2   : > { %4376 = vst.msk [vmem:[#allocation2 + $0xa0] sm:$0xff] %vm508_vm5, %v4340_v55  ;;  %v3306_v22 = vld [vmem:[#allocation2 + $0xb8] sm:$0xff] }
 0x2c3   : > { %v4487_v51 = vmax.f32 %v4451_v59, 0.0  ;;  %v3342_v34 = vadd.f32 %v3306_v22, %v3250_v3  ;;  %2946 = vst.msk [vmem:[#allocation2 + $0xc0] sm:$0xff] %vm508_vm5, %v2910_v62 }
 0x2c5   : > { %4523 = vst.msk [vmem:[%s7038_s19 + $0x98] sm:$0xff] %vm508_vm5, %v4487_v51  ;;  %v3872_v16 = vld [vmem:[#allocation2 + $0xb0] sm:$0xff]  ;;  %v3825_v38 = vpop.f32.mrf.mxu3 }
 0x2c6   : > { %v3908_v41 = vadd.f32 %v3872_v16, %v7464_v12  ;;  %3378 = vst.msk [vmem:[#allocation2 + $0xb8] sm:$0xff] %vm508_vm5, %v3342_v34 }
 0x2c7   : > { %v3253_v1 = vpop.f32.mrf.mxu2  ;;  %v4305_v7 = vld [vmem:[#allocation2 + $0xa8] sm:$0xff] }
 0x2c8   : > { %3944 = vst.msk [vmem:[#allocation2 + $0xb0] sm:$0xff] %vm508_vm5, %v3908_v41  ;;  %v4341_v42 = vadd.f32 %v4305_v7, %v7466_v21  ;;  %v2822_v50 = vpop.f32.mrf.mxu1 }
 0x2c9   : > { %v4412_v49 = vld [vmem:[#allocation2 + $0xa0] sm:$0xff]  ;;  %v2911_v18 = vadd.f32 %v2875_v46, %v2822_v50  ;;  %v4256_v35 = vpop.f32.mrf.mxu0 }
 0x2ca   : > { %v4452_v47 = vadd.f32 %v7502_v39, %v4412_v49  ;;  %4377 = vst.msk [vmem:[#allocation2 + $0xa8] sm:$0xff] %vm508_vm5, %v4341_v42  ;;  %v3307_v6 = vld [vmem:[#allocation2 + $0xc0] sm:$0xff] }
 0x2cb   : > { %v3343_v40 = vadd.f32 %v3307_v6, %v3253_v1  ;;  %2947 = vst.msk [vmem:[#allocation2 + $0xc8] sm:$0xff] %vm508_vm5, %v2911_v18 }
 0x2cc   : > { %v4488_v36 = vmax.f32 %v4452_v47, 0.0 }
 0x2cd   : > { %v3873_v12 = vld [vmem:[#allocation2 + $0xb8] sm:$0xff]  ;;  %3379 = vst.msk [vmem:[#allocation2 + $0xc0] sm:$0xff] %vm508_vm5, %v3343_v40  ;;  %v3827_v32 = vpop.f32.mrf.mxu3 }
 0x2ce   : > { %4524 = vst.msk [vmem:[%s7038_s19 + $0xa0] sm:$0xff] %vm508_vm5, %v4488_v36  ;;  %v3909_v21 = vadd.f32 %v3873_v12, %v7478_v28 }
 0x2cf   : > { %v3255_v14 = vpop.f32.mrf.mxu2  ;;  %v4306_v29 = vld [vmem:[#allocation2 + $0xb0] sm:$0xff] }
 0x2d0   : > { %3945 = vst.msk [vmem:[#allocation2 + $0xb8] sm:$0xff] %vm508_vm5, %v3909_v21  ;;  %v4342_v26 = vadd.f32 %v4306_v29, %v7480_v48  ;;  %v2825_v13 = vpop.f32.mrf.mxu1 }
 0x2d1   : > { %v4413_v58 = vld [vmem:[#allocation2 + $0xa8] sm:$0xff]  ;;  %v2912_v63 = vadd.f32 %v2876_v5, %v2825_v13  ;;  %v4259_v23 = vpop.f32.mrf.mxu0 }
 0x2d2   : > { %v4453_v37 = vadd.f32 %v7502_v39, %v4413_v58  ;;  %4378 = vst.msk [vmem:[#allocation2 + $0xb0] sm:$0xff] %vm508_vm5, %v4342_v26  ;;  %v3308_v30 = vld [vmem:[#allocation2 + $0xc8] sm:$0xff]  ;;  %v2880_v26 = vld [vmem:[#allocation2 + $0xf0] sm:$0xff] }
 0x2d3   : > { %v3344_v53 = vadd.f32 %v3308_v30, %v3255_v14  ;;  %2948 = vst.msk [vmem:[#allocation2 + $0xd0] sm:$0xff] %vm508_vm5, %v2912_v63 }
 0x2d4   : > { %v4489_v54 = vmax.f32 %v4453_v37, 0.0  ;;  %v3874_v15 = vld [vmem:[#allocation2 + $0xc0] sm:$0xff] }
 0x2d5   : > { %v3910_v44 = vadd.f32 %v3874_v15, %v3820_v2  ;;  %3380 = vst.msk [vmem:[#allocation2 + $0xc8] sm:$0xff] %vm508_vm5, %v3344_v53  ;;  %v3830_v22 = vpop.f32.mrf.mxu3 }
 0x2d6   : > { %4525 = vst.msk [vmem:[%s7038_s19 + $0xa8] sm:$0xff] %vm508_vm5, %v4489_v54 }
 0x2d7   : > { %v3258_v24 = vpop.f32.mrf.mxu2  ;;  %3946 = vst.msk [vmem:[#allocation2 + $0xc0] sm:$0xff] %vm508_vm5, %v3910_v44  ;;  %v4307_v28 = vld [vmem:[#allocation2 + $0xb8] sm:$0xff] }
 0x2d8   : > { %v4343_v48 = vadd.f32 %v4307_v28, %v7493_v19  ;;  %v2827_v4 = vpop.f32.mrf.mxu1 }
 0x2d9   : > { %v4414_v20 = vld [vmem:[#allocation2 + $0xb0] sm:$0xff]  ;;  %v2913_v0 = vadd.f32 %v2877_v31, %v2827_v4  ;;  %v4261_v51 = vpop.f32.mrf.mxu0 }
 0x2da   : > { %v4454_v27 = vadd.f32 %v7502_v39, %v4414_v20  ;;  %4379 = vst.msk [vmem:[#allocation2 + $0xb8] sm:$0xff] %vm508_vm5, %v4343_v48  ;;  %v3309_v56 = vld [vmem:[#allocation2 + $0xd0] sm:$0xff] }
 0x2db   : > { %v3345_v61 = vadd.f32 %v3309_v56, %v3258_v24  ;;  %2949 = vst.msk [vmem:[#allocation2 + $0xd8] sm:$0xff] %vm508_vm5, %v2913_v0  ;;  %v2881_v24 = vld [vmem:[#allocation2 + $0xf8] sm:$0xff] }
 0x2dc   : > { %v4490_v8 = vmax.f32 %v4454_v27, 0.0  ;;  %v3875_v52 = vld [vmem:[#allocation2 + $0xc8] sm:$0xff] }
 0x2dd   : > { %v3911_v10 = vadd.f32 %v3875_v52, %v3822_v57  ;;  %3381 = vst.msk [vmem:[#allocation2 + $0xd0] sm:$0xff] %vm508_vm5, %v3345_v61  ;;  %v2879_v57 = vld [vmem:[#allocation2 + $0xe8] sm:$0xff]  ;;  %v3832_v12 = vpop.f32.mrf.mxu3 }
 0x2de   : > { %4526 = vst.msk [vmem:[%s7038_s19 + $0xb0] sm:$0xff] %vm508_vm5, %v4490_v8  ;;  %v4308_v33 = vld [vmem:[#allocation2 + $0xc0] sm:$0xff] }
 0x2df   : > { %v3260_v9 = vpop.f32.mrf.mxu2  ;;  %3947 = vst.msk [vmem:[#allocation2 + $0xc8] sm:$0xff] %vm508_vm5, %v3911_v10  ;;  %v4344_v2 = vadd.f32 %v4308_v33, %v4254_v43  ;;  %v2882_v33 = vld [vmem:[#allocation2 + $0x100] sm:$0xff] }
 0x2e0   : > { %v2830_v19 = vpop.f32.mrf.mxu1 }
 0x2e1   : > { %v4415_v3 = vld [vmem:[#allocation2 + $0xb8] sm:$0xff]  ;;  %4380 = vst.msk [vmem:[#allocation2 + $0xc0] sm:$0xff] %vm508_vm5, %v4344_v2  ;;  %v2914_v11 = vadd.f32 %v2878_v25, %v2830_v19  ;;  %v4264_v21 = vpop.f32.mrf.mxu0 }
 0x2e2   : > { %v4455_v17 = vadd.f32 %v7502_v39, %v4415_v3  ;;  %v3310_v55 = vld [vmem:[#allocation2 + $0xd8] sm:$0xff] }
 0x2e3   : > { %v3346_v60 = vadd.f32 %v3310_v55, %v3260_v9  ;;  %2950 = vst.msk [vmem:[#allocation2 + $0xe0] sm:$0xff] %vm508_vm5, %v2914_v11 }
 0x2e4   : > { %v4491_v45 = vmax.f32 %v4455_v17, 0.0  ;;  %v3876_v59 = vld [vmem:[#allocation2 + $0xd0] sm:$0xff] }
 0x2e5   : > { %v3912_v62 = vadd.f32 %v3876_v59, %v3825_v38  ;;  %3382 = vst.msk [vmem:[#allocation2 + $0xd8] sm:$0xff] %vm508_vm5, %v3346_v60  ;;  %v3835_v4 = vpop.f32.mrf.mxu3 }
 0x2e6   : > { %4527 = vst.msk [vmem:[%s7038_s19 + $0xb8] sm:$0xff] %vm508_vm5, %v4491_v45  ;;  %v4309_v34 = vld [vmem:[#allocation2 + $0xc8] sm:$0xff] }
 0x2e7   : > { %v3263_v16 = vpop.f32.mrf.mxu2  ;;  %3948 = vst.msk [vmem:[#allocation2 + $0xd0] sm:$0xff] %vm508_vm5, %v3912_v62  ;;  %v4345_v41 = vadd.f32 %v4309_v34, %v4256_v35 }
 0x2e8   : > { %v4416_v1 = vld [vmem:[#allocation2 + $0xc0] sm:$0xff]  ;;  %v2832_v7 = vpop.f32.mrf.mxu1 }
 0x2e9   : > { %v4456_v43 = vadd.f32 %v7502_v39, %v4416_v1  ;;  %4381 = vst.msk [vmem:[#allocation2 + $0xc8] sm:$0xff] %vm508_vm5, %v4345_v41  ;;  %v2915_v42 = vadd.f32 %v2879_v57, %v2832_v7  ;;  %v4266_v31 = vpop.f32.mrf.mxu0 }
 0x2ea   : > { %v3311_v50 = vld [vmem:[#allocation2 + $0xe0] sm:$0xff] }
 0x2eb   : > { %v4492_v46 = vmax.f32 %v4456_v43, 0.0  ;;  %v3347_v49 = vadd.f32 %v3311_v50, %v3263_v16  ;;  %2951 = vst.msk [vmem:[#allocation2 + $0xe8] sm:$0xff] %vm508_vm5, %v2915_v42 }
 0x2ec   : > { %v3877_v18 = vld [vmem:[#allocation2 + $0xd8] sm:$0xff] }
 0x2ed   : > { %4528 = vst.msk [vmem:[%s7038_s19 + $0xc0] sm:$0xff] %vm508_vm5, %v4492_v46  ;;  %v3913_v47 = vadd.f32 %v3877_v18, %v3827_v32  ;;  %v3837_v11 = vpop.f32.mrf.mxu3 }
 0x2ee   : > { %3383 = vst.msk [vmem:[#allocation2 + $0xe0] sm:$0xff] %vm508_vm5, %v3347_v49  ;;  %v4310_v6 = vld [vmem:[#allocation2 + $0xd0] sm:$0xff] }
 0x2ef   : > { %v3265_v40 = vpop.f32.mrf.mxu2  ;;  %3949 = vst.msk [vmem:[#allocation2 + $0xd8] sm:$0xff] %vm508_vm5, %v3913_v47  ;;  %v4346_v36 = vadd.f32 %v4310_v6, %v4259_v23 }
 0x2f0   : > { %v4417_v14 = vld [vmem:[#allocation2 + $0xc8] sm:$0xff]  ;;  %v2835_v29 = vpop.f32.mrf.mxu1 }
 0x2f1   : > { %v4457_v13 = vadd.f32 %v7502_v39, %v4417_v14  ;;  %4382 = vst.msk [vmem:[#allocation2 + $0xd0] sm:$0xff] %vm508_vm5, %v4346_v36  ;;  %v2916_v5 = vadd.f32 %v2880_v26, %v2835_v29  ;;  %v4269_v17 = vpop.f32.mrf.mxu0 }
 0x2f2   : > { %v3312_v58 = vld [vmem:[#allocation2 + $0xe8] sm:$0xff] }
 0x2f3   : > { %v4493_v63 = vmax.f32 %v4457_v13, 0.0  ;;  %v3348_v38 = vadd.f32 %v3312_v58, %v3265_v40  ;;  %2952 = vst.msk [vmem:[#allocation2 + $0xf0] sm:$0xff] %vm508_vm5, %v2916_v5  ;;  %v2884_v40 = vld [vmem:[#allocation2 + $0x110] sm:$0xff] }
 0x2f5   : > { %4529 = vst.msk [vmem:[%s7038_s19 + $0xc8] sm:$0xff] %vm508_vm5, %v4493_v63  ;;  %v3878_v35 = vld [vmem:[#allocation2 + $0xe0] sm:$0xff]  ;;  %v3840_v42 = vpop.f32.mrf.mxu3 }
 0x2f6   : > { %v3914_v37 = vadd.f32 %v3878_v35, %v3830_v22  ;;  %3384 = vst.msk [vmem:[#allocation2 + $0xe8] sm:$0xff] %vm508_vm5, %v3348_v38  ;;  %v4311_v30 = vld [vmem:[#allocation2 + $0xd8] sm:$0xff] }
 0x2f7   : > { %v3268_v53 = vpop.f32.mrf.mxu2  ;;  %v4347_v54 = vadd.f32 %v4311_v30, %v4261_v51  ;;  %v2883_v51 = vld [vmem:[#allocation2 + $0x108] sm:$0xff] }
 0x2f8   : > { %v4418_v15 = vld [vmem:[#allocation2 + $0xd0] sm:$0xff]  ;;  %3950 = vst.msk [vmem:[#allocation2 + $0xe0] sm:$0xff] %vm508_vm5, %v3914_v37  ;;  %v2837_v44 = vpop.f32.mrf.mxu1 }
 0x2f9   : > { %v4458_v28 = vadd.f32 %v7502_v39, %v4418_v15  ;;  %4383 = vst.msk [vmem:[#allocation2 + $0xd8] sm:$0xff] %vm508_vm5, %v4347_v54  ;;  %v2917_v48 = vadd.f32 %v2881_v24, %v2837_v44  ;;  %v4271_v50 = vpop.f32.mrf.mxu0 }
 0x2fa   : > { %v3313_v20 = vld [vmem:[#allocation2 + $0xf0] sm:$0xff] }
 0x2fb   : > { %v4494_v0 = vmax.f32 %v4458_v28, 0.0  ;;  %v3349_v27 = vadd.f32 %v3313_v20, %v3268_v53  ;;  %2953 = vst.msk [vmem:[#allocation2 + $0xf8] sm:$0xff] %vm508_vm5, %v2917_v48  ;;  %v2885_v53 = vld [vmem:[#allocation2 + $0x118] sm:$0xff] }
 0x2fd   : > { %4530 = vst.msk [vmem:[%s7038_s19 + $0xd0] sm:$0xff] %vm508_vm5, %v4494_v0  ;;  %v3879_v56 = vld [vmem:[#allocation2 + $0xe8] sm:$0xff]  ;;  %v3842_v63 = vpop.f32.mrf.mxu3 }
 0x2fe   : > { %v3915_v61 = vadd.f32 %v3879_v56, %v3832_v12  ;;  %3385 = vst.msk [vmem:[#allocation2 + $0xf0] sm:$0xff] %vm508_vm5, %v3349_v27 }
 0x2ff   : > { %v3270_v32 = vpop.f32.mrf.mxu2  ;;  %v4312_v23 = vld [vmem:[#allocation2 + $0xe0] sm:$0xff] }
 0x300   : > { %v4419_v8 = vld [vmem:[#allocation2 + $0xd8] sm:$0xff]  ;;  %3951 = vst.msk [vmem:[#allocation2 + $0xe8] sm:$0xff] %vm508_vm5, %v3915_v61  ;;  %v4348_v52 = vadd.f32 %v4312_v23, %v4264_v21  ;;  %v2840_v10 = vpop.f32.mrf.mxu1 }
 0x301   : > { %v4459_v9 = vadd.f32 %v7502_v39, %v4419_v8  ;;  %v2918_v2 = vadd.f32 %v2882_v33, %v2840_v10  ;;  %v4274_v38 = vpop.f32.mrf.mxu0 }
 0x302   : > { %4384 = vst.msk [vmem:[#allocation2 + $0xe0] sm:$0xff] %vm508_vm5, %v4348_v52  ;;  %v3314_v19 = vld [vmem:[#allocation2 + $0xf8] sm:$0xff] }
 0x303   : > { %v4495_v25 = vmax.f32 %v4459_v9, 0.0  ;;  %v3350_v3 = vadd.f32 %v3314_v19, %v3270_v32  ;;  %2954 = vst.msk [vmem:[#allocation2 + $0x100] sm:$0xff] %vm508_vm5, %v2918_v2 }
 0x305   : > { %4531 = vst.msk [vmem:[%s7038_s19 + $0xd8] sm:$0xff] %vm508_vm5, %v4495_v25  ;;  %v3880_v55 = vld [vmem:[#allocation2 + $0xf0] sm:$0xff]  ;;  %v3845_v56 = vpop.f32.mrf.mxu3 }
 0x306   : > { %v3916_v60 = vadd.f32 %v3880_v55, %v3835_v4  ;;  %3386 = vst.msk [vmem:[#allocation2 + $0xf8] sm:$0xff] %vm508_vm5, %v3350_v3 }
 0x307   : > { %v3273_v45 = vpop.f32.mrf.mxu2  ;;  %v4313_v59 = vld [vmem:[#allocation2 + $0xe8] sm:$0xff] }
 0x308   : > { %3952 = vst.msk [vmem:[#allocation2 + $0xf0] sm:$0xff] %vm508_vm5, %v3916_v60  ;;  %v4349_v62 = vadd.f32 %v4313_v59, %v4266_v31  ;;  %v2842_v22 = vpop.f32.mrf.mxu1 }
 0x309   : > { %v4420_v34 = vld [vmem:[#allocation2 + $0xe0] sm:$0xff]  ;;  %v2919_v16 = vadd.f32 %v2883_v51, %v2842_v22  ;;  %v4276_v8 = vpop.f32.mrf.mxu0 }
 0x30a   : > { %v4460_v41 = vadd.f32 %v7502_v39, %v4420_v34  ;;  %4385 = vst.msk [vmem:[#allocation2 + $0xe8] sm:$0xff] %vm508_vm5, %v4349_v62  ;;  %v3315_v1 = vld [vmem:[#allocation2 + $0x100] sm:$0xff] }
 0x30b   : > { %v3351_v7 = vadd.f32 %v3315_v1, %v3273_v45  ;;  %2955 = vst.msk [vmem:[#allocation2 + $0x108] sm:$0xff] %vm508_vm5, %v2919_v16 }
 0x30c   : > { %v4496_v57 = vmax.f32 %v4460_v41, 0.0 }
 0x30d   : > { %v3881_v43 = vld [vmem:[#allocation2 + $0xf8] sm:$0xff]  ;;  %3387 = vst.msk [vmem:[#allocation2 + $0x100] sm:$0xff] %vm508_vm5, %v3351_v7 }
 0x30e   : > { %4532 = vst.msk [vmem:[%s7038_s19 + $0xe0] sm:$0xff] %vm508_vm5, %v4496_v57  ;;  %v3917_v46 = vadd.f32 %v3881_v43, %v3837_v11 }
 0x30f   : > { %v3275_v49 = vpop.f32.mrf.mxu2  ;;  %v4314_v18 = vld [vmem:[#allocation2 + $0xf0] sm:$0xff] }
 0x310   : > { %3953 = vst.msk [vmem:[#allocation2 + $0xf8] sm:$0xff] %vm508_vm5, %v3917_v46  ;;  %v4350_v47 = vadd.f32 %v4314_v18, %v4269_v17  ;;  %v2845_v6 = vpop.f32.mrf.mxu1  ;;  %v3847_v17 = vpop.f32.mrf.mxu3 }
 0x311   : > { %v4421_v36 = vld [vmem:[#allocation2 + $0xe8] sm:$0xff]  ;;  %v2920_v12 = vadd.f32 %v2884_v40, %v2845_v6  ;;  %v4279_v60 = vpop.f32.mrf.mxu0 }
 0x312   : > { %v4461_v21 = vadd.f32 %v7502_v39, %v4421_v36  ;;  %4386 = vst.msk [vmem:[#allocation2 + $0xf0] sm:$0xff] %vm508_vm5, %v4350_v47  ;;  %v3316_v14 = vld [vmem:[#allocation2 + $0x108] sm:$0xff] }
 0x313   : > { %v3352_v29 = vadd.f32 %v3316_v14, %v3275_v49  ;;  %2956 = vst.msk [vmem:[#allocation2 + $0x110] sm:$0xff] %vm508_vm5, %v2920_v12 }
 0x314   : > { %v4497_v26 = vmax.f32 %v4461_v21, 0.0  ;;  %v3882_v13 = vld [vmem:[#allocation2 + $0x100] sm:$0xff] }
 0x315   : > { %v3918_v5 = vadd.f32 %v3882_v13, %v3840_v42  ;;  %3388 = vst.msk [vmem:[#allocation2 + $0x108] sm:$0xff] %vm508_vm5, %v3352_v29 }
 0x316   : > { %4533 = vst.msk [vmem:[%s7038_s19 + $0xe8] sm:$0xff] %vm508_vm5, %v4497_v26 }
 0x317   : > { %3954 = vst.msk [vmem:[#allocation2 + $0x100] sm:$0xff] %vm508_vm5, %v3918_v5  ;;  %v4315_v58 = vld [vmem:[#allocation2 + $0xf8] sm:$0xff]  ;;  %v3278_v37 = vpop.f32.mrf.mxu2 }
 0x318   : > { %v4351_v35 = vadd.f32 %v4315_v58, %v4271_v50  ;;  %v2847_v30 = vpop.f32.mrf.mxu1 }
 0x319   : > { %v4422_v54 = vld [vmem:[#allocation2 + $0xf0] sm:$0xff]  ;;  %v2921_v15 = vadd.f32 %v2885_v53, %v2847_v30  ;;  %v4281_v16 = vpop.f32.mrf.mxu0 }
 0x31a   : > { %v4462_v44 = vadd.f32 %v7502_v39, %v4422_v54  ;;  %4387 = vst.msk [vmem:[#allocation2 + $0xf8] sm:$0xff] %vm508_vm5, %v4351_v35  ;;  %v3317_v24 = vld [vmem:[#allocation2 + $0x110] sm:$0xff] }
 0x31b   : > { %v3353_v28 = vadd.f32 %v3317_v24, %v3278_v37  ;;  %2957 = vst.msk [vmem:[#allocation2 + $0x118] sm:$0xff] %vm508_vm5, %v2921_v15 }
 0x31c   : > { %v4498_v48 = vmax.f32 %v4462_v44, 0.0  ;;  %v3883_v4 = vld [vmem:[#allocation2 + $0x108] sm:$0xff] }
 0x31d   : > { %v3919_v31 = vadd.f32 %v3883_v4, %v3842_v63  ;;  %3389 = vst.msk [vmem:[#allocation2 + $0x110] sm:$0xff] %vm508_vm5, %v3353_v28 }
 0x31e   : > { %4534 = vst.msk [vmem:[%s7038_s19 + $0xf0] sm:$0xff] %vm508_vm5, %v4498_v48  ;;  %v4316_v20 = vld [vmem:[#allocation2 + $0x100] sm:$0xff] }
 0x31f   : > { %3955 = vst.msk [vmem:[#allocation2 + $0x108] sm:$0xff] %vm508_vm5, %v3919_v31  ;;  %v4352_v0 = vadd.f32 %v4316_v20, %v4274_v38  ;;  %v3280_v32 = vpop.f32.mrf.mxu2 }
 0x321   : > { %v4423_v27 = vld [vmem:[#allocation2 + $0xf8] sm:$0xff]  ;;  %4388 = vst.msk [vmem:[#allocation2 + $0x100] sm:$0xff] %vm508_vm5, %v4352_v0 }
 0x322   : > { %v4463_v61 = vadd.f32 %v7502_v39, %v4423_v27  ;;  %v3318_v23 = vld [vmem:[#allocation2 + $0x118] sm:$0xff] }
 0x323   : > { %v3354_v52 = vadd.f32 %v3318_v23, %v3280_v32 }
 0x324   : > { %v4499_v10 = vmax.f32 %v4463_v61, 0.0  ;;  %v3884_v33 = vld [vmem:[#allocation2 + $0x110] sm:$0xff] }
 0x325   : > { %v3920_v9 = vadd.f32 %v3884_v33, %v3845_v56  ;;  %3390 = vst.msk [vmem:[#allocation2 + $0x118] sm:$0xff] %vm508_vm5, %v3354_v52 }
 0x326   : > { %4535 = vst.msk [vmem:[%s7038_s19 + $0xf8] sm:$0xff] %vm508_vm5, %v4499_v10  ;;  %v4317_v2 = vld [vmem:[#allocation2 + $0x108] sm:$0xff] }
 0x327   : > { %3956 = vst.msk [vmem:[#allocation2 + $0x110] sm:$0xff] %vm508_vm5, %v3920_v9  ;;  %v4353_v19 = vadd.f32 %v4317_v2, %v4276_v8 }
 0x328   : > { %v4424_v25 = vld [vmem:[#allocation2 + $0x100] sm:$0xff] }
 0x329   : > { %v4464_v3 = vadd.f32 %v7502_v39, %v4424_v25  ;;  %4389 = vst.msk [vmem:[#allocation2 + $0x108] sm:$0xff] %vm508_vm5, %v4353_v19 }
 0x32b   : > { %v4500_v11 = vmax.f32 %v4464_v3, 0.0 }
 0x32c   : > { %v3885_v55 = vld [vmem:[#allocation2 + $0x118] sm:$0xff] }
 0x32d   : > { %4536 = vst.msk [vmem:[%s7038_s19 + $0x100] sm:$0xff] %vm508_vm5, %v4500_v11  ;;  %v3921_v45 = vadd.f32 %v3885_v55, %v3847_v17 }
 0x32e   : > { %v4318_v59 = vld [vmem:[#allocation2 + $0x110] sm:$0xff] }
 0x32f   : > { %3957 = vst.msk [vmem:[#allocation2 + $0x118] sm:$0xff] %vm508_vm5, %v3921_v45  ;;  %v4354_v62 = vadd.f32 %v4318_v59, %v4279_v60 }
 0x330   : > { %v4425_v22 = vld [vmem:[#allocation2 + $0x108] sm:$0xff] }
 0x331   : > { %v4465_v51 = vadd.f32 %v7502_v39, %v4425_v22  ;;  %4390 = vst.msk [vmem:[#allocation2 + $0x110] sm:$0xff] %vm508_vm5, %v4354_v62 }
 0x333   : > { %v4501_v34 = vmax.f32 %v4465_v51, 0.0 }
 0x335   : > { %4537 = vst.msk [vmem:[%s7038_s19 + $0x108] sm:$0xff] %vm508_vm5, %v4501_v34 }
 0x336   : > { %v4319_v41 = vld [vmem:[#allocation2 + $0x118] sm:$0xff] }
 0x337   : > { %v4355_v1 = vadd.f32 %v4319_v41, %v4281_v16 }
 0x338   : > { %v4426_v7 = vld [vmem:[#allocation2 + $0x110] sm:$0xff] }
 0x339   : > { %v4466_v57 = vadd.f32 %v7502_v39, %v4426_v7  ;;  %4391 = vst.msk [vmem:[#allocation2 + $0x118] sm:$0xff] %vm508_vm5, %v4355_v1 }
 0x33b   : > { %v4502_v43 = vmax.f32 %v4466_v57, 0.0 }
 0x33d   : > { %4538 = vst.msk [vmem:[%s7038_s19 + $0x110] sm:$0xff] %vm508_vm5, %v4502_v43 }
 0x340   : > { %v4427_v42 = vld [vmem:[#allocation2 + $0x118] sm:$0xff] }
 0x341   : > { %v4467_v50 = vadd.f32 %v7502_v39, %v4427_v42 }
 0x343   : > { %v4503_v46 = vmax.f32 %v4467_v50, 0.0 }
 0x345   : > { %4539 = vst.msk [vmem:[%s7038_s19 + $0x118] sm:$0xff] %vm508_vm5, %v4503_v46 }
 0x346 PF: > { %s13_s14 = sadd.s32 1, %s5689_s14   ;;  %s7628_s12 = smov %s5685_s13 }
 0x347   : > { %p10_p5 = scmp.ge.s32.totalorder %s13_s14, 4   ;;  %s7629_s13 = smov %s7631_s15 }
 0x349   :  { %12 = sbr.rel (!%p10_p5) target bundleno = 2 (0x2), region = 76 }

</bundles_post_ra>
